<compile_context>
chip_gen: v6e
topology: v6e:2x2x1
jax: 0.10.0
libtpu: 0.0.40
codegen_flags: <defaults>
</compile_context>

<pallas_src>
import functools

import jax
import jax.numpy as jnp
from jax.experimental import pallas as pl
from jax.experimental.pallas import tpu as pltpu

LANE = 128           # TPU lane width: every channel dim is zero-padded to this
LEAKY_SLOPE = 0.1    # darknet LeakyReLU slope (not PyTorch's default 0.01)

# MXU operand dtype.  bf16 is the native MXU dtype on v5e/v6e/v7x; accumulation
# stays f32 via preferred_element_type, and all elementwise epilogue math stays
# f32 (v5e has no bf16 VPU/EUP).
MATMUL_DTYPE = jnp.bfloat16


# ----------------------------------------------------------------------------
# In-kernel helpers (operate on values already resident in VMEM/vregs)
# ----------------------------------------------------------------------------

def _pool2x2(y):
    # 2x2 max pool via pairwise VPU maxima (no 5-D axis reduce).
    h, w, c = y.shape
    y = y.reshape(h, w // 2, 2, c)
    y = jnp.maximum(y[:, :, 0, :], y[:, :, 1, :])
    y = y.reshape(h // 2, 2, w // 2, c)
    return jnp.maximum(y[:, 0], y[:, 1])


def _upsample2x(x):
    # nearest-neighbor 2x upsample (in vregs)
    h, w, c = x.shape
    y = jnp.broadcast_to(x[:, None, :, None, :], (h, 2, w, 2, c))
    return y.reshape(2 * h, 2 * w, c)


def _leaky(y):
    return jnp.where(y > 0, y, LEAKY_SLOPE * y)


# ----------------------------------------------------------------------------
# Pallas kernels
# ----------------------------------------------------------------------------

def _conv_block_kernel(*refs, n_src, has_res, ksize, pad, upsample, leaky,
                       epilogue):
    """Fused conv block, one batch element per grid step.

    [route srcs written into channel segments] -> [2x nearest upsample] ->
    bf16 halo scratch in VMEM -> per-tap MXU matmuls accumulated in f32 ->
    bias -> leaky -> {residual add | 2x2 maxpool}* epilogue.

    refs = src_0..src_{n_src-1}, [res], w2d, b, out, acc_scratch, xp_scratch
    """
    idx = 0
    srcs = refs[:n_src]
    idx = n_src
    res_ref = refs[idx] if has_res else None
    idx += 1 if has_res else 0
    w_ref, b_ref, o_ref, acc_ref, xp_ref = refs[idx:idx + 5]

    hs, ws = srcs[0].shape[1], srcs[0].shape[2]
    hi, wi = (2 * hs, 2 * ws) if upsample else (hs, ws)
    cin = xp_ref.shape[-1]
    cout = w_ref.shape[1]
    hp, wp = hi + 2 * pad, wi + 2 * pad
    ho, wo = hp - ksize + 1, wp - ksize + 1

    # Zero only the 2*pad halo border (interior is fully overwritten below).
    # This is per-step but tiny, and stays correct under "parallel" batch
    # sharding / arbitrary iteration order (per-core scratches).
    if pad:
        xp_ref[pl.ds(0, pad), :, :] = jnp.zeros((pad, wp, cin), xp_ref.dtype)
        xp_ref[pl.ds(hp - pad, pad), :, :] = jnp.zeros((pad, wp, cin),
                                                       xp_ref.dtype)
        xp_ref[:, pl.ds(0, pad), :] = jnp.zeros((hp, pad, cin), xp_ref.dtype)
        xp_ref[:, pl.ds(wp - pad, pad), :] = jnp.zeros((hp, pad, cin),
                                                       xp_ref.dtype)

    # Write each route source directly into its 128-aligned channel segment of
    # the halo scratch (no jnp.concatenate materialization); the 2x upsample is
    # done in vregs per source and stored once.
    c_off = 0
    for s_ref in srcs:
        cs = s_ref.shape[-1]
        v = s_ref[0]
        if upsample:
            v = _upsample2x(v)
        xp_ref[pl.ds(pad, hi), pl.ds(pad, wi), pl.ds(c_off, cs)] = (
            v.astype(xp_ref.dtype))
        c_off += cs

    # Tap accumulation: one MXU matmul per (dh, dw) tap with K = cin (128 or
    # 256) accumulated into an f32 scratch -- no (Ho*Wo, K*K*Cin) im2col
    # matrix, ~K*K-times smaller VMEM footprint than the monolithic concat.
    for dh in range(ksize):
        for dw in range(ksize):
            t = dh * ksize + dw
            patch = xp_ref[pl.ds(dh, ho), pl.ds(dw, wo), :].reshape(
                ho * wo, cin)
            w_tap = w_ref[pl.ds(t * cin, cin), :]
            part = jnp.dot(patch, w_tap, preferred_element_type=jnp.float32)
            if t == 0:
                acc_ref[...] = part
            else:
                acc_ref[...] += part

    y = acc_ref[...] + b_ref[...]
    if leaky:
        y = _leaky(y)
    y = y.reshape(ho, wo, cout)

    for op in epilogue:
        if op == "res":
            y = y + res_ref[0]
        elif op == "pool":
            y = _pool2x2(y)
    o_ref[0] = y


def _se_scale_kernel(g_ref, s_ref, o_ref):
    # fused global avgpool (gate) + scale_channels, one batch element per step
    gate = jnp.mean(g_ref[...], axis=(1, 2), keepdims=True)   # (1,1,1,C)
    o_ref[...] = s_ref[...] * gate


def _fc_kernel(x_ref, w_ref, b_ref, o_ref):
    o_ref[...] = (jnp.dot(x_ref[...].astype(MATMUL_DTYPE), w_ref[...],
                          preferred_element_type=jnp.float32) + b_ref[...])


# --- standalone fallbacks (used only when a layer cannot be fused) -----------

def _maxpool_kernel(x_ref, o_ref):
    o_ref[0] = _pool2x2(x_ref[0])


def _avgpool_kernel(x_ref, o_ref):
    o_ref[...] = jnp.mean(x_ref[...], axis=(1, 2), keepdims=True)


def _upsample_kernel(x_ref, o_ref):
    o_ref[0] = _upsample2x(x_ref[0])


def _add_kernel(a_ref, b_ref, o_ref):
    o_ref[...] = a_ref[...] + b_ref[...]


def _scale_kernel(g_ref, s_ref, o_ref):
    o_ref[...] = s_ref[...] * g_ref[...]


# ----------------------------------------------------------------------------
# Wrappers (pallas_call plumbing)
# ----------------------------------------------------------------------------

def _full_spec(shape):
    nd = len(shape)
    return pl.BlockSpec(shape, lambda *_: (0,) * nd)


def _batch_spec(shape):
    nd = len(shape)
    return pl.BlockSpec((1,) + shape[1:], lambda i: (i,) + (0,) * (nd - 1))


_PAR = pltpu.CompilerParams(dimension_semantics=("parallel",))


def conv_block(srcs, layer, *, upsample=False, epilogue=(), residual=None):
    """Fused conv block; grid over batch so both v7x TensorCores get work."""
    w2d, b = layer["w2d"], layer["b"]
    k, pad, leaky = layer["ksize"], layer["pad"], layer["leaky"]
    n, h, w = srcs[0].shape[0], srcs[0].shape[1], srcs[0].shape[2]
    for s in srcs:
        assert s.shape[1] == h and s.shape[2] == w
    cin = sum(s.shape[3] for s in srcs)
    cout = w2d.shape[1]
    assert w2d.shape[0] == k * k * cin, (w2d.shape, k, cin)

    hi, wi = (2 * h, 2 * w) if upsample else (h, w)
    hp, wp = hi + 2 * pad, wi + 2 * pad
    ho, wo = hp - k + 1, wp - k + 1
    oh, ow = ho, wo
    if "pool" in epilogue:
        assert ho % 2 == 0 and wo % 2 == 0   # darknet cfgs use even sizes
        oh, ow = ho // 2, wo // 2
    has_res = residual is not None
    assert has_res == ("res" in epilogue)

    args = list(srcs)
    in_specs = [_batch_spec(s.shape) for s in srcs]
    if has_res:
        args.append(residual)
        in_specs.append(_batch_spec(residual.shape))
    args += [w2d, b]
    in_specs += [pl.BlockSpec(w2d.shape, lambda i: (0, 0)),
                 pl.BlockSpec(b.shape, lambda i: (0, 0))]

    kernel = functools.partial(
        _conv_block_kernel, n_src=len(srcs), has_res=has_res, ksize=k,
        pad=pad, upsample=upsample, leaky=leaky, epilogue=tuple(epilogue))

    # TODO(synk): at real darknet sizes, tile over output rows (haloed input
    # row window) and raise vmem_limit_bytes; full-image blocks are fine at
    # demo sizes (well under the 16 MiB v5e scoped default).
    return pl.pallas_call(
        kernel,
        out_shape=jax.ShapeDtypeStruct((n, oh, ow, cout), jnp.float32),
        grid=(n,),
        in_specs=in_specs,
        out_specs=pl.BlockSpec((1, oh, ow, cout), lambda i: (i, 0, 0, 0)),
        scratch_shapes=[pltpu.VMEM((ho * wo, cout), jnp.float32),   # f32 acc
                        pltpu.VMEM((hp, wp, cin), MATMUL_DTYPE)],   # bf16 halo
        compiler_params=_PAR,
    )(*args)


def se_scale(gate_in, src):
    # fused avgpool + scale_channels
    n = src.shape[0]
    return pl.pallas_call(
        _se_scale_kernel,
        out_shape=jax.ShapeDtypeStruct(src.shape, src.dtype),
        grid=(n,),
        in_specs=[_batch_spec(gate_in.shape), _batch_spec(src.shape)],
        out_specs=_batch_spec(src.shape),
        compiler_params=_PAR,
    )(gate_in, src)


def fc(x, layer):
    # Weight rows were built at build time in NHWC flatten order over ALL 128
    # padded channels (zero rows for dead channels), so the wrapper needs only
    # a pure layout-preserving reshape -- no lane slice / relayout op before
    # the matmul.  Output is 128-lane padded and sliced back afterwards.
    n, h, w, c = x.shape
    xf = x.reshape(n, h * w * c)
    w2d, b = layer["w2d"], layer["b"]
    assert w2d.shape[0] == h * w * c
    # N is tiny (batch) so the whole problem is one block; at real sizes this
    # fc typically follows a global avgpool (H*W == 1) so it stays small.
    y = pl.pallas_call(
        _fc_kernel,
        out_shape=jax.ShapeDtypeStruct((n, w2d.shape[1]), jnp.float32),
        in_specs=[_full_spec(xf.shape), _full_spec(w2d.shape),
                  _full_spec(b.shape)],
        out_specs=_full_spec((n, w2d.shape[1])),
    )(xf, w2d, b)
    return y[:, :layer["out_real"]]


def maxpool2x2(x):
    n, h, w, c = x.shape
    assert h % 2 == 0 and w % 2 == 0
    return pl.pallas_call(
        _maxpool_kernel,
        out_shape=jax.ShapeDtypeStruct((n, h // 2, w // 2, c), x.dtype),
        grid=(n,),
        in_specs=[_batch_spec(x.shape)],
        out_specs=pl.BlockSpec((1, h // 2, w // 2, c), lambda i: (i, 0, 0, 0)),
        compiler_params=_PAR,
    )(x)


def global_avgpool(x):
    n, h, w, c = x.shape
    return pl.pallas_call(
        _avgpool_kernel,
        out_shape=jax.ShapeDtypeStruct((n, 1, 1, c), x.dtype),
        grid=(n,),
        in_specs=[_batch_spec(x.shape)],
        out_specs=pl.BlockSpec((1, 1, 1, c), lambda i: (i, 0, 0, 0)),
        compiler_params=_PAR,
    )(x)


def upsample2x(x):
    n, h, w, c = x.shape
    return pl.pallas_call(
        _upsample_kernel,
        out_shape=jax.ShapeDtypeStruct((n, 2 * h, 2 * w, c), x.dtype),
        grid=(n,),
        in_specs=[_batch_spec(x.shape)],
        out_specs=pl.BlockSpec((1, 2 * h, 2 * w, c), lambda i: (i, 0, 0, 0)),
        compiler_params=_PAR,
    )(x)


def shortcut_add(x, src, *, alias=False):
    # Only aliases/overwrites x's buffer when the caller proved that cached
    # tensor is never referenced again (see `referenced` in forward()).
    n = x.shape[0]
    extra = {"input_output_aliases": {0: 0}} if alias else {}
    return pl.pallas_call(
        _add_kernel,
        out_shape=jax.ShapeDtypeStruct(x.shape, x.dtype),
        grid=(n,),
        in_specs=[_batch_spec(x.shape), _batch_spec(src.shape)],
        out_specs=_batch_spec(x.shape),
        compiler_params=_PAR,
        **extra,
    )(x, src)


def scale_channels(x, src):
    # x: (N,1,1,C) gate, src: (N,H,W,C)
    n = src.shape[0]
    return pl.pallas_call(
        _scale_kernel,
        out_shape=jax.ShapeDtypeStruct(src.shape, src.dtype),
        grid=(n,),
        in_specs=[_batch_spec(x.shape), _batch_spec(src.shape)],
        out_specs=_batch_spec(src.shape),
        compiler_params=_PAR,
    )(x, src)


# ----------------------------------------------------------------------------
# Peephole fusion over the cfg layer list
# ----------------------------------------------------------------------------

def _abs_idx(r, i):
    return r if r >= 0 else i + r


def _referenced_indices(module_list):
    refs = set()
    for i, layer in enumerate(module_list):
        t = layer["type"]
        if t in ("shortcut", "scale_channels"):
            refs.add(_abs_idx(layer["from"], i))
        elif t == "route":
            refs.update(_abs_idx(li, i) for li in layer["layers"])
    return refs


def _match_conv_block(module_list, i, referenced):
    """Match [route] [upsample] convolutional {maxpool | shortcut}* at i.
    A layer is only absorbed when the preceding intermediate output is never
    referenced later, so cache_outputs indexing stays consistent."""
    n = len(module_list)
    j = i
    srcs_idx = None
    upsample = False
    t = module_list[j]["type"]
    if t == "route":
        if j in referenced or j + 1 >= n:
            return None
        nxt = module_list[j + 1]["type"]
        if nxt == "convolutional":
            srcs_idx = [_abs_idx(li, j) for li in module_list[j]["layers"]]
            j += 1
        elif (nxt == "upsample" and (j + 1) not in referenced and j + 2 < n
              and module_list[j + 2]["type"] == "convolutional"):
            srcs_idx = [_abs_idx(li, j) for li in module_list[j]["layers"]]
            upsample = True
            j += 2
        else:
            return None
    elif t == "upsample":
        if (j in referenced or j + 1 >= n
                or module_list[j + 1]["type"] != "convolutional"):
            return None
        upsample = True
        j += 1
    if module_list[j]["type"] != "convolutional":
        return None
    conv = module_list[j]

    epilogue = []
    res_idx = None
    last = j
    while last + 1 < n and last not in referenced:
        nxt = module_list[last + 1]
        if nxt["type"] == "maxpool":
            epilogue.append("pool")
            last += 1
        elif nxt["type"] == "shortcut" and res_idx is None:
            res_idx = _abs_idx(nxt["from"], last + 1)
            epilogue.append("res")
            last += 1
        else:
            break
    return last, srcs_idx, upsample, conv, tuple(epilogue), res_idx


def forward(x, module_list, target=None):
    """Mirrors AnyModel.forward (quant=False so QuantStub/DeQuantStub are
    identities) with a peephole fusion pass over the layer list."""
    referenced = _referenced_indices(module_list)
    n = len(module_list)
    cache_outputs = [None] * n
    outputs = []   # is_output() is always False in the reference model
    i = 0
    while i < n:
        layer = module_list[i]
        t = layer["type"]

        if t in ("convolutional", "route", "upsample"):
            blk = _match_conv_block(module_list, i, referenced)
            if blk is not None:
                last, srcs_idx, ups, conv, epilogue, res_idx = blk
                srcs = ([x] if srcs_idx is None
                        else [cache_outputs[s] for s in srcs_idx])
                res = cache_outputs[res_idx] if res_idx is not None else None
                x = conv_block(srcs, conv, upsample=ups, epilogue=epilogue,
                               residual=res)
                cache_outputs[last] = x
                i = last + 1
                continue

        if (t == "avgpool" and i + 1 < n and i not in referenced
                and module_list[i + 1]["type"] == "scale_channels"):
            src = cache_outputs[_abs_idx(module_list[i + 1]["from"], i + 1)]
            x = se_scale(x, src)
            cache_outputs[i + 1] = x
            i += 2
            continue

        # ------- unfused single layers ---------------------------------
        if t == "fc":
            x = fc(x, layer)
        elif t == "maxpool":
            x = maxpool2x2(x)
        elif t == "avgpool":
            x = global_avgpool(x)
        elif t == "upsample":
            x = upsample2x(x)
        elif t == "shortcut":
            # only donate x's buffer when its cache slot (i-1) is dead
            alias_ok = i > 0 and (i - 1) not in referenced
            x = shortcut_add(x, cache_outputs[_abs_idx(layer["from"], i)],
                             alias=alias_ok)
        elif t == "scale_channels":
            x = scale_channels(x, cache_outputs[_abs_idx(layer["from"], i)])
        elif t == "route":
            x = jnp.concatenate(
                [cache_outputs[_abs_idx(li, i)] for li in layer["layers"]],
                axis=-1)
        elif t == "convolutional":
            x = conv_block([x], layer)
        else:
            # TODO(synk): 'yolo' layers come from the external Parser and are
            # not reproducible here.
            raise ValueError("unknown layer type: %s" % t)
        cache_outputs[i] = x
        i += 1

    num_outputs = len(outputs)
    if num_outputs == 0:
        outputs = cache_outputs[-1]
    elif num_outputs == 1:
        outputs = outputs[0]
    return outputs


# ----------------------------------------------------------------------------
# Synthetic "cfg" with weights pre-padded to the lane-dense layout
# ----------------------------------------------------------------------------

def _conv_params(key, kh, kw, cin, cout):
    kw_, kb = jax.random.split(key)
    w = jax.random.normal(kw_, (kh, kw, cin, cout), jnp.float32) / jnp.sqrt(
        float(kh * kw * cin))
    b = jax.random.normal(kb, (1, cout), jnp.float32) * 0.01
    return w, b


def _pad_conv(w, b, cin_segments, cin_pad, cout_pad=LANE):
    """Zero-pad a (KH,KW,Cin,Cout) weight into the 128-lane padded channel
    layout of its input (cin_segments = [(offset_in_padded_input, count)]) and
    reshape to the (KH*KW*Cin_pad, Cout_pad) tap-major form (all free at build
    time).  Weights are stored in the MXU dtype (bf16); biases stay f32."""
    kh, kw, cin, cout = w.shape
    wp = jnp.zeros((kh, kw, cin_pad, cout_pad), w.dtype)
    row = 0
    for off, cnt in cin_segments:
        wp = wp.at[:, :, off:off + cnt, :cout].set(w[:, :, row:row + cnt, :])
        row += cnt
    assert row == cin
    bp = jnp.pad(b, ((0, 0), (0, cout_pad - cout)))
    return (wp.reshape(kh * kw * cin_pad, cout_pad).astype(MATMUL_DTYPE), bp)


def build_model(key, cin=4, h=16, w=16, num_out=10):
    ks = jax.random.split(key, 8)
    w0, b0 = _conv_params(ks[0], 3, 3, cin, 8)
    w2, b2 = _conv_params(ks[1], 1, 1, 8, 8)
    w8, b8 = _conv_params(ks[2], 3, 3, 16, 8)
    d_fc = 8 * h * w
    wf = jax.random.normal(ks[3], (d_fc, num_out), jnp.float32) / jnp.sqrt(
        float(d_fc))
    bf = jax.random.normal(ks[4], (1, num_out), jnp.float32) * 0.01

    w0p, b0p = _pad_conv(w0, b0, [(0, cin)], LANE)
    w2p, b2p = _pad_conv(w2, b2, [(0, 8)], LANE)
    # layer 8's input is route([3, 5]): two 128-padded tensors with 8 real
    # channels each -> real weight rows live at padded offsets 0 and 128.
    w8p, b8p = _pad_conv(w8, b8, [(0, 8), (LANE, 8)], 2 * LANE)
    # fc: fold the NCHW flatten into the weight rows (NHWC order) and also
    # zero-pad the dead-channel rows to the full 128-lane layout, so the
    # runtime needs only a pure reshape of the padded activation (no slice).
    wf4 = jnp.transpose(wf.reshape(8, h, w, num_out), (1, 2, 0, 3))  # (H,W,C,O)
    wf4 = jnp.pad(wf4, ((0, 0), (0, 0), (0, LANE - 8), (0, 0)))      # (H,W,128,O)
    wfp = wf4.reshape(h * w * LANE, num_out)
    wfp = jnp.pad(wfp, ((0, 0), (0, LANE - num_out))).astype(MATMUL_DTYPE)
    bfp = jnp.pad(bf, ((0, 0), (0, LANE - num_out)))

    return [
        {"type": "convolutional", "w2d": w0p, "b": b0p, "ksize": 3, "pad": 1,
         "leaky": True},
        {"type": "maxpool"},
        {"type": "convolutional", "w2d": w2p, "b": b2p, "ksize": 1, "pad": 0,
         "leaky": True},
        {"type": "shortcut", "from": -2},
        {"type": "avgpool"},
        {"type": "scale_channels", "from": -2},
        {"type": "route", "layers": [3, 5]},
        {"type": "upsample"},
        {"type": "convolutional", "w2d": w8p, "b": b8p, "ksize": 3, "pad": 1,
         "leaky": True},
        {"type": "fc", "w2d": wfp, "b": bfp, "out_real": num_out},
    ]


# ----------------------------------------------------------------------------

if __name__ == "__main__":
    key = jax.random.PRNGKey(0)
    kx, kp = jax.random.split(key)

    # PyTorch-style NCHW input -> NHWC (channels on the lane axis), zero-padded
    # once to 128 lanes at the boundary.
    x_nchw = jax.random.normal(kx, (2, 4, 16, 16), jnp.float32)
    x = jnp.transpose(x_nchw, (0, 2, 3, 1))
    x = jnp.pad(x, ((0, 0), (0, 0), (0, 0), (0, LANE - x.shape[-1])))

    module_list = build_model(kp, cin=4, h=16, w=16, num_out=10)
    out = forward(x, module_list)
    out = jax.block_until_ready(out)

    assert out.shape == (2, 10), out.shape
    assert bool(jnp.all(jnp.isfinite(out)))
    print("KERNEL_OK")
</pallas_src>

<mosaic_0001>
module attributes {stable_mosaic.version = 11 : i64} {
  func.func @_conv_block_kernel(%arg0: i32, %arg1: memref<1x16x16x128xf32, #tpu.memory_space<vmem>>, %arg2: memref<1152x128xbf16, #tpu.memory_space<vmem>>, %arg3: memref<1x128xf32, #tpu.memory_space<vmem>>, %arg4: memref<1x8x8x128xf32, #tpu.memory_space<vmem>>, %arg5: memref<256x128xf32, #tpu.memory_space<vmem>>, %arg6: memref<18x18x128xbf16, #tpu.memory_space<vmem>>) attributes {dimension_semantics = [#tpu.dimension_semantics<parallel>], iteration_bounds = array<i64: 2>, scalar_prefetch = 0 : i64, scratch_operands = 2 : i64, tpu.core_type = #tpu.core_type<tc>, window_params = [{transform_indices = @transform_0, window_bounds = array<i64: 1, 16, 16, 128>}, {pipeline_mode = #tpu.pipeline_mode<synchronous>, transform_indices = @transform_1, window_bounds = array<i64: 1152, 128>}, {pipeline_mode = #tpu.pipeline_mode<synchronous>, transform_indices = @transform_2, window_bounds = array<i64: 1, 128>}, {transform_indices = @transform_3, window_bounds = array<i64: 1, 8, 8, 128>}]} {
    %cst = arith.constant 0.000000e+00 : bf16
    %0 = vector.broadcast %cst : bf16 to vector<1x18x128xbf16>
    %c0 = arith.constant 0 : index
    %c0_0 = arith.constant 0 : index
    %c0_1 = arith.constant 0 : index
    %1 = vector.load %arg6[%c0, %c0_0, %c0_1] : memref<18x18x128xbf16, #tpu.memory_space<vmem>>, vector<1x18x128xbf16>
    tpu.vector_store %arg6[%c0, %c0_0, %c0_1], %0 {strides = array<i32>} : memref<18x18x128xbf16, #tpu.memory_space<vmem>>, vector<1x18x128xbf16>,
    %cst_2 = arith.constant 0.000000e+00 : bf16
    %2 = vector.broadcast %cst_2 : bf16 to vector<1x18x128xbf16>
    %c17 = arith.constant 17 : index
    %c0_3 = arith.constant 0 : index
    %c0_4 = arith.constant 0 : index
    %3 = vector.load %arg6[%c17, %c0_3, %c0_4] : memref<18x18x128xbf16, #tpu.memory_space<vmem>>, vector<1x18x128xbf16>
    tpu.vector_store %arg6[%c17, %c0_3, %c0_4], %2 {strides = array<i32>} : memref<18x18x128xbf16, #tpu.memory_space<vmem>>, vector<1x18x128xbf16>,
    %cst_5 = arith.constant 0.000000e+00 : bf16
    %4 = vector.broadcast %cst_5 : bf16 to vector<18x1x128xbf16>
    %c0_6 = arith.constant 0 : index
    %c0_7 = arith.constant 0 : index
    %c0_8 = arith.constant 0 : index
    %5 = vector.load %arg6[%c0_6, %c0_7, %c0_8] : memref<18x18x128xbf16, #tpu.memory_space<vmem>>, vector<18x1x128xbf16>
    tpu.vector_store %arg6[%c0_6, %c0_7, %c0_8], %4 {strides = array<i32>} : memref<18x18x128xbf16, #tpu.memory_space<vmem>>, vector<18x1x128xbf16>,
    %cst_9 = arith.constant 0.000000e+00 : bf16
    %6 = vector.broadcast %cst_9 : bf16 to vector<18x1x128xbf16>
    %c0_10 = arith.constant 0 : index
    %c17_11 = arith.constant 17 : index
    %c0_12 = arith.constant 0 : index
    %7 = vector.load %arg6[%c0_10, %c17_11, %c0_12] : memref<18x18x128xbf16, #tpu.memory_space<vmem>>, vector<18x1x128xbf16>
    tpu.vector_store %arg6[%c0_10, %c17_11, %c0_12], %6 {strides = array<i32>} : memref<18x18x128xbf16, #tpu.memory_space<vmem>>, vector<18x1x128xbf16>,
    %c0_13 = arith.constant 0 : index
    %c0_14 = arith.constant 0 : index
    %c0_15 = arith.constant 0 : index
    %c0_16 = arith.constant 0 : index
    %8 = vector.load %arg1[%c0_13, %c0_14, %c0_15, %c0_16] : memref<1x16x16x128xf32, #tpu.memory_space<vmem>>, vector<1x16x16x128xf32>
    %9 = vector.shape_cast %8 : vector<1x16x16x128xf32> to vector<16x16x128xf32>
    %10 = arith.truncf %9 : vector<16x16x128xf32> to vector<16x16x128xbf16>
    %c1 = arith.constant 1 : index
    %c1_17 = arith.constant 1 : index
    %c0_18 = arith.constant 0 : index
    %11 = vector.load %arg6[%c1, %c1_17, %c0_18] : memref<18x18x128xbf16, #tpu.memory_space<vmem>>, vector<16x16x128xbf16>
    tpu.vector_store %arg6[%c1, %c1_17, %c0_18], %10 {strides = array<i32>} : memref<18x18x128xbf16, #tpu.memory_space<vmem>>, vector<16x16x128xbf16>,
    %c0_19 = arith.constant 0 : index
    %c0_20 = arith.constant 0 : index
    %c0_21 = arith.constant 0 : index
    %12 = vector.load %arg6[%c0_19, %c0_20, %c0_21] : memref<18x18x128xbf16, #tpu.memory_space<vmem>>, vector<16x16x128xbf16>
    %13 = vector.shape_cast %12 : vector<16x16x128xbf16> to vector<256x128xbf16>
    %c0_22 = arith.constant 0 : index
    %c0_23 = arith.constant 0 : index
    %14 = vector.load %arg2[%c0_22, %c0_23] : memref<1152x128xbf16, #tpu.memory_space<vmem>>, vector<128x128xbf16>
    %cst_24 = arith.constant dense<0.000000e+00> : vector<256x128xf32>
    %15 = tpu.matmul %13, %14, %cst_24 {dimension_numbers = #tpu.dot_dimension_numbers<[1], [0], [0], [1], [0, 0, 1, 1], [], []>} : vector<256x128xbf16>, vector<128x128xbf16>, vector<256x128xf32> -> vector<256x128xf32>
    %c0_25 = arith.constant 0 : index
    %c0_26 = arith.constant 0 : index
    %16 = vector.load %arg5[%c0_25, %c0_26] : memref<256x128xf32, #tpu.memory_space<vmem>>, vector<256x128xf32>
    tpu.vector_store %arg5[%c0_25, %c0_26], %15 {strides = array<i32>} : memref<256x128xf32, #tpu.memory_space<vmem>>, vector<256x128xf32>,
    %c0_27 = arith.constant 0 : index
    %c1_28 = arith.constant 1 : index
    %c0_29 = arith.constant 0 : index
    %17 = vector.load %arg6[%c0_27, %c1_28, %c0_29] : memref<18x18x128xbf16, #tpu.memory_space<vmem>>, vector<16x16x128xbf16>
    %18 = vector.shape_cast %17 : vector<16x16x128xbf16> to vector<256x128xbf16>
    %c128 = arith.constant 128 : index
    %c0_30 = arith.constant 0 : index
    %19 = vector.load %arg2[%c128, %c0_30] : memref<1152x128xbf16, #tpu.memory_space<vmem>>, vector<128x128xbf16>
    %cst_31 = arith.constant dense<0.000000e+00> : vector<256x128xf32>
    %20 = tpu.matmul %18, %19, %cst_31 {dimension_numbers = #tpu.dot_dimension_numbers<[1], [0], [0], [1], [0, 0, 1, 1], [], []>} : vector<256x128xbf16>, vector<128x128xbf16>, vector<256x128xf32> -> vector<256x128xf32>
    %c0_32 = arith.constant 0 : index
    %c0_33 = arith.constant 0 : index
    %21 = vector.load %arg5[%c0_32, %c0_33] : memref<256x128xf32, #tpu.memory_space<vmem>>, vector<256x128xf32>
    %22 = arith.addf %21, %20 : vector<256x128xf32>
    %c0_34 = arith.constant 0 : index
    %c0_35 = arith.constant 0 : index
    %23 = vector.load %arg5[%c0_34, %c0_35] : memref<256x128xf32, #tpu.memory_space<vmem>>, vector<256x128xf32>
    tpu.vector_store %arg5[%c0_34, %c0_35], %22 {strides = array<i32>} : memref<256x128xf32, #tpu.memory_space<vmem>>, vector<256x128xf32>,
    %c0_36 = arith.constant 0 : index
    %c2 = arith.constant 2 : index
    %c0_37 = arith.constant 0 : index
    %24 = vector.load %arg6[%c0_36, %c2, %c0_37] : memref<18x18x128xbf16, #tpu.memory_space<vmem>>, vector<16x16x128xbf16>
    %25 = vector.shape_cast %24 : vector<16x16x128xbf16> to vector<256x128xbf16>
    %c256 = arith.constant 256 : index
    %c0_38 = arith.constant 0 : index
    %26 = vector.load %arg2[%c256, %c0_38] : memref<1152x128xbf16, #tpu.memory_space<vmem>>, vector<128x128xbf16>
    %cst_39 = arith.constant dense<0.000000e+00> : vector<256x128xf32>
    %27 = tpu.matmul %25, %26, %cst_39 {dimension_numbers = #tpu.dot_dimension_numbers<[1], [0], [0], [1], [0, 0, 1, 1], [], []>} : vector<256x128xbf16>, vector<128x128xbf16>, vector<256x128xf32> -> vector<256x128xf32>
    %c0_40 = arith.constant 0 : index
    %c0_41 = arith.constant 0 : index
    %28 = vector.load %arg5[%c0_40, %c0_41] : memref<256x128xf32, #tpu.memory_space<vmem>>, vector<256x128xf32>
    %29 = arith.addf %28, %27 : vector<256x128xf32>
    %c0_42 = arith.constant 0 : index
    %c0_43 = arith.constant 0 : index
    %30 = vector.load %arg5[%c0_42, %c0_43] : memref<256x128xf32, #tpu.memory_space<vmem>>, vector<256x128xf32>
    tpu.vector_store %arg5[%c0_42, %c0_43], %29 {strides = array<i32>} : memref<256x128xf32, #tpu.memory_space<vmem>>, vector<256x128xf32>,
    %c1_44 = arith.constant 1 : index
    %c0_45 = arith.constant 0 : index
    %c0_46 = arith.constant 0 : index
    %31 = vector.load %arg6[%c1_44, %c0_45, %c0_46] : memref<18x18x128xbf16, #tpu.memory_space<vmem>>, vector<16x16x128xbf16>
    %32 = vector.shape_cast %31 : vector<16x16x128xbf16> to vector<256x128xbf16>
    %c384 = arith.constant 384 : index
    %c0_47 = arith.constant 0 : index
    %33 = vector.load %arg2[%c384, %c0_47] : memref<1152x128xbf16, #tpu.memory_space<vmem>>, vector<128x128xbf16>
    %cst_48 = arith.constant dense<0.000000e+00> : vector<256x128xf32>
    %34 = tpu.matmul %32, %33, %cst_48 {dimension_numbers = #tpu.dot_dimension_numbers<[1], [0], [0], [1], [0, 0, 1, 1], [], []>} : vector<256x128xbf16>, vector<128x128xbf16>, vector<256x128xf32> -> vector<256x128xf32>
    %c0_49 = arith.constant 0 : index
    %c0_50 = arith.constant 0 : index
    %35 = vector.load %arg5[%c0_49, %c0_50] : memref<256x128xf32, #tpu.memory_space<vmem>>, vector<256x128xf32>
    %36 = arith.addf %35, %34 : vector<256x128xf32>
    %c0_51 = arith.constant 0 : index
    %c0_52 = arith.constant 0 : index
    %37 = vector.load %arg5[%c0_51, %c0_52] : memref<256x128xf32, #tpu.memory_space<vmem>>, vector<256x128xf32>
    tpu.vector_store %arg5[%c0_51, %c0_52], %36 {strides = array<i32>} : memref<256x128xf32, #tpu.memory_space<vmem>>, vector<256x128xf32>,
    %c1_53 = arith.constant 1 : index
    %c1_54 = arith.constant 1 : index
    %c0_55 = arith.constant 0 : index
    %38 = vector.load %arg6[%c1_53, %c1_54, %c0_55] : memref<18x18x128xbf16, #tpu.memory_space<vmem>>, vector<16x16x128xbf16>
    %39 = vector.shape_cast %38 : vector<16x16x128xbf16> to vector<256x128xbf16>
    %c512 = arith.constant 512 : index
    %c0_56 = arith.constant 0 : index
    %40 = vector.load %arg2[%c512, %c0_56] : memref<1152x128xbf16, #tpu.memory_space<vmem>>, vector<128x128xbf16>
    %cst_57 = arith.constant dense<0.000000e+00> : vector<256x128xf32>
    %41 = tpu.matmul %39, %40, %cst_57 {dimension_numbers = #tpu.dot_dimension_numbers<[1], [0], [0], [1], [0, 0, 1, 1], [], []>} : vector<256x128xbf16>, vector<128x128xbf16>, vector<256x128xf32> -> vector<256x128xf32>
    %c0_58 = arith.constant 0 : index
    %c0_59 = arith.constant 0 : index
    %42 = vector.load %arg5[%c0_58, %c0_59] : memref<256x128xf32, #tpu.memory_space<vmem>>, vector<256x128xf32>
    %43 = arith.addf %42, %41 : vector<256x128xf32>
    %c0_60 = arith.constant 0 : index
    %c0_61 = arith.constant 0 : index
    %44 = vector.load %arg5[%c0_60, %c0_61] : memref<256x128xf32, #tpu.memory_space<vmem>>, vector<256x128xf32>
    tpu.vector_store %arg5[%c0_60, %c0_61], %43 {strides = array<i32>} : memref<256x128xf32, #tpu.memory_space<vmem>>, vector<256x128xf32>,
    %c1_62 = arith.constant 1 : index
    %c2_63 = arith.constant 2 : index
    %c0_64 = arith.constant 0 : index
    %45 = vector.load %arg6[%c1_62, %c2_63, %c0_64] : memref<18x18x128xbf16, #tpu.memory_space<vmem>>, vector<16x16x128xbf16>
    %46 = vector.shape_cast %45 : vector<16x16x128xbf16> to vector<256x128xbf16>
    %c640 = arith.constant 640 : index
    %c0_65 = arith.constant 0 : index
    %47 = vector.load %arg2[%c640, %c0_65] : memref<1152x128xbf16, #tpu.memory_space<vmem>>, vector<128x128xbf16>
    %cst_66 = arith.constant dense<0.000000e+00> : vector<256x128xf32>
    %48 = tpu.matmul %46, %47, %cst_66 {dimension_numbers = #tpu.dot_dimension_numbers<[1], [0], [0], [1], [0, 0, 1, 1], [], []>} : vector<256x128xbf16>, vector<128x128xbf16>, vector<256x128xf32> -> vector<256x128xf32>
    %c0_67 = arith.constant 0 : index
    %c0_68 = arith.constant 0 : index
    %49 = vector.load %arg5[%c0_67, %c0_68] : memref<256x128xf32, #tpu.memory_space<vmem>>, vector<256x128xf32>
    %50 = arith.addf %49, %48 : vector<256x128xf32>
    %c0_69 = arith.constant 0 : index
    %c0_70 = arith.constant 0 : index
    %51 = vector.load %arg5[%c0_69, %c0_70] : memref<256x128xf32, #tpu.memory_space<vmem>>, vector<256x128xf32>
    tpu.vector_store %arg5[%c0_69, %c0_70], %50 {strides = array<i32>} : memref<256x128xf32, #tpu.memory_space<vmem>>, vector<256x128xf32>,
    %c2_71 = arith.constant 2 : index
    %c0_72 = arith.constant 0 : index
    %c0_73 = arith.constant 0 : index
    %52 = vector.load %arg6[%c2_71, %c0_72, %c0_73] : memref<18x18x128xbf16, #tpu.memory_space<vmem>>, vector<16x16x128xbf16>
    %53 = vector.shape_cast %52 : vector<16x16x128xbf16> to vector<256x128xbf16>
    %c768 = arith.constant 768 : index
    %c0_74 = arith.constant 0 : index
    %54 = vector.load %arg2[%c768, %c0_74] : memref<1152x128xbf16, #tpu.memory_space<vmem>>, vector<128x128xbf16>
    %cst_75 = arith.constant dense<0.000000e+00> : vector<256x128xf32>
    %55 = tpu.matmul %53, %54, %cst_75 {dimension_numbers = #tpu.dot_dimension_numbers<[1], [0], [0], [1], [0, 0, 1, 1], [], []>} : vector<256x128xbf16>, vector<128x128xbf16>, vector<256x128xf32> -> vector<256x128xf32>
    %c0_76 = arith.constant 0 : index
    %c0_77 = arith.constant 0 : index
    %56 = vector.load %arg5[%c0_76, %c0_77] : memref<256x128xf32, #tpu.memory_space<vmem>>, vector<256x128xf32>
    %57 = arith.addf %56, %55 : vector<256x128xf32>
    %c0_78 = arith.constant 0 : index
    %c0_79 = arith.constant 0 : index
    %58 = vector.load %arg5[%c0_78, %c0_79] : memref<256x128xf32, #tpu.memory_space<vmem>>, vector<256x128xf32>
    tpu.vector_store %arg5[%c0_78, %c0_79], %57 {strides = array<i32>} : memref<256x128xf32, #tpu.memory_space<vmem>>, vector<256x128xf32>,
    %c2_80 = arith.constant 2 : index
    %c1_81 = arith.constant 1 : index
    %c0_82 = arith.constant 0 : index
    %59 = vector.load %arg6[%c2_80, %c1_81, %c0_82] : memref<18x18x128xbf16, #tpu.memory_space<vmem>>, vector<16x16x128xbf16>
    %60 = vector.shape_cast %59 : vector<16x16x128xbf16> to vector<256x128xbf16>
    %c896 = arith.constant 896 : index
    %c0_83 = arith.constant 0 : index
    %61 = vector.load %arg2[%c896, %c0_83] : memref<1152x128xbf16, #tpu.memory_space<vmem>>, vector<128x128xbf16>
    %cst_84 = arith.constant dense<0.000000e+00> : vector<256x128xf32>
    %62 = tpu.matmul %60, %61, %cst_84 {dimension_numbers = #tpu.dot_dimension_numbers<[1], [0], [0], [1], [0, 0, 1, 1], [], []>} : vector<256x128xbf16>, vector<128x128xbf16>, vector<256x128xf32> -> vector<256x128xf32>
    %c0_85 = arith.constant 0 : index
    %c0_86 = arith.constant 0 : index
    %63 = vector.load %arg5[%c0_85, %c0_86] : memref<256x128xf32, #tpu.memory_space<vmem>>, vector<256x128xf32>
    %64 = arith.addf %63, %62 : vector<256x128xf32>
    %c0_87 = arith.constant 0 : index
    %c0_88 = arith.constant 0 : index
    %65 = vector.load %arg5[%c0_87, %c0_88] : memref<256x128xf32, #tpu.memory_space<vmem>>, vector<256x128xf32>
    tpu.vector_store %arg5[%c0_87, %c0_88], %64 {strides = array<i32>} : memref<256x128xf32, #tpu.memory_space<vmem>>, vector<256x128xf32>,
    %c2_89 = arith.constant 2 : index
    %c2_90 = arith.constant 2 : index
    %c0_91 = arith.constant 0 : index
    %66 = vector.load %arg6[%c2_89, %c2_90, %c0_91] : memref<18x18x128xbf16, #tpu.memory_space<vmem>>, vector<16x16x128xbf16>
    %67 = vector.shape_cast %66 : vector<16x16x128xbf16> to vector<256x128xbf16>
    %c1024 = arith.constant 1024 : index
    %c0_92 = arith.constant 0 : index
    %68 = vector.load %arg2[%c1024, %c0_92] : memref<1152x128xbf16, #tpu.memory_space<vmem>>, vector<128x128xbf16>
    %cst_93 = arith.constant dense<0.000000e+00> : vector<256x128xf32>
    %69 = tpu.matmul %67, %68, %cst_93 {dimension_numbers = #tpu.dot_dimension_numbers<[1], [0], [0], [1], [0, 0, 1, 1], [], []>} : vector<256x128xbf16>, vector<128x128xbf16>, vector<256x128xf32> -> vector<256x128xf32>
    %c0_94 = arith.constant 0 : index
    %c0_95 = arith.constant 0 : index
    %70 = vector.load %arg5[%c0_94, %c0_95] : memref<256x128xf32, #tpu.memory_space<vmem>>, vector<256x128xf32>
    %71 = arith.addf %70, %69 : vector<256x128xf32>
    %c0_96 = arith.constant 0 : index
    %c0_97 = arith.constant 0 : index
    %72 = vector.load %arg5[%c0_96, %c0_97] : memref<256x128xf32, #tpu.memory_space<vmem>>, vector<256x128xf32>
    tpu.vector_store %arg5[%c0_96, %c0_97], %71 {strides = array<i32>} : memref<256x128xf32, #tpu.memory_space<vmem>>, vector<256x128xf32>,
    %c0_98 = arith.constant 0 : index
    %c0_99 = arith.constant 0 : index
    %73 = vector.load %arg5[%c0_98, %c0_99] : memref<256x128xf32, #tpu.memory_space<vmem>>, vector<256x128xf32>
    %c0_100 = arith.constant 0 : index
    %c0_101 = arith.constant 0 : index
    %74 = vector.load %arg3[%c0_100, %c0_101] : memref<1x128xf32, #tpu.memory_space<vmem>>, vector<1x128xf32>
    %75 = vector.broadcast %74 : vector<1x128xf32> to vector<256x128xf32>
    %76 = arith.addf %73, %75 : vector<256x128xf32>
    %cst_102 = arith.constant 0.000000e+00 : f32
    %77 = vector.broadcast %cst_102 : f32 to vector<256x128xf32>
    %78 = arith.cmpf ogt, %76, %77 : vector<256x128xf32>
    %cst_103 = arith.constant 1.000000e-01 : f32
    %79 = vector.broadcast %cst_103 : f32 to vector<256x128xf32>
    %80 = arith.mulf %79, %76 : vector<256x128xf32>
    %81 = arith.select %78, %76, %80 : vector<256x128xi1>, vector<256x128xf32>
    %82 = vector.shape_cast %81 : vector<256x128xf32> to vector<16x16x128xf32>
    %83 = vector.shape_cast %82 : vector<16x16x128xf32> to vector<16x8x2x128xf32>
    %84 = vector.extract_strided_slice %83 {offsets = [0, 0, 0, 0], sizes = [16, 8, 1, 128], strides = [1, 1, 1, 1]} : vector<16x8x2x128xf32> to vector<16x8x1x128xf32>
    %85 = vector.shape_cast %84 : vector<16x8x1x128xf32> to vector<16x8x128xf32>
    %86 = vector.extract_strided_slice %83 {offsets = [0, 0, 1, 0], sizes = [16, 8, 1, 128], strides = [1, 1, 1, 1]} : vector<16x8x2x128xf32> to vector<16x8x1x128xf32>
    %87 = vector.shape_cast %86 : vector<16x8x1x128xf32> to vector<16x8x128xf32>
    %88 = arith.maximumf %85, %87 : vector<16x8x128xf32>
    %89 = vector.shape_cast %88 : vector<16x8x128xf32> to vector<8x2x8x128xf32>
    %90 = vector.extract_strided_slice %89 {offsets = [0, 0, 0, 0], sizes = [8, 1, 8, 128], strides = [1, 1, 1, 1]} : vector<8x2x8x128xf32> to vector<8x1x8x128xf32>
    %91 = vector.shape_cast %90 : vector<8x1x8x128xf32> to vector<8x8x128xf32>
    %92 = vector.extract_strided_slice %89 {offsets = [0, 1, 0, 0], sizes = [8, 1, 8, 128], strides = [1, 1, 1, 1]} : vector<8x2x8x128xf32> to vector<8x1x8x128xf32>
    %93 = vector.shape_cast %92 : vector<8x1x8x128xf32> to vector<8x8x128xf32>
    %94 = arith.maximumf %91, %93 : vector<8x8x128xf32>
    %c0_104 = arith.constant 0 : index
    %c0_105 = arith.constant 0 : index
    %c0_106 = arith.constant 0 : index
    %c0_107 = arith.constant 0 : index
    %95 = vector.load %arg4[%c0_104, %c0_105, %c0_106, %c0_107] : memref<1x8x8x128xf32, #tpu.memory_space<vmem>>, vector<1x8x8x128xf32>
    %96 = vector.shape_cast %95 : vector<1x8x8x128xf32> to vector<8x8x128xf32>
    %97 = vector.shape_cast %94 : vector<8x8x128xf32> to vector<1x8x8x128xf32>
    tpu.vector_store %arg4[%c0_104, %c0_105, %c0_106, %c0_107], %97 {strides = array<i32>} : memref<1x8x8x128xf32, #tpu.memory_space<vmem>>, vector<1x8x8x128xf32>,
    return
  }
  func.func @transform_0(%arg0: i32) -> (i32, i32, i32, i32) {
    %c0_i32 = arith.constant 0 : i32
    %c0_i32_0 = arith.constant 0 : i32
    %c0_i32_1 = arith.constant 0 : i32
    %c0_i32_2 = arith.constant 0 : i32
    return %arg0, %c0_i32, %c0_i32_0, %c0_i32_1 : i32, i32, i32, i32
  }
  func.func @transform_1(%arg0: i32) -> (i32, i32) {
    %c0_i32 = arith.constant 0 : i32
    %c0_i32_0 = arith.constant 0 : i32
    %c0_i32_1 = arith.constant 0 : i32
    return %c0_i32, %c0_i32_0 : i32, i32
  }
  func.func @transform_2(%arg0: i32) -> (i32, i32) {
    %c0_i32 = arith.constant 0 : i32
    %c0_i32_0 = arith.constant 0 : i32
    %c0_i32_1 = arith.constant 0 : i32
    return %c0_i32, %c0_i32_0 : i32, i32
  }
  func.func @transform_3(%arg0: i32) -> (i32, i32, i32, i32) {
    %c0_i32 = arith.constant 0 : i32
    %c0_i32_0 = arith.constant 0 : i32
    %c0_i32_1 = arith.constant 0 : i32
    %c0_i32_2 = arith.constant 0 : i32
    return %arg0, %c0_i32, %c0_i32_0, %c0_i32_1 : i32, i32, i32, i32
  }
}

</mosaic_0001>

<bundles_post_ra>
// kernel: tpu_custom_call.1
= control target key start
LH: loop header
LB: loop body
LE: loop exit
PB: predicated region body
PF: predicated region fallthrough
CT: control target
= control target key end

     0   :  { %8 = vsyncpa [#allocation5], 0  ;;  %s12009_s0 = inlined_call_operand.hbm [shape: f32[2,16,16,128], index: 0, kind: input, shape index: {}]   ;;  %s12010_s1 = inlined_call_operand.hbm [shape: bf16[1152,128], index: 1, kind: input, shape index: {}]   ;;  %s12011_s2 = inlined_call_operand.vmem [shape: f32[1,128], index: 2, kind: input, shape index: {}]   ;;  %s12012_s3 = inlined_call_operand.hbm [shape: f32[2,8,8,128], index: 3, kind: output, shape index: {}]  }
   0x1   :  { %10 = vsyncpa [#allocation5 + $0x1], 0 }
   0x2   :  { %11 = vsyncpa [#allocation8], 0 }
   0x3   :  { %12 = vsyncpa [#allocation6], 0 }
   0x4   :  { %14 = vsyncpa [#allocation6 + $0x1], 0  ;;  %s9834_s12 = smov 0   ;;  %s9836_s13 = smov 0  }
   0x5   :  { %s9838_s14 = smov 0   ;;  %s9840_s15 = smov 0  }
   0x6 LB: > { %s9855_s16 = sadd.s32 4294967295, %s9801_s15   ;;  %s8353_s17 = sadd.s32 4294967294, %s9801_s15   ;;  %s9801_s15 = sphi %s9840_s15, %s12128_s15   ;;  %s9797_s14 = sphi %s9838_s14, %s12127_s14   ;;  %s9793_s13 = sphi %s9836_s13, %s12126_s13   ;;  %s9789_s12 = sphi %s9834_s12, %s12125_s12  }
   0x7   : > { %p40_p0 = scmp.ne.s32.totalorder %s9793_s13, %s9789_s12  ;;  %p12013_p1 = scmp.eq.s32.totalorder %s9855_s16, 0 }
   0x8   : > { %p112_p3 = scmp.eq.s32.totalorder %s8353_s17, 1  ;;  %p8354_p5 = scmp.ge.s32.totalorder %s9801_s15, 1 }
   0x9   : > { %p9864_p4 = por %p12013_p1, %p40_p0  ;;  %p119_p7 = scmp.lt.s32.totalorder %s9801_s15, 3 }
   0xa   : > { %p9869_p6 = por %p112_p3, %p40_p0  ;;  %s9803_s21 = smov [#allocation7]  }
   0xb   : > { %s12018_s18 = scalar_select %p9864_p4, 1, 0 }
   0xc   : > { %s12019_s19 = scalar_select %p9869_p6, 1, 0 }
   0xd   : > { %p9874_p8 = pnand %p8354_p5, %p119_p7  ;;  %s131_s22 = sshll.u32 %s9803_s21, 4  ;;  %s132_s22 = int_to_ptr.vmem [resolvable:$true] %s131_s22 }
   0xe   : > { %s9888_s24 = sadd.s32 1, %s9801_s15   ;;  %s27_s25 = sadd.s32 1, %s9797_s14 }
   0xf   : > { %s12020_s20 = scalar_select %p9874_p8, 1, 0 }
  0x10   : > { %p9500_p9 = pneg %p9874_p8  ;;  %s24_s26 = ssub.s32 %s9801_s15, %s9888_s24 }
  0x11   : > { %s9690_s27 = scalar_lea.vmem %s132_s22, 9216  ;;  %p9698_p5 = scmp.lt.s32.totalorder %s132_s22, %s132_s22 }
  0x12   : > { %p9883_p11 = pnand %p9500_p9, %p12013_p1  ;;  %p9691_p13 = scmp.ne.s32.totalorder %s132_s22, %s9690_s27 }
  0x13   : > { %p9699_p7 = scmp.lt.s32.totalorder %s9690_s27, %s9690_s27 }
  0x14   : > { %p9681_p12 = pneg %p9883_p11 }
  0x15   : > { %p9700_p10 = por %p9699_p7, %p9698_p5 }
  0x16   : > { %p9693_p0 = pnand %p9691_p13, %p9681_p12 }
  0x18   : > { %p9694_p3 = pneg %p9693_p0 }
  0x1a   : > { %p9701_p2 = pnand %p9700_p10, %p9694_p3 }
  0x1c   : > { %9704 = shalt.err (!%p9701_p2)
}
  0x1d   : > { %s9804_s28 = smov 64   ;;  %s9805_s29 = smov 4  }
  0x1e   : > { %9503 = dma.hbm_to_vmem [thread:$0]  (!%p9883_p11), %s12010_s1, 9216, %s132_s22, [#allocation8], %s9804_s28, %s9804_s28, %s9805_s29  }
  0x1f   : > { %p25_p9 = scmp.eq.s32.totalorder %s24_s26, 0  ;;  %p34_p12 = scmp.ne.s32.totalorder %s9797_s14, %s9793_s13 }
  0x20   : > { %p35_p10 = scmp.eq.s32.totalorder %s9801_s15, 0  ;;  %p9513_p2 = scmp.lt.s32.totalorder %s9801_s15, 2 }
  0x21   : > { %s9905_s5 = scalar_select %p25_p9, %s9797_s14, %s27_s25  }
  0x22   : > { %p36_p13 = por %p35_p10, %p34_p12  ;;  %p12022_p0 = scmp.eq.s32.totalorder %s9855_s16, 1 }
  0x23   : > { %s148_s7 = sand.u32 1, %s9797_s14   ;;  %s8794_s8 = sshll.u32 %s9801_s15, 12 }
  0x24   : > { %p9909_p3 = por %p12022_p0, %p34_p12  ;;  %s8357_s9 = sshll.u32 %s148_s7, 8 }
  0x25   : > { %s9918_s17 = scalar_lea.hbm %s12009_s0, %s8794_s8  ;;  %s152_s21 = scalar_lea.vmem [#allocation4], %s8357_s9 }
  0x26   : > { %s12023_s6 = scalar_select %p9909_p3, 1, 0 }
  0x27   : > { %s159_s22 = sshll.u32 %s152_s21, 4  ;;  %p9920_p11 = pnand %p9513_p2, %p36_p13  ;;  %s9924_s22 = int_to_ptr.vmem [resolvable:$true] %s159_s22 }
  0x28   : > { %s9926_s25 = scalar_lea.sflag [#allocation5], %s148_s7  ;;  %s9705_s26 = scalar_lea.hbm %s9918_s17, 4096 }
  0x29   : > { %p9706_p5 = scmp.ne.s32.totalorder %s9918_s17, %s9705_s26  ;;  %p9707_p7 = pneg %p9920_p11 }
  0x2a   : > { %s9710_s29 = scalar_lea.hbm %s12009_s0, 8192  ;;  %p9711_p10 = scmp.lt.s32.totalorder %s9918_s17, %s12009_s0 }
  0x2b   : > { %p9708_p9 = pnand %p9707_p7, %p9706_p5  ;;  %p9712_p2 = scmp.lt.s32.totalorder %s9710_s29, %s9705_s26 }
  0x2d   : > { %p9709_p12 = pneg %p9708_p9  ;;  %p9713_p13 = por %p9712_p2, %p9711_p10 }
  0x2f   : > { %p9714_p0 = pnand %p9713_p13, %p9709_p12 }
  0x31   : > { %9717 = shalt.err (!%p9714_p0)
}
  0x32   : > { %s9718_s7 = scalar_lea.vmem %s9924_s22, 4096  ;;  %s9806_s8 = smov [#allocation4]  }
  0x33   : > { %p9719_p1 = scmp.ne.s32.totalorder %s9924_s22, %s9718_s7  ;;  %s9723_s9 = sshll.u32 %s9806_s8, 4  ;;  %s9724_s9 = int_to_ptr.vmem [resolvable:$false] %s9723_s9 }
  0x34   : > { %s9725_s10 = scalar_lea.vmem %s9724_s9, 8192  ;;  %p9726_p9 = scmp.lt.s32.totalorder %s9924_s22, %s9724_s9 }
  0x35   : > { %p9721_p6 = pnand %p9719_p1, %p9707_p7  ;;  %p9727_p3 = scmp.lt.s32.totalorder %s9725_s10, %s9718_s7 }
  0x37   : > { %p9722_p5 = pneg %p9721_p6  ;;  %p9728_p4 = por %p9727_p3, %p9726_p9 }
  0x39   : > { %p9729_p8 = pnand %p9728_p4, %p9722_p5 }
  0x3b   : > { %9732 = shalt.err (!%p9729_p8)
}
  0x3c   : > { %s9807_s11 = smov 128   ;;  %s9808_s21 = smov 8  }
  0x3d   : > { %9507 = dma.hbm_to_vmem [thread:$0]  (!%p9920_p11), %s9918_s17, 4096, %s9924_s22, %s9926_s25, %s9807_s11, %s9807_s11, %s9808_s21  }
  0x3e   : > { %p12025_p1 = scmp.ne.s32.totalorder %s12020_s20, 0 }
  0x40   : > { %171 = sbr.rel (%p12025_p1) target bundleno = 834 (0x342), region = 32 }
  0x45   : > { %s9950_s26 = sand.u32 1, %s9793_s13   ;;  %p12026_p4 = scmp.ne.s32.totalorder %s12018_s18, 0 }
  0x46   : > { %s8361_s27 = sshll.u32 %s9950_s26, 8  ;;  %s174_s28 = scalar_lea.sflag [#allocation5], %s9950_s26 }
  0x47   : > { %s9954_s29 = scalar_lea.vmem [#allocation4], %s8361_s27 }
  0x48   : > { %9776 = dma.done.wait (%p12026_p4), %s174_s28, 4096  }
  0x49   : > { %9778 = vsyncadd (%p12026_p4), %s174_s28, 4294963200  ;;  %p12027_p6 = scmp.eq.s32.totalorder %s9855_s16, 0 }
  0x4b   : > { %9780 = dma.done.wait (%p12027_p6), [#allocation8], 9216   ;;  %p12028_p8 = pmov %p12027_p6 }
  0x4c   : > { %v9809_v0 = vmov 0   ;;  %v9557_v1 = vld [vmem:[#allocation7 + $0x38] sm:$0xff]   ;;  %v9558_v2 = vld [vmem:[#allocation7 + $0x30] sm:$0xff]   ;;  %vm212_vm0 = vcmask 1040384   ;;  %vm213_vm1 = vsmask.f32 256 }
  0x4d   : > { %9782 = vsyncadd (%p12028_p8), [#allocation8], 4294958080  ;;  %205 = vst [vmem:[#allocation3] sm:$0xf] %v9809_v0  ;;  %9044 = vmatprep.subr.bf16.mxu0 %v9557_v1  ;;  %9476 = vmatprep.subr.bf16.mxu1 %v9557_v1  ;;  %v9559_v3 = vld [vmem:[#allocation7 + $0x28] sm:$0xff]   ;;  %v12031_v5 = vmov 0 }
  0x4e   : > { %206 = vst [vmem:[#allocation3 + $0x4] sm:$0xf] %v9809_v0  ;;  %207 = vst [vmem:[#allocation3 + $0x8] sm:$0x1] %v9809_v0  ;;  %9045 = vmatpush3.bf16.msra.mxu0 %v9557_v1  ;;  %9484 = vmatpush3.bf16.msra.mxu1 %v9557_v1  ;;  %vm269_vm3 = vsmask.f32 7938 }
  0x4f   : > { %209 = vst [vmem:[#allocation3 + $0xcc] sm:$0xf] %v9809_v0  ;;  %210 = vst [vmem:[#allocation3 + $0xd0] sm:$0xf] %v9809_v0  ;;  %9046 = vmatprep.subr.bf16.mxu0 %v9558_v2  ;;  %9477 = vmatprep.subr.bf16.mxu1 %v9558_v2  ;;  %vm453_vm5 = vsmask.f32 4368 }
  0x50   : > { %211 = vst [vmem:[#allocation3 + $0xd4] sm:$0x1] %v9809_v0  ;;  %vm9965_vm2 = vmand %vm212_vm0, %vm213_vm1  ;;  %v9560_v6 = vld [vmem:[#allocation7 + $0x20] sm:$0xff]   ;;  %vm776_vm6 = vcmask 1043456   ;;  %v239_v8 = vld [vmem:[#allocation3 + $0x60] sm:$0x1] }
  0x51   : > { %vm9970_vm4 = vmand %vm212_vm0, %vm269_vm3  ;;  %v240_v10 = vsel %vm9965_vm2, 0, %v239_v8  ;;  %v295_v11 = vld [vmem:[#allocation3 + $0x68] sm:$0x1]  ;;  %v340_v13 = vld [vmem:[%s9954_s29 + $0x78] sm:$0xff]  ;;  %vm2191_vm9 = vcmask 1042432   ;;  %vm2192_vm10 = vcmask 1046532  }
  0x52   : > { %v12032_v5 = vsel %vm9970_vm4, 4294967295, %v12031_v5  ;;  %9047 = vmatpush3.bf16.msra.mxu0 %v9558_v2  ;;  %9485 = vmatpush3.bf16.msra.mxu1 %v9558_v2  ;;  %v339_v12 = vld [vmem:[%s9954_s29 + $0x70] sm:$0xff]  ;;  %241 = vst [vmem:[#allocation3 + $0x60] sm:$0x1] %v240_v10  ;;  %v296_v14 = vsel %vm9970_vm4, 0, %v295_v11  ;;  %v8810_v16 = vpack.c.bf16 %v340_v13, %v340_v13  ;;  %v325_v19 = vld [vmem:[%s9954_s29] sm:$0xff]  ;;  %vm9994_vm7 = vmor %vm213_vm1, %vm453_vm5 }
  0x53   : > { %12033 = vst [vmem:[#allocation13_spill] sm:$0xff] %v12032_v5  ;;  %9048 = vmatprep.subr.bf16.mxu0 %v9559_v3  ;;  %9478 = vmatprep.subr.bf16.mxu1 %v9559_v3  ;;  %v8809_v15 = vpack.c.bf16 %v339_v12, %v339_v12  ;;  %v218_v17 = vld [vmem:[#allocation3 + $0xc] sm:$0x1]  ;;  %v274_v18 = vld [vmem:[#allocation3 + $0x14] sm:$0x1]  ;;  %v326_v22 = vld [vmem:[%s9954_s29 + $0x8] sm:$0xff]  ;;  %v8795_v23 = vpack.c.bf16 %v325_v19, %v325_v19 }
  0x54   : > { %v215_v7 = vld [vmem:[#allocation3] sm:$0x1]  ;;  %297 = vst [vmem:[#allocation3 + $0x68] sm:$0x1] %v296_v14  ;;  %v219_v20 = vsel %vm9965_vm2, 0, %v218_v17  ;;  %v275_v21 = vsel %vm9970_vm4, 0, %v274_v18  ;;  %v8796_v32 = vpack.c.bf16 %v326_v22, %v326_v22  ;;  %vm10000_vm8 = vmand %vm776_vm6, %vm269_vm3 }
  0x55   : > { %v216_v9 = vsel %vm9965_vm2, 0, %v215_v7  ;;  %v242_v24 = vld [vmem:[#allocation3 + $0x6c] sm:$0x1]  ;;  %v341_v25 = vld [vmem:[%s9954_s29 + $0x80] sm:$0xff]  ;;  %v9561_v26 = vld [vmem:[#allocation7 + $0x18] sm:$0xff]   ;;  %v575_v27 = vshrl.u32 %v8809_v15, 16 }
  0x56   : > { %217 = vst [vmem:[#allocation3] sm:$0x1] %v216_v9  ;;  %9049 = vmatpush3.bf16.msra.mxu0 %v9559_v3  ;;  %9486 = vmatpush3.bf16.msra.mxu1 %v9559_v3  ;;  %v578_v28 = vshll.u32 %v8809_v15, 16  ;;  %v583_v29 = vshrl.u32 %v8810_v16, 16  ;;  %v586_v30 = vshll.u32 %v8810_v16, 16  ;;  %v342_v31 = vld [vmem:[%s9954_s29 + $0x88] sm:$0xff]  ;;  %v8811_v39 = vpack.c.bf16 %v341_v25, %v341_v25  ;;  %vm10179_vm13 = vmor %vm2191_vm9, %vm2192_vm10 }
  0x57   : > { %9050 = vmatprep.subr.bf16.mxu0 %v9560_v6  ;;  %9479 = vmatprep.subr.bf16.mxu1 %v9560_v6  ;;  %220 = vst [vmem:[#allocation3 + $0xc] sm:$0x1] %v219_v20  ;;  %276 = vst [vmem:[#allocation3 + $0x14] sm:$0x1] %v275_v21  ;;  %v456_v33 = vshrl.u32 %v8795_v23, 16  ;;  %v459_v34 = vshll.u32 %v8795_v23, 16  ;;  %v8812_v45 = vpack.c.bf16 %v342_v31, %v342_v31 }
  0x58   : > { %v243_v35 = vsel %vm9965_vm2, 0, %v242_v24  ;;  %v577_v37 = vrot.slane %v575_v27, 7  ;;  %v585_v38 = vrot.slane %v583_v29, 7  ;;  %v9562_v40 = vld [vmem:[#allocation7 + $0x10] sm:$0xff]   ;;  %v464_v43 = vshrl.u32 %v8796_v32, 16  ;;  %v9563_v0 = vld [vmem:[#allocation7 + $0x8] sm:$0xff]  }
  0x59   : > { %244 = vst [vmem:[#allocation3 + $0x6c] sm:$0x1] %v243_v35  ;;  %v458_v42 = vrot.slane %v456_v33, 7  ;;  %v467_v44 = vshll.u32 %v8796_v32, 16  ;;  %v827_v51 = vld [vmem:[#allocation3 + $0x60] sm:$0xf] }
  0x5a   : > { %9051 = vmatpush3.bf16.msra.mxu0 %v9560_v6  ;;  %9487 = vmatpush3.bf16.msra.mxu1 %v9560_v6  ;;  %v580_v46 = vor.u32 %v578_v28, %v577_v37  ;;  %v581_v47 = vrot.slane %v577_v37, 4  ;;  %v588_v48 = vor.u32 %v586_v30, %v585_v38  ;;  %v590_v49 = vrot.slane %v585_v38, 4  ;;  %v327_v7 = vld [vmem:[%s9954_s29 + $0x10] sm:$0xff]  ;;  %v221_v11 = vld [vmem:[#allocation3 + $0x18] sm:$0x1]  ;;  %v328_v17 = vld [vmem:[%s9954_s29 + $0x18] sm:$0xff] }
  0x5b   : > { %9052 = vmatprep.subr.bf16.mxu0 %v9561_v26  ;;  %9480 = vmatprep.subr.bf16.mxu1 %v9561_v26  ;;  %v461_v52 = vor.u32 %v459_v34, %v458_v42  ;;  %v462_v53 = vrot.slane %v458_v42, 4  ;;  %v831_v56 = vld [vmem:[#allocation3 + $0x68] sm:$0x1]  ;;  %v466_v57 = vrot.slane %v464_v43, 7  ;;  %v592_v58 = vshrl.u32 %v8811_v39, 16  ;;  %v9564_v20 = vld [vmem:[#allocation7] sm:$0xff]  }
  0x5c   : > { %v589_v54 = vsel %vm9994_vm7, %v581_v47, %v588_v48  ;;  %v828_v55 = vsel %vm10000_vm8, %v580_v46, %v827_v51  ;;  %v832_v59 = vsel %vm9965_vm2, %v590_v49, %v831_v56  ;;  %v595_v62 = vshll.u32 %v8811_v39, 16  ;;  %v245_v18 = vld [vmem:[#allocation3 + $0x78] sm:$0x1]  ;;  %v343_v19 = vld [vmem:[%s9954_s29 + $0x90] sm:$0xff]  ;;  %v344_v24 = vld [vmem:[%s9954_s29 + $0x98] sm:$0xff]  ;;  %s8363_s17 = sshll.u32 %s9950_s26, 6 }
  0x5d   : > { %v9565_v50 = vld [vmem:[#allocation3] sm:$0xff]   ;;  %829 = vst [vmem:[#allocation3 + $0x60] sm:$0xf] %v828_v55  ;;  %830 = vst [vmem:[#allocation3 + $0x64] sm:$0xf] %v589_v54  ;;  %v600_v63 = vshrl.u32 %v8812_v45, 16  ;;  %v469_v1 = vor.u32 %v467_v44, %v466_v57  ;;  %v8797_v12 = vpack.c.bf16 %v327_v7, %v327_v7  ;;  %v8798_v23 = vpack.c.bf16 %v328_v17, %v328_v17 }
  0x5e   : > { %9053 = vmatpush3.bf16.msra.mxu0 %v9561_v26  ;;  %9488 = vmatpush3.bf16.msra.mxu1 %v9561_v26  ;;  %v778_v60 = vld [vmem:[#allocation3 + $0xc] sm:$0xf]  ;;  %v782_v61 = vld [vmem:[#allocation3 + $0x14] sm:$0x1]  ;;  %833 = vst [vmem:[#allocation3 + $0x68] sm:$0x1] %v832_v59  ;;  %v8813_v35 = vpack.c.bf16 %v343_v19, %v343_v19  ;;  %v8814_v42 = vpack.c.bf16 %v344_v24, %v344_v24 }
  0x5f   : > { %9054 = vmatprep.subr.bf16.mxu0 %v9562_v40  ;;  %9481 = vmatprep.subr.bf16.mxu1 %v9562_v40  ;;  %v471_v2 = vrot.slane %v466_v57, 4  ;;  %v779_v3 = vsel %vm10000_vm8, %v461_v52, %v778_v60  ;;  %v594_v6 = vrot.slane %v592_v58, 7  ;;  %v10013_v8 = vrot.slane %v600_v63, 7  ;;  %v329_v25 = vld [vmem:[%s9954_s29 + $0x20] sm:$0xff]  ;;  %v224_v30 = vld [vmem:[#allocation3 + $0x24] sm:$0x1] }
  0x60   : > { %9060 = vmatprep.mubr.bf16.mxu0 %v9565_v50  ;;  %780 = vst [vmem:[#allocation3 + $0xc] sm:$0xf] %v779_v3  ;;  %v603_v9 = vshll.u32 %v8812_v45, 16  ;;  %v834_v10 = vld [vmem:[#allocation3 + $0x6c] sm:$0xf]  ;;  %v470_v13 = vsel %vm9994_vm7, %v462_v53, %v469_v1  ;;  %v222_v22 = vsel %vm9965_vm2, 0, %v221_v11  ;;  %v8799_v43 = vpack.c.bf16 %v329_v25, %v329_v25 }
  0x61   : > { %v783_v14 = vsel %vm9965_vm2, %v471_v2, %v782_v61  ;;  %v597_v15 = vor.u32 %v595_v62, %v594_v6  ;;  %v598_v16 = vrot.slane %v594_v6, 4  ;;  %781 = vst [vmem:[#allocation3 + $0x10] sm:$0xf] %v470_v13  ;;  %223 = vst [vmem:[#allocation3 + $0x18] sm:$0x1] %v222_v22  ;;  %v473_v27 = vshrl.u32 %v8797_v12, 16 }
  0x62   : > { %9055 = vmatpush3.bf16.msra.mxu0 %v9562_v40  ;;  %9489 = vmatpush3.bf16.msra.mxu1 %v9562_v40  ;;  %784 = vst [vmem:[#allocation3 + $0x14] sm:$0x1] %v783_v14  ;;  %v605_v21 = vor.u32 %v603_v9, %v10013_v8  ;;  %v476_v28 = vshll.u32 %v8797_v12, 16  ;;  %v246_v29 = vsel %vm9965_vm2, 0, %v245_v18  ;;  %v330_v31 = vld [vmem:[%s9954_s29 + $0x28] sm:$0xff]  ;;  %v481_v33 = vshrl.u32 %v8798_v23, 16 }
  0x63   : > { %9056 = vmatprep.subr.bf16.mxu0 %v9563_v0  ;;  %9482 = vmatprep.subr.bf16.mxu1 %v9563_v0  ;;  %v835_v26 = vsel %vm10000_vm8, %v597_v15, %v834_v10  ;;  %v484_v34 = vshll.u32 %v8798_v23, 16  ;;  %247 = vst [vmem:[#allocation3 + $0x78] sm:$0x1] %v246_v29  ;;  %v345_v37 = vld [vmem:[%s9954_s29 + $0xa0] sm:$0xff]  ;;  %v10034_v39 = vld [vmem:[#allocation7 + $0x78] sm:$0xff]   ;;  %v475_v40 = vrot.slane %v473_v27, 7  ;;  %v8800_v44 = vpack.c.bf16 %v330_v31, %v330_v31 }
  0x64   : > { %v606_v32 = vsel %vm9994_vm7, %v598_v16, %v605_v21  ;;  %836 = vst [vmem:[#allocation3 + $0x6c] sm:$0xf] %v835_v26  ;;  %v9566_v38 = vld [vmem:[#allocation3 + $0x60] sm:$0xff]   ;;  %v10036_v45 = vrot.slane %v481_v33, 7  ;;  %v609_v46 = vshrl.u32 %v8813_v35, 16  ;;  %v612_v47 = vshll.u32 %v8813_v35, 16 }
  0x65   : > { %837 = vst [vmem:[#allocation3 + $0x70] sm:$0xf] %v606_v32  ;;  %v225_v48 = vsel %vm9965_vm2, 0, %v224_v30  ;;  %v9570_v49 = vld [vmem:[#allocation7 + $0xb8] sm:$0xff]   ;;  %v478_v50 = vor.u32 %v476_v28, %v475_v40  ;;  %v479_v51 = vrot.slane %v475_v40, 4  ;;  %v617_v52 = vshrl.u32 %v8814_v42, 16  ;;  %9076 = vmatprep.mubr.bf16.mxu1 %v9566_v38 }
  0x66   : > { %9057 = vmatpush3.bf16.msra.mxu0 %v9563_v0  ;;  %9490 = vmatpush3.bf16.msra.mxu1 %v9563_v0  ;;  %v620_v53 = vshll.u32 %v8814_v42, 16  ;;  %226 = vst [vmem:[#allocation3 + $0x24] sm:$0x1] %v225_v48  ;;  %v486_v54 = vor.u32 %v484_v34, %v10036_v45  ;;  %v611_v55 = vrot.slane %v609_v46, 7  ;;  %v490_v56 = vshrl.u32 %v8799_v43, 16  ;;  %v346_v58 = vld [vmem:[%s9954_s29 + $0xa8] sm:$0xff] }
  0x67   : > { %9058 = vmatprep.subr.bf16.mxu0 %v9564_v20  ;;  %9483 = vmatprep.subr.bf16.mxu1 %v9564_v20  ;;  %v248_v57 = vld [vmem:[#allocation3 + $0x84] sm:$0x1]  ;;  %v10042_v60 = vrot.slane %v617_v52, 7  ;;  %v493_v61 = vshll.u32 %v8799_v43, 16  ;;  %v498_v62 = vshrl.u32 %v8800_v44, 16  ;;  %v8815_v63 = vpack.c.bf16 %v345_v37, %v345_v37  ;;  %v9572_v7 = vld [vmem:[#allocation7 + $0xb0] sm:$0xff]  }
  0x68   : > { %v9567_v59 = vld [vmem:[#allocation3 + $0xc] sm:$0xff]   ;;  %v487_v0 = vsel %vm9994_vm7, %v479_v51, %v486_v54  ;;  %v785_v1 = vld [vmem:[#allocation3 + $0x18] sm:$0xf]  ;;  %v614_v2 = vor.u32 %v612_v47, %v611_v55  ;;  %v615_v3 = vrot.slane %v611_v55, 4  ;;  %v492_v6 = vrot.slane %v490_v56, 7  ;;  %v9577_v26 = vld [vmem:[#allocation7 + $0x68] sm:$0xff]  }
  0x69   : > { %v786_v9 = vsel %vm10000_vm8, %v478_v50, %v785_v1  ;;  %788 = vst [vmem:[#allocation3 + $0x1c] sm:$0xf] %v487_v0  ;;  %v622_v10 = vor.u32 %v620_v53, %v10042_v60  ;;  %v10050_v12 = vrot.slane %v498_v62, 7  ;;  %v9571_v14 = vld [vmem:[#allocation7 + $0x70] sm:$0xff]   ;;  %v501_v18 = vshll.u32 %v8800_v44, 16  ;;  %v9578_v30 = vld [vmem:[#allocation7 + $0xa8] sm:$0xff]  }
  0x6a   : > { %9059 = vmatpush3.bf16.msra.mxu0 %v9564_v20  ;;  %9491 = vmatpush3.bf16.msra.mxu1 %v9564_v20  ;;  %v841_v11 = vld [vmem:[#allocation3 + $0x78] sm:$0xf]  ;;  %787 = vst [vmem:[#allocation3 + $0x18] sm:$0xf] %v786_v9  ;;  %v495_v16 = vor.u32 %v493_v61, %v492_v6  ;;  %v496_v17 = vrot.slane %v492_v6, 4  ;;  %v249_v20 = vsel %vm9965_vm2, 0, %v248_v57  ;;  %v8816_v21 = vpack.c.bf16 %v346_v58, %v346_v58 }
  0x6b   : > { %9092 = vmatprep.subr.bf16.mxu1 %v10034_v39  ;;  %9140 = vmatprep.subr.bf16.mxu0 %v9570_v49  ;;  %v842_v15 = vsel %vm10000_vm8, %v614_v2, %v841_v11  ;;  %v623_v19 = vsel %vm9994_vm7, %v615_v3, %v622_v10  ;;  %v503_v22 = vor.u32 %v501_v18, %v10050_v12  ;;  %v626_v24 = vshrl.u32 %v8815_v63, 16  ;;  %v331_v31 = vld [vmem:[%s9954_s29 + $0x30] sm:$0xff]  ;;  %v227_v34 = vld [vmem:[#allocation3 + $0x30] sm:$0x1]  ;;  %v9580_v50 = vld [vmem:[#allocation7 + $0xa0] sm:$0xff]   ;;  %s11718_s22 = scalar_lea.vmem [#allocation9], %s8363_s17 }
  0x6c   : > { %v9568_v13 = vld [vmem:[#allocation3 + $0x6c] sm:$0xff]   ;;  %843 = vst [vmem:[#allocation3 + $0x78] sm:$0xf] %v842_v15  ;;  %844 = vst [vmem:[#allocation3 + $0x7c] sm:$0xf] %v623_v19  ;;  %v629_v25 = vshll.u32 %v8815_v63, 16  ;;  %v8801_v37 = vpack.c.bf16 %v331_v31, %v331_v31 }
  0x6d   : > { %9061 = vmatmul.mubr.bf16.vlgmr.msra.gmra.mxu0 %v9567_v59  ;;  %9077 = vmatmul.mubr.bf16.vlgmr.msra.gmra.mxu1 %v9568_v13  ;;  %v792_v23 = vld [vmem:[#allocation3 + $0x24] sm:$0xf]  ;;  %250 = vst [vmem:[#allocation3 + $0x84] sm:$0x1] %v249_v20  ;;  %v634_v28 = vshrl.u32 %v8816_v21, 16  ;;  %v637_v29 = vshll.u32 %v8816_v21, 16  ;;  %v504_v32 = vsel %vm9994_vm7, %v496_v17, %v503_v22 }
  0x6e   : > { %9141 = vmatpush3.bf16.msra.mxu0 %v9570_v49  ;;  %9093 = vmatpush3.bf16.msra.mxu1 %v10034_v39  ;;  %v793_v27 = vsel %vm10000_vm8, %v495_v16, %v792_v23  ;;  %v628_v33 = vrot.slane %v626_v24, 7  ;;  %v332_v35 = vld [vmem:[%s9954_s29 + $0x38] sm:$0xff]  ;;  %795 = vst [vmem:[#allocation3 + $0x28] sm:$0xf] %v504_v32  ;;  %v228_v40 = vsel %vm9965_vm2, 0, %v227_v34  ;;  %v347_v44 = vld [vmem:[%s9954_s29 + $0xb0] sm:$0xff] }
  0x6f   : > { %9142 = vmatprep.subr.bf16.mxu0 %v9572_v7  ;;  %9094 = vmatprep.subr.bf16.mxu1 %v9571_v14  ;;  %794 = vst [vmem:[#allocation3 + $0x24] sm:$0xf] %v793_v27  ;;  %v251_v38 = vld [vmem:[#allocation3 + $0x90] sm:$0x1]  ;;  %v10066_v39 = vrot.slane %v634_v28, 7  ;;  %v8802_v42 = vpack.c.bf16 %v332_v35, %v332_v35  ;;  %v9579_v49 = vld [vmem:[#allocation7 + $0x60] sm:$0xff]   ;;  %v8817_v61 = vpack.c.bf16 %v347_v44, %v347_v44 }
  0x70   : > { %v252_v43 = vsel %vm9965_vm2, 0, %v251_v38  ;;  %v348_v46 = vld [vmem:[%s9954_s29 + $0xb8] sm:$0xff]  ;;  %v631_v47 = vor.u32 %v629_v25, %v628_v33  ;;  %v632_v48 = vrot.slane %v628_v33, 4  ;;  %229 = vst [vmem:[#allocation3 + $0x30] sm:$0x1] %v228_v40  ;;  %v507_v51 = vshrl.u32 %v8801_v37, 16 }
  0x71   : > { %v510_v52 = vshll.u32 %v8801_v37, 16  ;;  %253 = vst [vmem:[#allocation3 + $0x90] sm:$0x1] %v252_v43  ;;  %v333_v53 = vld [vmem:[%s9954_s29 + $0x40] sm:$0xff]  ;;  %v639_v55 = vor.u32 %v637_v29, %v10066_v39  ;;  %v515_v56 = vshrl.u32 %v8802_v42, 16  ;;  %v518_v57 = vshll.u32 %v8802_v42, 16 }
  0x72   : > { %9143 = vmatpush3.bf16.msra.mxu0 %v9572_v7  ;;  %9095 = vmatpush3.bf16.msra.mxu1 %v9571_v14  ;;  %v9573_v54 = vld [vmem:[#allocation3 + $0x18] sm:$0xff]   ;;  %v334_v58 = vld [vmem:[%s9954_s29 + $0x48] sm:$0xff]  ;;  %v509_v59 = vrot.slane %v507_v51, 7  ;;  %v8818_v62 = vpack.c.bf16 %v348_v46, %v348_v46  ;;  %v8803_v7 = vpack.c.bf16 %v333_v53, %v333_v53  ;;  %v643_v13 = vshrl.u32 %v8817_v61, 16  ;;  %v9585_v20 = vld [vmem:[#allocation7 + $0x58] sm:$0xff]   ;;  %s8827_s30 = sshll.u32 %s9855_s16, 10 }
  0x73   : > { %9144 = vmatprep.subr.bf16.mxu0 %v9578_v30  ;;  %9096 = vmatprep.subr.bf16.mxu1 %v9577_v26  ;;  %v230_v63 = vld [vmem:[#allocation3 + $0x3c] sm:$0x1]  ;;  %v640_v2 = vsel %vm9994_vm7, %v632_v48, %v639_v55  ;;  %v10080_v6 = vrot.slane %v515_v56, 7  ;;  %v350_v14 = vld [vmem:[%s9954_s29 + $0xc8] sm:$0xff]  ;;  %v646_v16 = vshll.u32 %v8817_v61, 16  ;;  %v8804_v18 = vpack.c.bf16 %v334_v58, %v334_v58  ;;  %v9586_v21 = vld [vmem:[#allocation7 + $0x98] sm:$0xff]   ;;  %s11961_s9 = scalar_lea.hbm %s12012_s3, %s8827_s30 }
  0x74   : > { %v349_v0 = vld [vmem:[%s9954_s29 + $0xc0] sm:$0xff]  ;;  %9064 = vmatprep.mubr.bf16.mxu0 %v9573_v54  ;;  %v848_v3 = vld [vmem:[#allocation3 + $0x84] sm:$0xf]  ;;  %851 = vst [vmem:[#allocation3 + $0x88] sm:$0xf] %v640_v2  ;;  %v512_v10 = vor.u32 %v510_v52, %v509_v59  ;;  %v513_v11 = vrot.slane %v509_v59, 4  ;;  %v8820_v32 = vpack.c.bf16 %v350_v14, %v350_v14 }
  0x75   : > { %v9574_v1 = vld [vmem:[#allocation3 + $0x78] sm:$0xff]   ;;  %v849_v9 = vsel %vm10000_vm8, %v631_v47, %v848_v3  ;;  %v520_v15 = vor.u32 %v518_v57, %v10080_v6  ;;  %v651_v17 = vshrl.u32 %v8818_v62, 16  ;;  %v645_v23 = vrot.slane %v643_v13, 7  ;;  %v9587_v43 = vld [vmem:[#allocation7 + $0x50] sm:$0xff]   ;;  %v336_v13 = vld [vmem:[%s9954_s29 + $0x58] sm:$0xff]  ;;  %s8270_s4 = sshll.u32 %s11718_s22, 4  ;;  %s11963_s4 = int_to_ptr.vmem [resolvable:$true] %s8270_s4 }
  0x76   : > { %9145 = vmatpush3.bf16.msra.mxu0 %v9578_v30  ;;  %9080 = vmatprep.mubr.bf16.mxu1 %v9574_v1  ;;  %850 = vst [vmem:[#allocation3 + $0x84] sm:$0xf] %v849_v9  ;;  %v254_v19 = vld [vmem:[#allocation3 + $0x9c] sm:$0x1]  ;;  %v9575_v22 = vld [vmem:[#allocation3 + $0x24] sm:$0xff]   ;;  %v654_v24 = vshll.u32 %v8818_v62, 16  ;;  %v8819_v27 = vpack.c.bf16 %v349_v0, %v349_v0 }
  0x77   : > { %9097 = vmatpush3.bf16.msra.mxu1 %v9577_v26  ;;  %9146 = vmatprep.subr.bf16.mxu0 %v9580_v50  ;;  %v231_v25 = vsel %vm9965_vm2, 0, %v230_v63  ;;  %v521_v26 = vsel %vm9994_vm7, %v513_v11, %v520_v15  ;;  %v799_v28 = vld [vmem:[#allocation3 + $0x30] sm:$0xf]  ;;  %v10090_v29 = vrot.slane %v651_v17, 7  ;;  %v524_v31 = vshrl.u32 %v8803_v7, 16  ;;  %v9588_v51 = vld [vmem:[#allocation7 + $0x90] sm:$0xff]  }
  0x78   : > { %9098 = vmatprep.subr.bf16.mxu1 %v9579_v49  ;;  %v855_v30 = vld [vmem:[#allocation3 + $0x90] sm:$0xf]  ;;  %232 = vst [vmem:[#allocation3 + $0x3c] sm:$0x1] %v231_v25  ;;  %9065 = vmatmul.mubr.bf16.gmra.mxu0 %v9575_v22  ;;  %v800_v33 = vsel %vm10000_vm8, %v512_v10, %v799_v28  ;;  %802 = vst [vmem:[#allocation3 + $0x34] sm:$0xf] %v521_v26  ;;  %v648_v34 = vor.u32 %v646_v16, %v645_v23 }
  0x79   : > { %v649_v35 = vrot.slane %v645_v23, 4  ;;  %v527_v37 = vshll.u32 %v8803_v7, 16  ;;  %801 = vst [vmem:[#allocation3 + $0x30] sm:$0xf] %v800_v33  ;;  %v656_v38 = vor.u32 %v654_v24, %v10090_v29  ;;  %v526_v40 = vrot.slane %v524_v31, 7  ;;  %v335_v7 = vld [vmem:[%s9954_s29 + $0x50] sm:$0xff] }
  0x7a   : > { %9147 = vmatpush3.bf16.msra.mxu0 %v9580_v50  ;;  %v532_v42 = vshrl.u32 %v8804_v18, 16  ;;  %v856_v44 = vsel %vm10000_vm8, %v648_v34, %v855_v30  ;;  %v535_v46 = vshll.u32 %v8804_v18, 16  ;;  %v255_v47 = vsel %vm9965_vm2, 0, %v254_v19  ;;  %v233_v3 = vld [vmem:[#allocation3 + $0x48] sm:$0x1]  ;;  %v352_v19 = vld [vmem:[%s9954_s29 + $0xd8] sm:$0xff] }
  0x7b   : > { %9099 = vmatpush3.bf16.msra.mxu1 %v9579_v49  ;;  %v660_v48 = vshrl.u32 %v8819_v27, 16  ;;  %9148 = vmatprep.subr.bf16.mxu0 %v9586_v21  ;;  %v657_v49 = vsel %vm9994_vm7, %v649_v35, %v656_v38  ;;  %857 = vst [vmem:[#allocation3 + $0x90] sm:$0xf] %v856_v44  ;;  %v529_v50 = vor.u32 %v527_v37, %v526_v40  ;;  %v530_v52 = vrot.slane %v526_v40, 4  ;;  %v257_v17 = vld [vmem:[#allocation3 + $0xa8] sm:$0x1] }
  0x7c   : > { %9100 = vmatprep.subr.bf16.mxu1 %v9585_v20  ;;  %v10101_v53 = vrot.slane %v532_v42, 7  ;;  %256 = vst [vmem:[#allocation3 + $0x9c] sm:$0x1] %v255_v47  ;;  %858 = vst [vmem:[#allocation3 + $0x94] sm:$0xf] %v657_v49  ;;  %v663_v56 = vshll.u32 %v8819_v27, 16  ;;  %v8805_v14 = vpack.c.bf16 %v335_v7, %v335_v7  ;;  %v8806_v16 = vpack.c.bf16 %v336_v13, %v336_v13 }
  0x7d   : > { %v9576_v54 = vld [vmem:[#allocation3 + $0x84] sm:$0xff]   ;;  %v662_v55 = vrot.slane %v660_v48, 7  ;;  %v668_v57 = vshrl.u32 %v8820_v32, 16  ;;  %v671_v59 = vshll.u32 %v8820_v32, 16  ;;  %v234_v11 = vsel %vm9965_vm2, 0, %v233_v3  ;;  %v337_v37 = vld [vmem:[%s9954_s29 + $0x60] sm:$0xff] }
  0x7e   : > { %v537_v58 = vor.u32 %v535_v46, %v10101_v53  ;;  %9149 = vmatpush3.bf16.msra.mxu0 %v9586_v21  ;;  %9081 = vmatmul.mubr.bf16.gmra.mxu1 %v9576_v54  ;;  %v607_v15 = vrot.slane %v10013_v8, 4  ;;  %235 = vst [vmem:[#allocation3 + $0x48] sm:$0x1] %v234_v11  ;;  %v351_v18 = vld [vmem:[%s9954_s29 + $0xd0] sm:$0xff]  ;;  %v541_v22 = vshrl.u32 %v8805_v14, 16  ;;  %v544_v23 = vshll.u32 %v8805_v14, 16 }
  0x7f   : > { %9101 = vmatpush3.bf16.msra.mxu1 %v9585_v20  ;;  %v806_v61 = vld [vmem:[#allocation3 + $0x3c] sm:$0xf]  ;;  %v666_v62 = vrot.slane %v662_v55, 4  ;;  %v10104_v63 = vrot.slane %v668_v57, 7  ;;  %v665_v2 = vor.u32 %v663_v56, %v662_v55  ;;  %9150 = vmatprep.subr.bf16.mxu0 %v9588_v51  ;;  %v8821_v24 = vpack.c.bf16 %v351_v18, %v351_v18  ;;  %v236_v35 = vld [vmem:[#allocation3 + $0x54] sm:$0x1] }
  0x80   : > { %9102 = vmatprep.subr.bf16.mxu1 %v9587_v43  ;;  %v538_v0 = vsel %vm9994_vm7, %v530_v52, %v537_v58  ;;  %v807_v1 = vsel %vm10000_vm8, %v529_v50, %v806_v61  ;;  %v9581_v9 = vld [vmem:[#allocation3 + $0x30] sm:$0xff]   ;;  %v549_v26 = vshrl.u32 %v8806_v16, 16  ;;  %v552_v28 = vshll.u32 %v8806_v16, 16  ;;  %v353_v46 = vld [vmem:[%s9954_s29 + $0xe0] sm:$0xff]  ;;  %v354_v50 = vld [vmem:[%s9954_s29 + $0xe8] sm:$0xff]  ;;  %s8257_s16 = scalar_lea.sflag [#allocation6], %s9950_s26 }
  0x81   : > { %808 = vst [vmem:[#allocation3 + $0x3c] sm:$0xf] %v807_v1  ;;  %809 = vst [vmem:[#allocation3 + $0x40] sm:$0xf] %v538_v0  ;;  %v673_v10 = vor.u32 %v671_v59, %v10104_v63  ;;  %9068 = vmatprep.mubr.bf16.mxu0 %v9581_v9  ;;  %v258_v30 = vsel %vm9965_vm2, 0, %v257_v17  ;;  %v543_v31 = vrot.slane %v541_v22, 7  ;;  %v8822_v32 = vpack.c.bf16 %v352_v19, %v352_v19 }
  0x82   : > { %9151 = vmatpush3.bf16.msra.mxu0 %v9588_v51  ;;  %259 = vst [vmem:[#allocation3 + $0xa8] sm:$0x1] %v258_v30  ;;  %v677_v33 = vshrl.u32 %v8821_v24, 16  ;;  %v680_v34 = vshll.u32 %v8821_v24, 16  ;;  %v488_v38 = vrot.slane %v10036_v45, 4  ;;  %v10126_v40 = vrot.slane %v549_v26, 7 }
  0x83   : > { %9103 = vmatpush3.bf16.msra.mxu1 %v9587_v43  ;;  %v674_v20 = vsel %vm9994_vm7, %v666_v62, %v673_v10  ;;  %v862_v21 = vld [vmem:[#allocation3 + $0x9c] sm:$0xf]  ;;  %v9582_v25 = vld [vmem:[#allocation3 + $0x90] sm:$0xff]   ;;  %v237_v42 = vsel %vm9965_vm2, 0, %v236_v35  ;;  %v338_v43 = vld [vmem:[%s9954_s29 + $0x68] sm:$0xff]  ;;  %v8807_v44 = vpack.c.bf16 %v337_v37, %v337_v37  ;;  %v546_v47 = vor.u32 %v544_v23, %v543_v31  ;;  %s9733_s10 = scalar_lea.vmem %s11963_s4, 1024 }
  0x84   : > { %v863_v27 = vsel %vm10000_vm8, %v665_v2, %v862_v21  ;;  %865 = vst [vmem:[#allocation3 + $0xa0] sm:$0xf] %v674_v20  ;;  %9084 = vmatprep.mubr.bf16.mxu1 %v9582_v25  ;;  %v547_v48 = vrot.slane %v543_v31, 4  ;;  %v679_v51 = vrot.slane %v677_v33, 7  ;;  %v685_v49 = vshrl.u32 %v8822_v32, 16  ;;  %v9593_v2 = vld [vmem:[#allocation7 + $0x48] sm:$0xff]   ;;  %p9734_p3 = scmp.ne.s32.totalorder %s11963_s4, %s9733_s10 }
  0x85   : > { %864 = vst [vmem:[#allocation3 + $0x9c] sm:$0xf] %v863_v27  ;;  %238 = vst [vmem:[#allocation3 + $0x54] sm:$0x1] %v237_v42  ;;  %v624_v52 = vrot.slane %v10042_v60, 4  ;;  %v554_v55 = vor.u32 %v552_v28, %v10126_v40  ;;  %v8808_v56 = vpack.c.bf16 %v338_v43, %v338_v43  ;;  %v10135_v58 = vpack.c.bf16 %v353_v46, %v353_v46  ;;  %v9594_v17 = vld [vmem:[#allocation7 + $0x88] sm:$0xff]  }
  0x86   : > { %v260_v57 = vld [vmem:[#allocation3 + $0xb4] sm:$0x1]  ;;  %v813_v59 = vld [vmem:[#allocation3 + $0x48] sm:$0xf]  ;;  %v682_v61 = vor.u32 %v680_v34, %v679_v51  ;;  %v683_v62 = vrot.slane %v679_v51, 4  ;;  %v10137_v0 = vrot.slane %v685_v49, 7  ;;  %9104 = vmatprep.subr.bf16.mxu1 %v9593_v2  ;;  %v8824_v21 = vpack.c.bf16 %v354_v50, %v354_v50  ;;  %9152 = vmatprep.subr.bf16.mxu0 %v9594_v17 }
  0x87   : > { %v688_v1 = vshll.u32 %v8822_v32, 16  ;;  %v555_v3 = vsel %vm9994_vm7, %v547_v48, %v554_v55  ;;  %v814_v7 = vsel %vm10000_vm8, %v546_v47, %v813_v59  ;;  %v558_v9 = vshrl.u32 %v8807_v44, 16  ;;  %9105 = vmatpush3.bf16.msra.mxu1 %v9593_v2  ;;  %9153 = vmatpush3.bf16.msra.mxu0 %v9594_v17  ;;  %v9595_v32 = vld [vmem:[#allocation7 + $0x40] sm:$0xff]   ;;  %v10159_v46 = vld [vmem:[#allocation7 + $0xf8] sm:$0xff]   ;;  %v271_v51 = vld [vmem:[#allocation3 + $0x8] sm:$0x1] }
  0x88   : > { %v9583_v54 = vld [vmem:[#allocation3 + $0x3c] sm:$0xff]   ;;  %v561_v10 = vshll.u32 %v8807_v44, 16  ;;  %v505_v11 = vrot.slane %v10050_v12, 4  ;;  %815 = vst [vmem:[#allocation3 + $0x48] sm:$0xf] %v814_v7  ;;  %v566_v14 = vshrl.u32 %v8808_v56, 16  ;;  %9106 = vmatprep.subr.bf16.mxu1 %v9595_v32 }
  0x89   : > { %9069 = vmatmul.mubr.bf16.gmra.mxu0 %v9583_v54  ;;  %816 = vst [vmem:[#allocation3 + $0x4c] sm:$0xf] %v555_v3  ;;  %v690_v13 = vor.u32 %v688_v1, %v10137_v0  ;;  %v569_v16 = vshll.u32 %v8808_v56, 16  ;;  %v869_v19 = vld [vmem:[#allocation3 + $0xa8] sm:$0xf]  ;;  %v560_v20 = vrot.slane %v558_v9, 7 }
  0x8a   : > { %v870_v23 = vsel %vm10000_vm8, %v682_v61, %v869_v19  ;;  %v10149_v24 = vrot.slane %v566_v14, 7  ;;  %v261_v25 = vsel %vm9965_vm2, 0, %v260_v57  ;;  %v694_v31 = vshrl.u32 %v10135_v58, 16  ;;  %v9596_v42 = vld [vmem:[#allocation7 + $0x80] sm:$0xff]   ;;  %v1275_v49 = vld [vmem:[#allocation3] sm:$0xf] }
  0x8b   : > { %v691_v22 = vsel %vm9994_vm7, %v683_v62, %v690_v13  ;;  %871 = vst [vmem:[#allocation3 + $0xa8] sm:$0xf] %v870_v23  ;;  %v563_v26 = vor.u32 %v561_v10, %v560_v20  ;;  %v564_v28 = vrot.slane %v560_v20, 4  ;;  %262 = vst [vmem:[#allocation3 + $0xb4] sm:$0x1] %v261_v25  ;;  %v697_v34 = vshll.u32 %v10135_v58, 16  ;;  %9154 = vmatprep.subr.bf16.mxu0 %v9596_v42 }
  0x8c   : > { %v9584_v18 = vld [vmem:[#allocation3 + $0x9c] sm:$0xff]   ;;  %872 = vst [vmem:[#allocation3 + $0xac] sm:$0xf] %v691_v22  ;;  %v820_v30 = vld [vmem:[#allocation3 + $0x54] sm:$0xf]  ;;  %v571_v33 = vor.u32 %v569_v16, %v10149_v24  ;;  %v702_v35 = vshrl.u32 %v8824_v21, 16  ;;  %9107 = vmatpush3.bf16.msra.mxu1 %v9595_v32  ;;  %9155 = vmatpush3.bf16.msra.mxu0 %v9596_v42 }
  0x8d   : > { %9085 = vmatmul.mubr.bf16.gmra.mxu1 %v9584_v18  ;;  %v705_v37 = vshll.u32 %v8824_v21, 16  ;;  %vm1323_vm11 = vsmask.f32 3328  ;;  %vm1324_vm12 = vsmask.f32 7440  ;;  %v821_v43 = vsel %vm10000_vm8, %v563_v26, %v820_v30  ;;  %v10165_v50 = vld [vmem:[#allocation7 + $0x138] sm:$0xff]   ;;  %9188 = vmatprep.subr.bf16.mxu1 %v10159_v46 }
  0x8e   : > { %v696_v44 = vrot.slane %v694_v31, 7  ;;  %v572_v47 = vsel %vm9994_vm7, %v564_v28, %v571_v33  ;;  %822 = vst [vmem:[#allocation3 + $0x54] sm:$0xf] %v821_v43  ;;  %v10163_v48 = vrot.slane %v702_v35, 7  ;;  %v272_v58 = vsel %vm9970_vm4, 0, %v271_v51  ;;  %9236 = vmatprep.subr.bf16.mxu0 %v10165_v50  ;;  %vm10186_vm14 = vmor %vm1323_vm11, %vm1324_vm12  ;;  %v10297_v42 = vld [vmem:[#allocation7 + $0xd0] sm:$0xff]  }
  0x8f   : > { %823 = vst [vmem:[#allocation3 + $0x58] sm:$0xf] %v572_v47  ;;  %v1276_v59 = vld [vmem:[#allocation3 + $0x4] sm:$0xf]  ;;  %v1327_v61 = vshrl.u32 %v1275_v49, 16  ;;  %v522_v62 = vrot.slane %v10080_v6, 4 }
  0x90   : > { %v9589_v54 = vld [vmem:[#allocation3 + $0x48] sm:$0xff]   ;;  %v700_v55 = vrot.slane %v696_v44, 4  ;;  %v699_v56 = vor.u32 %v697_v34, %v696_v44  ;;  %v707_v57 = vor.u32 %v705_v37, %v10163_v48  ;;  %273 = vst [vmem:[#allocation3 + $0x8] sm:$0x1] %v272_v58  ;;  %v1330_v1 = vshll.u32 %v1275_v49, 16  ;;  %v9610_v6 = vld [vmem:[#allocation7 + $0x108] sm:$0xff]  }
  0x91   : > { %9072 = vmatprep.mubr.bf16.mxu0 %v9589_v54  ;;  %v1336_v2 = vshll.u32 %v1276_v59, 16  ;;  %v1340_v3 = vshrl.u32 %v1276_v59, 16  ;;  %v2095_v7 = vld [vmem:[#allocation3] sm:$0xe]  ;;  %v1329_v13 = vrot.slane %v1327_v61, 4  ;;  %vm8179_vm3 = vcmask 1042434  }
  0x92   : > { %v708_v10 = vsel %vm9994_vm7, %v700_v55, %v707_v57  ;;  %v876_v14 = vld [vmem:[#allocation3 + $0xb4] sm:$0xf]  ;;  %v1332_v16 = vrot.slane %v1330_v1, 5  ;;  %v8444_v19 = vrot.slane %v2095_v7, 9  ;;  %v2096_v21 = vld [vmem:[#allocation3 + $0x4] sm:$0xf] }
  0x93   : > { %v9590_v9 = vld [vmem:[#allocation3 + $0xa8] sm:$0xff]   ;;  %879 = vst [vmem:[#allocation3 + $0xb8] sm:$0xf] %v708_v10  ;;  %v1338_v17 = vrot.slane %v1336_v2, 5  ;;  %v1342_v18 = vrot.slane %v1340_v3, 4  ;;  %v877_v20 = vsel %vm10000_vm8, %v699_v56, %v876_v14  ;;  %v2196_v28 = vrot.slane %v2096_v21, 5 }
  0x94   : > { %9088 = vmatprep.mubr.bf16.mxu1 %v9590_v9  ;;  %v1278_v22 = vld [vmem:[#allocation3 + $0xc] sm:$0xf]  ;;  %v1279_v23 = vld [vmem:[#allocation3 + $0x10] sm:$0xf]  ;;  %878 = vst [vmem:[#allocation3 + $0xb4] sm:$0xf] %v877_v20  ;;  %v1333_v25 = vor.u32 %v1332_v16, %v1329_v13 }
  0x95   : > { %v1343_v26 = vor.u32 %v1342_v18, %v1338_v17  ;;  %v1280_v30 = vld [vmem:[#allocation3 + $0x14] sm:$0x1]  ;;  %v1351_v31 = vshrl.u32 %v1278_v22, 16  ;;  %v1354_v34 = vshll.u32 %v1278_v22, 16  ;;  %v1360_v35 = vshll.u32 %v1279_v23, 16  ;;  %p12122_p11 = scmp.ne.s32.totalorder %s12023_s6, 0 }
  0x96   : > { %v9591_v32 = vld [vmem:[#allocation3 + $0x54] sm:$0xff]   ;;  %v1364_v37 = vshrl.u32 %v1279_v23, 16  ;;  %v1334_v44 = vrot.slane %v1333_v25, 4  ;;  %v2198_v51 = vrot.slane %v2196_v28, 4  ;;  %v2098_v49 = vld [vmem:[#allocation3 + $0xc] sm:$0xe]  ;;  %v2197_v59 = vsel %vm10179_vm13, %v8444_v19, %v2196_v28 }
  0x97   : > { %v1344_v47 = vrot.slane %v1343_v26, 4  ;;  %9073 = vmatmul.mubr.bf16.gmra.mxu0 %v9591_v32  ;;  %v1277_v54 = vld [vmem:[#allocation3 + $0x8] sm:$0x1]  ;;  %v1353_v56 = vrot.slane %v1351_v31, 4  ;;  %v1356_v57 = vrot.slane %v1354_v34, 5  ;;  %v1362_v1 = vrot.slane %v1360_v35, 5  ;;  %p9735_p7 = pnand %p9734_p3, %p12122_p11 }
  0x98   : > { %v2097_v55 = vld [vmem:[#allocation3 + $0x8] sm:$0x1]  ;;  %v1346_v58 = vshll.u32 %v1277_v54, 16  ;;  %v2099_v2 = vld [vmem:[#allocation3 + $0x10] sm:$0xf]  ;;  %v1339_v3 = vsel %vm10186_vm14, %v1334_v44, %v1338_v17  ;;  %v1366_v9 = vrot.slane %v1364_v37, 4 }
  0x99   : > { %v2199_v61 = vrot.slane %v2097_v55, 5  ;;  %v1357_v7 = vor.u32 %v1356_v57, %v1353_v56  ;;  %v1370_v10 = vshll.u32 %v1280_v30, 16  ;;  %v2100_v13 = vld [vmem:[#allocation3 + $0x14] sm:$0x1]  ;;  %v8445_v18 = vrot.slane %v2098_v49, 9  ;;  %p9736_p12 = pneg %p9735_p7  ;;  %s9811_s11 = smov [#allocation9]  }
  0x9a   : > { %v1348_v14 = vrot.slane %v1346_v58, 5  ;;  %v2203_v20 = vrot.slane %v2099_v2, 5  ;;  %v1367_v19 = vor.u32 %v1366_v9, %v1362_v1  ;;  %v2206_v30 = vrot.slane %v2100_v13, 5  ;;  %v277_v35 = vld [vmem:[#allocation3 + $0x20] sm:$0x1]  ;;  %s9737_s21 = sshll.u32 %s9811_s11, 4  ;;  %s9738_s21 = int_to_ptr.vmem [resolvable:$false] %s9737_s21 }
  0x9b   : > { %v2200_v16 = vsel %vm10179_vm13, %v2198_v51, %v2199_v61  ;;  %v9592_v21 = vld [vmem:[#allocation3 + $0xb4] sm:$0xff]   ;;  %v1358_v23 = vrot.slane %v1357_v7, 4  ;;  %v1372_v25 = vrot.slane %v1370_v10, 5  ;;  %v539_v31 = vrot.slane %v10101_v53, 4  ;;  %v1282_v54 = vld [vmem:[#allocation3 + $0x1c] sm:$0xf]  ;;  %p9740_p10 = scmp.lt.s32.totalorder %s11963_s4, %s9738_s21 }
  0x9c   : > { %v8460_v22 = vcombine.low %v2197_v59, %v2200_v16  ;;  %v1349_v26 = vsel %vm10186_vm14, %v1344_v47, %v1348_v14  ;;  %v2204_v17 = vsel %vm10179_vm13, %v8445_v18, %v2203_v20  ;;  %v2205_v28 = vrot.slane %v2203_v20, 4  ;;  %9089 = vmatmul.mubr.bf16.gmra.mxu1 %v9592_v21  ;;  %v1281_v49 = vld [vmem:[#allocation3 + $0x18] sm:$0xf]  ;;  %v9600_v59 = vld [vmem:[#allocation7 + $0x130] sm:$0xff]   ;;  %v1284_v14 = vld [vmem:[#allocation3 + $0x24] sm:$0xf] }
  0x9d   : > { %v8420_v32 = vcombine.low %v1339_v3, %v1349_v26  ;;  %v1368_v34 = vrot.slane %v1367_v19, 4  ;;  %v556_v37 = vrot.slane %v10126_v40, 4  ;;  %v1363_v44 = vsel %vm10186_vm14, %v1358_v23, %v1362_v1  ;;  %v10210_v1 = vld [vmem:[#allocation3 + $0x1c] sm:$0xf]  ;;  %v280_v3 = vld [vmem:[#allocation3 + $0x2c] sm:$0x1] }
  0x9e   : > { %9156 = vmatprep.mubr.bf16.mxu0 %v8460_v22  ;;  %v2207_v47 = vsel %vm10179_vm13, %v2205_v28, %v2206_v30  ;;  %v278_v51 = vsel %vm9970_vm4, 0, %v277_v35  ;;  %v1375_v57 = vshrl.u32 %v1281_v49, 16  ;;  %v1378_v58 = vshll.u32 %v1281_v49, 16  ;;  %v1285_v20 = vld [vmem:[#allocation3 + $0x28] sm:$0xf]  ;;  %v9602_v28 = vld [vmem:[#allocation7 + $0x128] sm:$0xff]  }
  0x9f   : > { %9108 = vmatprep.mubr.bf16.mxu1 %v8420_v32  ;;  %v1373_v55 = vsel %vm10186_vm14, %v1368_v34, %v1372_v25  ;;  %v8461_v56 = vcombine.low %v2204_v17, %v2207_v47  ;;  %279 = vst [vmem:[#allocation3 + $0x20] sm:$0x1] %v278_v51  ;;  %v1384_v61 = vshll.u32 %v1282_v54, 16  ;;  %v1388_v2 = vshrl.u32 %v1282_v54, 16  ;;  %v10217_v19 = vld [vmem:[#allocation3 + $0x18] sm:$0xe] }
  0xa0   : > { %v8421_v7 = vcombine.low %v1363_v44, %v1373_v55  ;;  %v1377_v9 = vrot.slane %v1375_v57, 4  ;;  %v1380_v10 = vrot.slane %v1378_v58, 5  ;;  %v281_v13 = vsel %vm9970_vm4, 0, %v280_v3  ;;  %v9599_v17 = vld [vmem:[#allocation7 + $0xf0] sm:$0xff]   ;;  %v10223_v44 = vld [vmem:[#allocation3 + $0x24] sm:$0xe] }
  0xa1   : > { %9157 = vmatmul.mubr.bf16.vlgmr.msra.gmra.mxu0 %v8461_v56  ;;  %v10215_v16 = vrot.slane %v1384_v61, 5  ;;  %v1390_v18 = vrot.slane %v1388_v2, 4  ;;  %282 = vst [vmem:[#allocation3 + $0x2c] sm:$0x1] %v281_v13  ;;  %v1399_v21 = vshrl.u32 %v1284_v14, 16  ;;  %v1402_v22 = vshll.u32 %v1284_v14, 16 }
  0xa2   : > { %9237 = vmatpush3.bf16.msra.mxu0 %v10165_v50  ;;  %v1381_v23 = vor.u32 %v1380_v10, %v1377_v9  ;;  %v2210_v25 = vrot.slane %v10210_v1, 5  ;;  %v1408_v26 = vshll.u32 %v1285_v20, 16  ;;  %v573_v30 = vrot.slane %v10149_v24, 4  ;;  %v10225_v47 = vld [vmem:[#allocation3 + $0x28] sm:$0xf]  ;;  %v9601_v51 = vld [vmem:[#allocation7 + $0xe8] sm:$0xff]  }
  0xa3   : > { %9238 = vmatprep.subr.bf16.mxu0 %v9600_v59  ;;  %v1401_v32 = vrot.slane %v1399_v21, 4  ;;  %v1404_v50 = vrot.slane %v1402_v22, 5  ;;  %v1412_v34 = vshrl.u32 %v1285_v20, 16  ;;  %v9604_v49 = vld [vmem:[#allocation7 + $0x120] sm:$0xff]   ;;  %v1391_v55 = vor.u32 %v1390_v18, %v10215_v16  ;;  %v1287_v9 = vld [vmem:[#allocation3 + $0x30] sm:$0xf] }
  0xa4   : > { %9109 = vmatmul.mubr.bf16.vlgmr.msra.gmra.mxu1 %v8421_v7  ;;  %v10221_v35 = vrot.slane %v1408_v26, 5  ;;  %v8446_v56 = vrot.slane %v10217_v19, 9  ;;  %v10234_v61 = vrot.slane %v1381_v23, 4  ;;  %v10238_v2 = vrot.slane %v2210_v25, 4  ;;  %v10244_v21 = vld [vmem:[#allocation7 + $0xe0] sm:$0xff]   ;;  %v9606_v22 = vld [vmem:[#allocation7 + $0x118] sm:$0xff]  }
  0xa5   : > { %9189 = vmatpush3.bf16.msra.mxu1 %v10159_v46  ;;  %v1414_v57 = vrot.slane %v1412_v34, 4  ;;  %v283_v46 = vld [vmem:[#allocation3 + $0x38] sm:$0x1]  ;;  %v1405_v3 = vor.u32 %v1404_v50, %v1401_v32  ;;  %v1423_v13 = vshrl.u32 %v1287_v9, 16  ;;  %v1426_v14 = vshll.u32 %v1287_v9, 16  ;;  %s9739_s27 = scalar_lea.vmem %s9738_s21, 2048 }
  0xa6   : > { %v789_v54 = vld [vmem:[#allocation3 + $0x20] sm:$0x1]  ;;  %9239 = vmatpush3.bf16.msra.mxu0 %v9600_v59  ;;  %9190 = vmatprep.subr.bf16.mxu1 %v9599_v17  ;;  %v2217_v59 = vrot.slane %v10225_v47, 5  ;;  %v284_v45 = vsel %vm9970_vm4, 0, %v283_v46  ;;  %v10246_v23 = vrot.slane %v1391_v55, 4  ;;  %v8447_v26 = vrot.slane %v10223_v44, 9  ;;  %p9741_p2 = scmp.lt.s32.totalorder %s9739_s27, %s9733_s10 }
  0xa7   : > { %v790_v58 = vsel %vm9965_vm2, %v488_v38, %v789_v54  ;;  %9240 = vmatprep.subr.bf16.mxu0 %v9602_v28  ;;  %v1415_v7 = vor.u32 %v1414_v57, %v10221_v35  ;;  %v1288_v38 = vld [vmem:[#allocation3 + $0x34] sm:$0xf]  ;;  %285 = vst [vmem:[#allocation3 + $0x38] sm:$0x1] %v284_v45  ;;  %v10253_v32 = vld [vmem:[#allocation3 + $0x30] sm:$0xe] }
  0xa8   : > { %791 = vst [vmem:[#allocation3 + $0x20] sm:$0x1] %v790_v58  ;;  %v796_v10 = vld [vmem:[#allocation3 + $0x2c] sm:$0x1]  ;;  %v1432_v18 = vshll.u32 %v1288_v38, 16  ;;  %v1436_v20 = vshrl.u32 %v1288_v38, 16  ;;  %p9742_p13 = por %p9741_p2, %p9740_p10 }
  0xa9   : > { %v797_v19 = vsel %vm9965_vm2, %v505_v11, %v796_v10  ;;  %9191 = vmatpush3.bf16.msra.mxu1 %v9599_v17  ;;  %v10255_v50 = vld [vmem:[#allocation3 + $0x34] sm:$0xf]  ;;  %v1425_v34 = vrot.slane %v1423_v13, 4  ;;  %v1428_v47 = vrot.slane %v1426_v14, 5  ;;  %v286_v57 = vld [vmem:[#allocation3 + $0x44] sm:$0x1] }
  0xaa   : > { %9241 = vmatpush3.bf16.msra.mxu0 %v9602_v28  ;;  %798 = vst [vmem:[#allocation3 + $0x2c] sm:$0x1] %v797_v19  ;;  %v10257_v54 = vrot.slane %v1432_v18, 5  ;;  %v1438_v55 = vrot.slane %v1436_v20, 4  ;;  %9192 = vmatprep.subr.bf16.mxu1 %v9601_v51  ;;  %v10259_v12 = vrot.slane %v1405_v3, 4  ;;  %v10261_v11 = vrot.slane %v2217_v59, 4  ;;  %p9743_p0 = pnand %p9742_p13, %p9736_p12 }
  0xab   : > { %9242 = vmatprep.subr.bf16.mxu0 %v9604_v49  ;;  %v2224_v17 = vrot.slane %v10255_v50, 5  ;;  %v287_v44 = vsel %vm9970_vm4, 0, %v286_v57  ;;  %v1290_v58 = vld [vmem:[#allocation3 + $0x3c] sm:$0xf]  ;;  %v10266_v28 = vrot.slane %v1415_v7, 4  ;;  %v1429_v46 = vor.u32 %v1428_v47, %v1425_v34  ;;  %v9605_v18 = vld [vmem:[#allocation7 + $0xd8] sm:$0xff]  }
  0xac   : > { %288 = vst [vmem:[#allocation3 + $0x44] sm:$0x1] %v287_v44  ;;  %v1291_v45 = vld [vmem:[#allocation3 + $0x40] sm:$0xf]  ;;  %v1447_v9 = vshrl.u32 %v1290_v58, 16  ;;  %v1450_v38 = vshll.u32 %v1290_v58, 16  ;;  %v1439_v10 = vor.u32 %v1438_v55, %v10257_v54  ;;  %v1387_v7 = vsel %vm10186_vm14, %v10234_v61, %v10215_v16 }
  0xad   : > { %v8448_v3 = vrot.slane %v10253_v32, 9  ;;  %v1456_v13 = vshll.u32 %v1291_v45, 16  ;;  %v1460_v14 = vshrl.u32 %v1291_v45, 16  ;;  %9193 = vmatpush3.bf16.msra.mxu1 %v9601_v51  ;;  %v9608_v20 = vld [vmem:[#allocation7 + $0x110] sm:$0xff]   ;;  %v2211_v47 = vsel %vm10179_vm13, %v8446_v56, %v2210_v25  ;;  %v10286_v57 = vld [vmem:[#allocation3 + $0x40] sm:$0xf] }
  0xae   : > { %9243 = vmatpush3.bf16.msra.mxu0 %v9604_v49  ;;  %v10278_v55 = vrot.slane %v1429_v46, 4  ;;  %v10282_v51 = vrot.slane %v2224_v17, 4  ;;  %v10284_v49 = vld [vmem:[#allocation3 + $0x3c] sm:$0xe]  ;;  %9194 = vmatprep.subr.bf16.mxu1 %v10244_v21  ;;  %v803_v44 = vld [vmem:[#allocation3 + $0x38] sm:$0x1]  ;;  %v2218_v25 = vsel %vm10179_vm13, %v8447_v26, %v2217_v59 }
  0xaf   : > { %v1283_v19 = vld [vmem:[#allocation3 + $0x20] sm:$0x1]  ;;  %9244 = vmatprep.subr.bf16.mxu0 %v9606_v22  ;;  %v1449_v1 = vrot.slane %v1447_v9, 4  ;;  %v1452_v58 = vrot.slane %v1450_v38, 5  ;;  %v804_v56 = vsel %vm9965_vm2, %v522_v62, %v803_v44  ;;  %v10295_v46 = vrot.slane %v1456_v13, 5  ;;  %v9611_v32 = vld [vmem:[#allocation7 + $0xc0] sm:$0xff]  }
  0xb0   : > { %v2103_v34 = vld [vmem:[#allocation3 + $0x20] sm:$0x1]  ;;  %v1394_v16 = vshll.u32 %v1283_v19, 16  ;;  %v1462_v45 = vrot.slane %v1460_v14, 4  ;;  %805 = vst [vmem:[#allocation3 + $0x38] sm:$0x1] %v804_v56 }
  0xb1   : > { %v2213_v61 = vrot.slane %v2103_v34, 5  ;;  %v1286_v9 = vld [vmem:[#allocation3 + $0x2c] sm:$0x1]  ;;  %v10302_v34 = vrot.slane %v1439_v10, 4  ;;  %v1453_v59 = vor.u32 %v1452_v58, %v1449_v1  ;;  %9195 = vmatpush3.bf16.msra.mxu1 %v10244_v21  ;;  %v1411_v10 = vsel %vm10186_vm14, %v10259_v12, %v10221_v35  ;;  %v1309_v8 = vld [vmem:[#allocation3 + $0x88] sm:$0xf] }
  0xb2   : > { %v1396_v27 = vrot.slane %v1394_v16, 5  ;;  %v2106_v38 = vld [vmem:[#allocation3 + $0x2c] sm:$0x1]  ;;  %9245 = vmatpush3.bf16.msra.mxu0 %v9606_v22  ;;  %v1418_v26 = vshll.u32 %v1286_v9, 16  ;;  %v1463_v14 = vor.u32 %v1462_v45, %v10295_v46  ;;  %9196 = vmatprep.subr.bf16.mxu1 %v9605_v18  ;;  %v8449_v21 = vrot.slane %v10284_v49, 9  ;;  %v9612_v9 = vld [vmem:[#allocation7 + $0x100] sm:$0xff]  }
  0xb3   : > { %v2214_v19 = vsel %vm10179_vm13, %v10238_v2, %v2213_v61  ;;  %v2220_v13 = vrot.slane %v2106_v38, 5  ;;  %9246 = vmatprep.subr.bf16.mxu0 %v9608_v20  ;;  %v810_v16 = vld [vmem:[#allocation3 + $0x44] sm:$0x1]  ;;  %v2231_v22 = vrot.slane %v10286_v57, 5  ;;  %v1294_v35 = vld [vmem:[#allocation3 + $0x4c] sm:$0xf] }
  0xb4   : > { %v8462_v62 = vcombine.low %v2211_v47, %v2214_v19  ;;  %v1397_v2 = vsel %vm10186_vm14, %v10246_v23, %v1396_v27  ;;  %v289_v47 = vld [vmem:[#allocation3 + $0x50] sm:$0x1]  ;;  %v1420_v44 = vrot.slane %v1418_v26, 5  ;;  %v811_v27 = vsel %vm9965_vm2, %v539_v31, %v810_v16  ;;  %v1293_v23 = vld [vmem:[#allocation3 + $0x48] sm:$0xf] }
  0xb5   : > { %v8422_v61 = vcombine.low %v1387_v7, %v1397_v2  ;;  %v2221_v1 = vsel %vm10179_vm13, %v10261_v11, %v2220_v13  ;;  %812 = vst [vmem:[#allocation3 + $0x44] sm:$0x1] %v811_v27  ;;  %v10322_v58 = vrot.slane %v1453_v59, 4  ;;  %v10324_v56 = vrot.slane %v1463_v14, 4  ;;  %v2113_v7 = vld [vmem:[#allocation3 + $0x48] sm:$0xe]  ;;  %9197 = vmatpush3.bf16.msra.mxu1 %v9605_v18 }
  0xb6   : > { %9160 = vmatprep.mubr.bf16.mxu0 %v8462_v62  ;;  %v8463_v12 = vcombine.low %v2218_v25, %v2221_v1  ;;  %v10326_v45 = vld [vmem:[#allocation3 + $0x4c] sm:$0xf]  ;;  %9247 = vmatpush3.bf16.msra.mxu0 %v9608_v20  ;;  %v1421_v53 = vsel %vm10186_vm14, %v10266_v28, %v1420_v44  ;;  %v10333_v31 = vrot.slane %v2231_v22, 4  ;;  %v290_v11 = vsel %vm9970_vm4, 0, %v289_v47  ;;  %v292_v19 = vld [vmem:[#allocation3 + $0x5c] sm:$0x1] }
  0xb7   : > { %9112 = vmatprep.mubr.bf16.mxu1 %v8422_v61  ;;  %v1471_v25 = vshrl.u32 %v1293_v23, 16  ;;  %9198 = vmatprep.subr.bf16.mxu1 %v10297_v42  ;;  %v8423_v38 = vcombine.low %v1411_v10, %v1421_v53  ;;  %291 = vst [vmem:[#allocation3 + $0x50] sm:$0x1] %v290_v11  ;;  %v1474_v18 = vshll.u32 %v1293_v23, 16  ;;  %v1480_v20 = vshll.u32 %v1294_v35, 16  ;;  %v9609_v28 = vld [vmem:[#allocation7 + $0xc8] sm:$0xff]  }
  0xb8   : > { %9161 = vmatmul.mubr.bf16.gmra.mxu0 %v8463_v12  ;;  %v1484_v59 = vshrl.u32 %v1294_v35, 16  ;;  %v1296_v62 = vld [vmem:[#allocation3 + $0x54] sm:$0xf]  ;;  %9248 = vmatprep.subr.bf16.mxu0 %v9610_v6  ;;  %v1289_v26 = vld [vmem:[#allocation3 + $0x38] sm:$0x1]  ;;  %v1435_v13 = vsel %vm10186_vm14, %v10278_v55, %v10257_v54  ;;  %v2225_v2 = vsel %vm10179_vm13, %v8448_v3, %v2224_v17  ;;  %v8450_v16 = vrot.slane %v2113_v7, 9 }
  0xb9   : > { %v2109_v14 = vld [vmem:[#allocation3 + $0x38] sm:$0x1]  ;;  %v1473_v10 = vrot.slane %v1471_v25, 4  ;;  %9113 = vmatmul.mubr.bf16.gmra.mxu1 %v8423_v38  ;;  %v1442_v47 = vshll.u32 %v1289_v26, 16  ;;  %v1476_v44 = vrot.slane %v1474_v18, 5  ;;  %v10348_v1 = vrot.slane %v1480_v20, 5 }
  0xba   : > { %v2227_v61 = vrot.slane %v2109_v14, 5  ;;  %9249 = vmatpush3.bf16.msra.mxu0 %v9610_v6  ;;  %v1486_v27 = vrot.slane %v1484_v59, 4  ;;  %v2238_v54 = vrot.slane %v10326_v45, 5  ;;  %v293_v50 = vsel %vm9970_vm4, 0, %v292_v19  ;;  %9199 = vmatpush3.bf16.msra.mxu1 %v10297_v42  ;;  %v9616_v17 = vld [vmem:[#allocation7 + $0x1b8] sm:$0xff]  }
  0xbb   : > { %v1495_v55 = vshrl.u32 %v1296_v62, 16  ;;  %9250 = vmatprep.subr.bf16.mxu0 %v9612_v9  ;;  %v1444_v3 = vrot.slane %v1442_v47, 5  ;;  %v1477_v35 = vor.u32 %v1476_v44, %v1473_v10  ;;  %294 = vst [vmem:[#allocation3 + $0x5c] sm:$0x1] %v293_v50  ;;  %v1297_v6 = vld [vmem:[#allocation3 + $0x58] sm:$0xf]  ;;  %9200 = vmatprep.subr.bf16.mxu1 %v9609_v28  ;;  %v1459_v42 = vsel %vm10186_vm14, %v10322_v58, %v10295_v46 }
  0xbc   : > { %v2228_v23 = vsel %vm10179_vm13, %v10282_v51, %v2227_v61  ;;  %v1498_v12 = vshll.u32 %v1296_v62, 16  ;;  %v1292_v45 = vld [vmem:[#allocation3 + $0x44] sm:$0x1]  ;;  %v2232_v51 = vsel %vm10179_vm13, %v8449_v21, %v2231_v22  ;;  %v1487_v11 = vor.u32 %v1486_v27, %v10348_v1  ;;  %v2116_v25 = vld [vmem:[#allocation3 + $0x54] sm:$0xe] }
  0xbd   : > { %v8464_v7 = vcombine.low %v2225_v2, %v2228_v23  ;;  %v2112_v53 = vld [vmem:[#allocation3 + $0x44] sm:$0x1]  ;;  %v1445_v19 = vsel %vm10186_vm14, %v10302_v34, %v1444_v3  ;;  %v1466_v38 = vshll.u32 %v1292_v45, 16  ;;  %v10373_v46 = vsel %vm10179_vm13, %v8450_v16, %v2238_v54  ;;  %v2117_v58 = vld [vmem:[#allocation3 + $0x58] sm:$0xf]  ;;  %v10377_v59 = vld [vmem:[#allocation7 + $0x178] sm:$0xff]  }
  0xbe   : > { %v2234_v18 = vrot.slane %v2112_v53, 5  ;;  %9251 = vmatpush3.bf16.msra.mxu0 %v9612_v9  ;;  %v8424_v57 = vcombine.low %v1435_v13, %v1445_v19  ;;  %v817_v49 = vld [vmem:[#allocation3 + $0x50] sm:$0x1]  ;;  %v10375_v20 = vrot.slane %v1477_v35, 4  ;;  %v1497_v21 = vrot.slane %v1495_v55, 4  ;;  %9201 = vmatpush3.bf16.msra.mxu1 %v9609_v28 }
  0xbf   : > { %9164 = vmatprep.mubr.bf16.mxu0 %v8464_v7  ;;  %v1500_v22 = vrot.slane %v1498_v12, 5  ;;  %v1468_v62 = vrot.slane %v1466_v38, 5  ;;  %v818_v9 = vsel %vm9965_vm2, %v556_v37, %v817_v49  ;;  %v10386_v26 = vrot.slane %v2238_v54, 4  ;;  %9202 = vmatprep.subr.bf16.mxu1 %v9611_v32  ;;  %v1299_v10 = vld [vmem:[#allocation3 + $0x60] sm:$0xf] }
  0xc0   : > { %v2235_v34 = vsel %vm10179_vm13, %v10333_v31, %v2234_v18  ;;  %9332 = vmatprep.subr.bf16.mxu0 %v9616_v17  ;;  %9116 = vmatprep.mubr.bf16.mxu1 %v8424_v57  ;;  %819 = vst [vmem:[#allocation3 + $0x50] sm:$0x1] %v818_v9  ;;  %v1504_v14 = vshll.u32 %v1297_v6, 16  ;;  %v1508_v2 = vshrl.u32 %v1297_v6, 16  ;;  %v8451_v16 = vrot.slane %v2116_v25, 9 }
  0xc1   : > { %v8465_v13 = vcombine.low %v2232_v51, %v2235_v34  ;;  %v1501_v28 = vor.u32 %v1500_v22, %v1497_v21  ;;  %v1469_v31 = vsel %vm10186_vm14, %v10324_v56, %v1468_v62  ;;  %v2245_v40 = vrot.slane %v2117_v58, 5  ;;  %v1300_v47 = vld [vmem:[#allocation3 + $0x64] sm:$0xf]  ;;  %v1301_v55 = vld [vmem:[#allocation3 + $0x68] sm:$0x1] }
  0xc2   : > { %v1519_v61 = vshrl.u32 %v1299_v10, 16  ;;  %v8425_v37 = vcombine.low %v1459_v42, %v1469_v31  ;;  %v1483_v44 = vsel %vm10186_vm14, %v10375_v20, %v10348_v1  ;;  %v1488_v27 = vrot.slane %v1487_v11, 4  ;;  %v824_v54 = vld [vmem:[#allocation3 + $0x5c] sm:$0x1]  ;;  %9203 = vmatpush3.bf16.msra.mxu1 %v9611_v32  ;;  %v2119_v35 = vld [vmem:[#allocation3 + $0x60] sm:$0xe] }
  0xc3   : > { %9165 = vmatmul.mubr.bf16.gmra.mxu0 %v8465_v13  ;;  %v10395_v50 = vrot.slane %v1501_v28, 4  ;;  %v825_v56 = vsel %vm9965_vm2, %v573_v30, %v824_v54  ;;  %v10401_v17 = vrot.slane %v1504_v14, 5  ;;  %v1510_v3 = vrot.slane %v1508_v2, 4  ;;  %v2120_v1 = vld [vmem:[#allocation3 + $0x64] sm:$0xf]  ;;  %9284 = vmatprep.subr.bf16.mxu1 %v10377_v59 }
  0xc4   : > { %v10405_v23 = vsel %vm10179_vm13, %v8451_v16, %v2245_v40  ;;  %9117 = vmatmul.mubr.bf16.gmra.mxu1 %v8425_v37  ;;  %826 = vst [vmem:[#allocation3 + $0x5c] sm:$0x1] %v825_v56  ;;  %v2247_v6 = vrot.slane %v2245_v40, 4  ;;  %v1521_v32 = vrot.slane %v1519_v61, 4  ;;  %v1522_v12 = vshll.u32 %v1299_v10, 16 }
  0xc5   : > { %v1528_v24 = vshll.u32 %v1300_v47, 16  ;;  %v2121_v7 = vld [vmem:[#allocation3 + $0x68] sm:$0x1]  ;;  %v1532_v45 = vshrl.u32 %v1300_v47, 16  ;;  %v1538_v30 = vshll.u32 %v1301_v55, 16  ;;  %v8452_v42 = vrot.slane %v2119_v35, 9 }
  0xc6   : > { %v2252_v53 = vrot.slane %v2120_v1, 5  ;;  %v298_v51 = vld [vmem:[#allocation3 + $0x74] sm:$0x1]  ;;  %v1507_v11 = vsel %vm10186_vm14, %v10395_v50, %v10401_v17  ;;  %v1524_v25 = vrot.slane %v1522_v12, 5  ;;  %v2255_v38 = vrot.slane %v2121_v7, 5 }
  0xc7   : > { %v1530_v19 = vrot.slane %v1528_v24, 5  ;;  %v1302_v18 = vld [vmem:[#allocation3 + $0x6c] sm:$0xf]  ;;  %v1295_v58 = vld [vmem:[#allocation3 + $0x50] sm:$0x1]  ;;  %v1511_v49 = vor.u32 %v1510_v3, %v10401_v17  ;;  %v1534_v20 = vrot.slane %v1532_v45, 4 }
  0xc8   : > { %v2115_v57 = vld [vmem:[#allocation3 + $0x50] sm:$0x1]  ;;  %v1540_v21 = vrot.slane %v1538_v30, 5  ;;  %v2253_v22 = vsel %vm10179_vm13, %v8452_v42, %v2252_v53  ;;  %v1490_v62 = vshll.u32 %v1295_v58, 16  ;;  %v1525_v9 = vor.u32 %v1524_v25, %v1521_v32  ;;  %v301_v7 = vld [vmem:[#allocation3 + $0x80] sm:$0x1] }
  0xc9   : > { %v2241_v34 = vrot.slane %v2115_v57, 5  ;;  %v2254_v13 = vrot.slane %v2252_v53, 4  ;;  %v1535_v28 = vor.u32 %v1534_v20, %v1530_v19  ;;  %v299_v14 = vsel %vm9970_vm4, 0, %v298_v51  ;;  %v1303_v2 = vld [vmem:[#allocation3 + $0x70] sm:$0xf] }
  0xca   : > { %v1543_v10 = vshrl.u32 %v1302_v18, 16  ;;  %v1546_v31 = vshll.u32 %v1302_v18, 16  ;;  %v1492_v16 = vrot.slane %v1490_v62, 5  ;;  %v1526_v47 = vrot.slane %v1525_v9, 4  ;;  %300 = vst [vmem:[#allocation3 + $0x74] sm:$0x1] %v299_v14 }
  0xcb   : > { %v2242_v40 = vsel %vm10179_vm13, %v10386_v26, %v2241_v34  ;;  %v2256_v61 = vsel %vm10179_vm13, %v2254_v13, %v2255_v38  ;;  %v1298_v54 = vld [vmem:[#allocation3 + $0x5c] sm:$0x1]  ;;  %v1512_v50 = vrot.slane %v1511_v49, 4  ;;  %v1536_v56 = vrot.slane %v1535_v28, 4  ;;  %v2122_v38 = vld [vmem:[#allocation3 + $0x6c] sm:$0xe] }
  0xcc   : > { %v8466_v37 = vcombine.low %v10373_v46, %v2242_v40  ;;  %v2118_v55 = vld [vmem:[#allocation3 + $0x5c] sm:$0x1]  ;;  %v8468_v17 = vcombine.low %v2253_v22, %v2256_v61  ;;  %v1493_v3 = vsel %vm10186_vm14, %v1488_v27, %v1492_v16  ;;  %v1514_v35 = vshll.u32 %v1298_v54, 16  ;;  %v1305_v27 = vld [vmem:[#allocation3 + $0x78] sm:$0xf] }
  0xcd   : > { %v2248_v1 = vrot.slane %v2118_v55, 5  ;;  %v1531_v26 = vsel %vm10186_vm14, %v1526_v47, %v1530_v19  ;;  %v8426_v32 = vcombine.low %v1483_v44, %v1493_v3  ;;  %v1541_v12 = vsel %vm10186_vm14, %v1536_v56, %v1540_v21  ;;  %v2123_v18 = vld [vmem:[#allocation3 + $0x70] sm:$0xf]  ;;  %v1306_v20 = vld [vmem:[#allocation3 + $0x7c] sm:$0xf] }
  0xce   : > { %9168 = vmatprep.mubr.bf16.mxu0 %v8466_v37  ;;  %v1545_v24 = vrot.slane %v1543_v10, 4  ;;  %v1552_v46 = vshll.u32 %v1303_v2, 16  ;;  %v1516_v45 = vrot.slane %v1514_v35, 5  ;;  %v1548_v42 = vrot.slane %v1546_v31, 5  ;;  %v1308_v10 = vld [vmem:[#allocation3 + $0x84] sm:$0xf] }
  0xcf   : > { %v2249_v30 = vsel %vm10179_vm13, %v2247_v6, %v2248_v1  ;;  %v1556_v53 = vshrl.u32 %v1303_v2, 16  ;;  %v675_v51 = vrot.slane %v10104_v63, 4  ;;  %v692_v25 = vrot.slane %v10137_v0, 4  ;;  %9120 = vmatprep.mubr.bf16.mxu1 %v8426_v32  ;;  %v304_v2 = vld [vmem:[#allocation3 + $0x8c] sm:$0x1] }
  0xd0   : > { %v8467_v44 = vcombine.low %v10405_v23, %v2249_v30  ;;  %v8428_v19 = vcombine.low %v1531_v26, %v1541_v12  ;;  %v1517_v58 = vsel %vm10186_vm14, %v1512_v50, %v1516_v45  ;;  %v10436_v57 = vrot.slane %v1552_v46, 5  ;;  %v2126_v23 = vld [vmem:[#allocation3 + $0x7c] sm:$0xf]  ;;  %v2125_v47 = vld [vmem:[#allocation3 + $0x78] sm:$0xe] }
  0xd1   : > { %v1558_v49 = vrot.slane %v1556_v53, 4  ;;  %v302_v6 = vsel %vm9970_vm4, 0, %v301_v7  ;;  %v8427_v21 = vcombine.low %v1507_v11, %v1517_v58  ;;  %v838_v22 = vld [vmem:[#allocation3 + $0x74] sm:$0x1]  ;;  %v1567_v62 = vshrl.u32 %v1305_v27, 16 }
  0xd2   : > { %9169 = vmatmul.mubr.bf16.gmra.mxu0 %v8467_v44  ;;  %303 = vst [vmem:[#allocation3 + $0x80] sm:$0x1] %v302_v6  ;;  %v1570_v34 = vshll.u32 %v1305_v27, 16  ;;  %v709_v9 = vrot.slane %v10163_v48, 4  ;;  %v839_v13 = vsel %vm9965_vm2, %v607_v15, %v838_v22  ;;  %v1549_v28 = vor.u32 %v1548_v42, %v1545_v24  ;;  %v2129_v46 = vld [vmem:[#allocation3 + $0x88] sm:$0xf] }
  0xd3   : > { %9172 = vmatprep.mubr.bf16.mxu0 %v8468_v17  ;;  %v8453_v14 = vrot.slane %v2122_v38, 9  ;;  %9121 = vmatmul.mubr.bf16.gmra.mxu1 %v8427_v21  ;;  %840 = vst [vmem:[#allocation3 + $0x74] sm:$0x1] %v839_v13  ;;  %v2259_v11 = vrot.slane %v2123_v18, 5  ;;  %v1569_v31 = vrot.slane %v1567_v62, 4  ;;  %v1576_v40 = vshll.u32 %v1306_v20, 16 }
  0xd4   : > { %v1572_v16 = vrot.slane %v1570_v34, 5  ;;  %9124 = vmatprep.mubr.bf16.mxu1 %v8428_v19  ;;  %v1559_v61 = vor.u32 %v1558_v49, %v10436_v57  ;;  %v1580_v37 = vshrl.u32 %v1306_v20, 16  ;;  %v2266_v54 = vrot.slane %v2126_v23, 5  ;;  %v10450_v17 = vld [vmem:[#allocation3 + $0x84] sm:$0xe] }
  0xd5   : > { %v10446_v55 = vrot.slane %v1576_v40, 5  ;;  %v305_v15 = vsel %vm9970_vm4, 0, %v304_v2  ;;  %v1591_v56 = vshrl.u32 %v1308_v10, 16  ;;  %v1550_v3 = vrot.slane %v1549_v28, 4  ;;  %v307_v18 = vld [vmem:[#allocation3 + $0x98] sm:$0x1] }
  0xd6   : > { %v1573_v50 = vor.u32 %v1572_v16, %v1569_v31  ;;  %v1582_v35 = vrot.slane %v1580_v37, 4  ;;  %v8454_v1 = vrot.slane %v2125_v47, 9  ;;  %306 = vst [vmem:[#allocation3 + $0x8c] sm:$0x1] %v305_v15  ;;  %v1594_v26 = vshll.u32 %v1308_v10, 16 }
  0xd7   : > { %v2260_v32 = vsel %vm10179_vm13, %v8453_v14, %v2259_v11  ;;  %v2261_v12 = vrot.slane %v2259_v11, 4  ;;  %v1600_v24 = vshll.u32 %v1309_v8, 16  ;;  %v1560_v7 = vrot.slane %v1559_v61, 4  ;;  %v1311_v58 = vld [vmem:[#allocation3 + $0x90] sm:$0xf] }
  0xd8   : > { %v10454_v30 = vrot.slane %v1573_v50, 4  ;;  %v10456_v42 = vrot.slane %v2266_v54, 4  ;;  %v1604_v53 = vshrl.u32 %v1309_v8, 16  ;;  %v1583_v44 = vor.u32 %v1582_v35, %v10446_v55  ;;  %v1312_v13 = vld [vmem:[#allocation3 + $0x94] sm:$0xf] }
  0xd9   : > { %v845_v45 = vld [vmem:[#allocation3 + $0x80] sm:$0x1]  ;;  %v1593_v19 = vrot.slane %v1591_v56, 4  ;;  %v1596_v38 = vrot.slane %v1594_v26, 5  ;;  %v1555_v6 = vsel %vm10186_vm14, %v1550_v3, %v10436_v57  ;;  %v10468_v21 = vsel %vm10179_vm13, %v8454_v1, %v2266_v54  ;;  %v2131_v50 = vld [vmem:[#allocation3 + $0x90] sm:$0xe] }
  0xda   : > { %v846_v27 = vsel %vm9965_vm2, %v624_v52, %v845_v45  ;;  %v1304_v49 = vld [vmem:[#allocation3 + $0x74] sm:$0x1]  ;;  %v8455_v60 = vrot.slane %v10450_v17, 9  ;;  %v2273_v52 = vrot.slane %v2129_v46, 5  ;;  %v10471_v34 = vrot.slane %v1600_v24, 5 }
  0xdb   : > { %v2124_v20 = vld [vmem:[#allocation3 + $0x74] sm:$0x1]  ;;  %847 = vst [vmem:[#allocation3 + $0x80] sm:$0x1] %v846_v27  ;;  %v1562_v22 = vshll.u32 %v1304_v49, 16  ;;  %v308_v23 = vsel %vm9970_vm4, 0, %v307_v18  ;;  %v1597_v54 = vor.u32 %v1596_v38, %v1593_v19  ;;  %v1579_v17 = vsel %vm10186_vm14, %v10454_v30, %v10446_v55 }
  0xdc   : > { %v2262_v62 = vrot.slane %v2124_v20, 5  ;;  %v1606_v28 = vrot.slane %v1604_v53, 4  ;;  %309 = vst [vmem:[#allocation3 + $0x98] sm:$0x1] %v308_v23  ;;  %v1615_v57 = vshrl.u32 %v1311_v58, 16  ;;  %v1618_v14 = vshll.u32 %v1311_v58, 16 }
  0xdd   : > { %v1624_v2 = vshll.u32 %v1312_v13, 16  ;;  %v1564_v10 = vrot.slane %v1562_v22, 5  ;;  %v1584_v31 = vrot.slane %v1583_v44, 4  ;;  %v852_v16 = vld [vmem:[#allocation3 + $0x8c] sm:$0x1]  ;;  %v1628_v40 = vshrl.u32 %v1312_v13, 16 }
  0xde   : > { %v2263_v11 = vsel %vm10179_vm13, %v2261_v12, %v2262_v62  ;;  %v12042_v61 = vrot.slane %v10066_v39, 4  ;;  %v10481_v8 = vrot.slane %v2273_v52, 4  ;;  %v310_v15 = vld [vmem:[#allocation3 + $0xa4] sm:$0x1]  ;;  %v1617_v3 = vrot.slane %v1615_v57, 4 }
  0xdf   : > { %v8469_v47 = vcombine.low %v2260_v32, %v2263_v11  ;;  %v1565_v56 = vsel %vm10186_vm14, %v1560_v7, %v1564_v10  ;;  %v1620_v35 = vrot.slane %v1618_v14, 5  ;;  %v2132_v39 = vld [vmem:[#allocation3 + $0x94] sm:$0xf]  ;;  %v1314_v1 = vld [vmem:[#allocation3 + $0x9c] sm:$0xf]  ;;  %v10489_v32 = vrot.slane %v1624_v2, 5 }
  0xe0   : > { %v853_v37 = vsel %vm9965_vm2, %v12042_v61, %v852_v16  ;;  %v8429_v26 = vcombine.low %v1555_v6, %v1565_v56  ;;  %v1630_v12 = vrot.slane %v1628_v40, 4  ;;  %v311_v24 = vsel %vm9970_vm4, 0, %v310_v15  ;;  %v1315_v46 = vld [vmem:[#allocation3 + $0xa0] sm:$0xf]  ;;  %v10507_v11 = vld [vmem:[#allocation3 + $0x9c] sm:$0xe] }
  0xe1   : > { %854 = vst [vmem:[#allocation3 + $0x8c] sm:$0x1] %v853_v37  ;;  %9173 = vmatmul.mubr.bf16.gmra.mxu0 %v8469_v47  ;;  %v1607_v53 = vor.u32 %v1606_v28, %v10471_v34  ;;  %v2274_v55 = vsel %vm10179_vm13, %v8455_v60, %v2273_v52  ;;  %312 = vst [vmem:[#allocation3 + $0xa4] sm:$0x1] %v311_v24  ;;  %v1639_v30 = vshrl.u32 %v1314_v1, 16  ;;  %v1642_v27 = vshll.u32 %v1314_v1, 16 }
  0xe2   : > { %v1307_v7 = vld [vmem:[#allocation3 + $0x80] sm:$0x1]  ;;  %9125 = vmatmul.mubr.bf16.gmra.mxu1 %v8429_v26  ;;  %v1598_v38 = vrot.slane %v1597_v54, 4  ;;  %v2280_v18 = vrot.slane %v2132_v39, 5  ;;  %v1621_v49 = vor.u32 %v1620_v35, %v1617_v3  ;;  %v8456_v6 = vrot.slane %v2131_v50, 9 }
  0xe3   : > { %v2127_v45 = vld [vmem:[#allocation3 + $0x80] sm:$0x1]  ;;  %v1586_v44 = vshll.u32 %v1307_v7, 16  ;;  %v859_v58 = vld [vmem:[#allocation3 + $0x98] sm:$0x1]  ;;  %v1641_v20 = vrot.slane %v1639_v30, 4  ;;  %v1631_v2 = vor.u32 %v1630_v12, %v10489_v32 }
  0xe4   : > { %v2269_v19 = vrot.slane %v2127_v45, 5  ;;  %v1644_v22 = vrot.slane %v1642_v27, 5  ;;  %v12043_v60 = vrot.slane %v10090_v29, 4  ;;  %v1648_v13 = vshll.u32 %v1315_v46, 16  ;;  %v10503_v28 = vld [vmem:[#allocation3 + $0xa0] sm:$0xf] }
  0xe5   : > { %v1588_v62 = vrot.slane %v1586_v44, 5  ;;  %v1608_v14 = vrot.slane %v1607_v53, 4  ;;  %v1652_v10 = vshrl.u32 %v1315_v46, 16  ;;  %v2282_v40 = vrot.slane %v2280_v18, 4  ;;  %v313_v39 = vld [vmem:[#allocation3 + $0xb0] sm:$0x1] }
  0xe6   : > { %v2270_v23 = vsel %vm10179_vm13, %v10456_v42, %v2269_v19  ;;  %v860_v52 = vsel %vm9965_vm2, %v12043_v60, %v859_v58  ;;  %v1645_v47 = vor.u32 %v1644_v22, %v1641_v20  ;;  %v10511_v61 = vrot.slane %v1648_v13, 5  ;;  %v1317_v12 = vld [vmem:[#allocation3 + $0xa8] sm:$0xf]  ;;  %v1318_v24 = vld [vmem:[#allocation3 + $0xac] sm:$0xf] }
  0xe7   : > { %v8470_v57 = vcombine.low %v10468_v21, %v2270_v23  ;;  %861 = vst [vmem:[#allocation3 + $0x98] sm:$0x1] %v860_v52  ;;  %v1589_v42 = vsel %vm10186_vm14, %v1584_v31, %v1588_v62  ;;  %v10513_v50 = vrot.slane %v1621_v49, 4  ;;  %v1603_v15 = vsel %vm10186_vm14, %v1598_v38, %v10471_v34  ;;  %v2137_v30 = vld [vmem:[#allocation3 + $0xa8] sm:$0xe] }
  0xe8   : > { %v1310_v16 = vld [vmem:[#allocation3 + $0x8c] sm:$0x1]  ;;  %v8430_v37 = vcombine.low %v1579_v17, %v1589_v42  ;;  %v2281_v56 = vsel %vm10179_vm13, %v8456_v6, %v2280_v18  ;;  %v866_v31 = vld [vmem:[#allocation3 + $0xa4] sm:$0x1]  ;;  %v1654_v3 = vrot.slane %v1652_v10, 4  ;;  %v2287_v35 = vrot.slane %v10503_v28, 5 }
  0xe9   : > { %v2130_v29 = vld [vmem:[#allocation3 + $0x8c] sm:$0x1]  ;;  %9176 = vmatprep.mubr.bf16.mxu0 %v8470_v57  ;;  %v1610_v54 = vshll.u32 %v1310_v16, 16  ;;  %v1632_v26 = vrot.slane %v1631_v2, 4  ;;  %v867_v34 = vsel %vm9965_vm2, %v675_v51, %v866_v31  ;;  %v10528_v7 = vrot.slane %v1645_v47, 4 }
  0xea   : > { %v2276_v21 = vrot.slane %v2130_v29, 5  ;;  %9128 = vmatprep.mubr.bf16.mxu1 %v8430_v37  ;;  %868 = vst [vmem:[#allocation3 + $0xa4] sm:$0x1] %v867_v34  ;;  %v1655_v45 = vor.u32 %v1654_v3, %v10511_v61  ;;  %v8457_v53 = vrot.slane %v10507_v11, 9  ;;  %v2138_v27 = vld [vmem:[#allocation3 + $0xac] sm:$0xf]  ;;  %v1627_v18 = vsel %vm10186_vm14, %v10513_v50, %v10489_v32 }
  0xeb   : > { %v1612_v1 = vrot.slane %v1610_v54, 5  ;;  %v314_v63 = vsel %vm9970_vm4, 0, %v313_v39  ;;  %v1663_v44 = vshrl.u32 %v1317_v12, 16  ;;  %v1666_v51 = vshll.u32 %v1317_v12, 16  ;;  %v316_v19 = vld [vmem:[#allocation3 + $0xbc] sm:$0x1] }
  0xec   : > { %v2277_v17 = vsel %vm10179_vm13, %v10481_v8, %v2276_v21  ;;  %v2289_v49 = vrot.slane %v2287_v35, 4  ;;  %315 = vst [vmem:[#allocation3 + $0xb0] sm:$0x1] %v314_v63  ;;  %v1672_v6 = vshll.u32 %v1318_v24, 16  ;;  %v1656_v60 = vrot.slane %v1655_v45, 4 }
  0xed   : > { %v8471_v46 = vcombine.low %v2274_v55, %v2277_v17  ;;  %v1613_v8 = vsel %vm10186_vm14, %v1608_v14, %v1612_v1  ;;  %v1665_v62 = vrot.slane %v1663_v44, 4  ;;  %v1668_v23 = vrot.slane %v1666_v51, 5  ;;  %v1320_v57 = vld [vmem:[#allocation3 + $0xb4] sm:$0xf]  ;;  %v1321_v11 = vld [vmem:[#allocation3 + $0xb8] sm:$0xf] }
  0xee   : > { %v8431_v38 = vcombine.low %v1603_v15, %v1613_v8  ;;  %v1313_v55 = vld [vmem:[#allocation3 + $0x98] sm:$0x1]  ;;  %v1676_v52 = vshrl.u32 %v1318_v24, 16  ;;  %v8458_v13 = vrot.slane %v2137_v30, 9  ;;  %v2294_v28 = vrot.slane %v2138_v27, 5 }
  0xef   : > { %9177 = vmatmul.mubr.bf16.gmra.mxu0 %v8471_v46  ;;  %v2133_v58 = vld [vmem:[#allocation3 + $0x98] sm:$0x1]  ;;  %v1634_v20 = vshll.u32 %v1313_v55, 16  ;;  %v1669_v10 = vor.u32 %v1668_v23, %v1665_v62  ;;  %v317_v32 = vsel %vm9970_vm4, 0, %v316_v19  ;;  %v1651_v16 = vsel %vm10186_vm14, %v10528_v7, %v10511_v61  ;;  %v3140_v63 = vld [vmem:[#allocation3 + $0xc] sm:$0xf] }
  0xf0   : > { %v2283_v22 = vrot.slane %v2133_v58, 5  ;;  %9129 = vmatmul.mubr.bf16.gmra.mxu1 %v8431_v38  ;;  %v10548_v29 = vrot.slane %v1672_v6, 5  ;;  %v1678_v47 = vrot.slane %v1676_v52, 4  ;;  %318 = vst [vmem:[#allocation3 + $0xbc] sm:$0x1] %v317_v32  ;;  %v2288_v21 = vsel %vm10179_vm13, %v8457_v53, %v2287_v35 }
  0xf1   : > { %v1636_v14 = vrot.slane %v1634_v20, 5  ;;  %v1316_v54 = vld [vmem:[#allocation3 + $0xa4] sm:$0x1]  ;;  %v10554_v50 = vrot.slane %v1669_v10, 4  ;;  %v1687_v15 = vshrl.u32 %v1320_v57, 16  ;;  %v10558_v1 = vsel %vm10179_vm13, %v8458_v13, %v2294_v28 }
  0xf2   : > { %v2284_v2 = vsel %vm10179_vm13, %v2282_v40, %v2283_v22  ;;  %v2136_v40 = vld [vmem:[#allocation3 + $0xa4] sm:$0x1]  ;;  %v2141_v31 = vld [vmem:[#allocation3 + $0xb8] sm:$0xf]  ;;  %v1658_v61 = vshll.u32 %v1316_v54, 16  ;;  %v1690_v12 = vshll.u32 %v1320_v57, 16  ;;  %v1679_v45 = vor.u32 %v1678_v47, %v10548_v29 }
  0xf3   : > { %v8472_v42 = vcombine.low %v2281_v56, %v2284_v2  ;;  %v1637_v37 = vsel %vm10186_vm14, %v1632_v26, %v1636_v14  ;;  %v2140_v56 = vld [vmem:[#allocation3 + $0xb4] sm:$0xe]  ;;  %v2290_v39 = vrot.slane %v2136_v40, 5  ;;  %v873_v17 = vld [vmem:[#allocation3 + $0xb0] sm:$0x1]  ;;  %v10560_v26 = vrot.slane %v2294_v28, 4 }
  0xf4   : > { %v8432_v3 = vcombine.low %v1627_v18, %v1637_v37  ;;  %v1689_v34 = vrot.slane %v1687_v15, 4  ;;  %v1696_v24 = vshll.u32 %v1321_v11, 16  ;;  %v1660_v35 = vrot.slane %v1658_v61, 5  ;;  %v3142_v38 = vld [vmem:[#allocation3 + $0x14] sm:$0x1] }
  0xf5   : > { %9180 = vmatprep.mubr.bf16.mxu0 %v8472_v42  ;;  %v2291_v46 = vsel %vm10179_vm13, %v2289_v49, %v2290_v39  ;;  %v874_v7 = vsel %vm9965_vm2, %v692_v25, %v873_v17  ;;  %v1692_v30 = vrot.slane %v1690_v12, 5  ;;  %v1700_v8 = vshrl.u32 %v1321_v11, 16  ;;  %v3141_v25 = vld [vmem:[#allocation3 + $0x10] sm:$0xf]  ;;  %v3144_v14 = vld [vmem:[#allocation3 + $0x1c] sm:$0xf] }
  0xf6   : > { %9132 = vmatprep.mubr.bf16.mxu1 %v8432_v3  ;;  %v8473_v53 = vcombine.low %v2288_v21, %v2291_v46  ;;  %875 = vst [vmem:[#allocation3 + $0xb0] sm:$0x1] %v874_v7  ;;  %v10569_v27 = vrot.slane %v1696_v24, 5  ;;  %v1661_v44 = vsel %vm10186_vm14, %v1656_v60, %v1660_v35  ;;  %v1675_v0 = vsel %vm10186_vm14, %v10554_v50, %v10548_v29  ;;  %v3143_v60 = vld [vmem:[#allocation3 + $0x18] sm:$0xf] }
  0xf7   : > { %v8459_v51 = vrot.slane %v2140_v56, 9  ;;  %v2301_v19 = vrot.slane %v2141_v31, 5  ;;  %v8433_v55 = vcombine.low %v1651_v16, %v1661_v44  ;;  %v880_v18 = vld [vmem:[#allocation3 + $0xbc] sm:$0x1]  ;;  %v1693_v58 = vor.u32 %v1692_v30, %v1689_v34  ;;  %v3145_v32 = vld [vmem:[#allocation3 + $0x20] sm:$0x1] }
  0xf8   : > { %9181 = vmatmul.mubr.bf16.gmra.mxu0 %v8473_v53  ;;  %v1702_v49 = vrot.slane %v1700_v8, 4  ;;  %v3189_v6 = vshrl.u32 %v3140_v63, 16  ;;  %v1680_v20 = vrot.slane %v1679_v45, 4  ;;  %v881_v22 = vsel %vm9965_vm2, %v709_v9, %v880_v18  ;;  %v3147_v18 = vld [vmem:[#allocation3 + $0x28] sm:$0xf] }
  0xf9   : > { %v10583_v62 = vsel %vm10179_vm13, %v8459_v51, %v2301_v19  ;;  %v3192_v23 = vshll.u32 %v3140_v63, 16  ;;  %9133 = vmatmul.mubr.bf16.gmra.mxu1 %v8433_v55  ;;  %882 = vst [vmem:[#allocation3 + $0xbc] sm:$0x1] %v881_v22  ;;  %v10585_v52 = vrot.slane %v1693_v58, 4  ;;  %v3198_v57 = vshll.u32 %v3141_v25, 16 }
  0xfa   : > { %v1703_v13 = vor.u32 %v1702_v49, %v10569_v27  ;;  %v3191_v28 = vrot.slane %v3189_v6, 4  ;;  %v3202_v48 = vshrl.u32 %v3141_v25, 16  ;;  %v3208_v10 = vshll.u32 %v3142_v38, 16  ;;  %v3146_v55 = vld [vmem:[#allocation3 + $0x24] sm:$0xf] }
  0xfb   : > { %v3194_v2 = vrot.slane %v3192_v23, 5  ;;  %v3213_v9 = vshrl.u32 %v3143_v60, 16  ;;  %v2303_v42 = vrot.slane %v2301_v19, 4  ;;  %v3200_v16 = vrot.slane %v3198_v57, 5  ;;  %v3148_v22 = vld [vmem:[#allocation3 + $0x2c] sm:$0x1] }
  0xfc   : > { %v1704_v11 = vrot.slane %v1703_v13, 4  ;;  %v3216_v29 = vshll.u32 %v3143_v60, 16  ;;  %v1699_v54 = vsel %vm10186_vm14, %v10585_v52, %v10569_v27  ;;  %v3204_v21 = vrot.slane %v3202_v48, 4  ;;  %v3149_v13 = vld [vmem:[#allocation3 + $0x30] sm:$0xf] }
  0xfd   : > { %v1319_v47 = vld [vmem:[#allocation3 + $0xb0] sm:$0x1]  ;;  %v3195_v40 = vor.u32 %v3194_v2, %v3191_v28  ;;  %v3210_v50 = vrot.slane %v3208_v10, 5  ;;  %v3215_v31 = vrot.slane %v3213_v9, 4  ;;  %v3222_v17 = vshll.u32 %v3144_v14, 16 }
  0xfe   : > { %v2139_v37 = vld [vmem:[#allocation3 + $0xb0] sm:$0x1]  ;;  %v1682_v15 = vshll.u32 %v1319_v47, 16  ;;  %v3218_v3 = vrot.slane %v3216_v29, 5  ;;  %v3205_v39 = vor.u32 %v3204_v21, %v3200_v16  ;;  %v3226_v34 = vshrl.u32 %v3144_v14, 16 }
  0xff   : > { %v2297_v56 = vrot.slane %v2139_v37, 5  ;;  %v3196_v61 = vrot.slane %v3195_v40, 4  ;;  %v3232_v46 = vshll.u32 %v3145_v32, 16  ;;  %v3224_v8 = vrot.slane %v3222_v17, 5  ;;  %v9613_v57 = vld [vmem:[#allocation3 + $0xc] sm:$0xff]  }
 0x100   : > { %v1684_v12 = vrot.slane %v1682_v15, 5  ;;  %v3219_v35 = vor.u32 %v3218_v3, %v3215_v31  ;;  %v1322_v45 = vld [vmem:[#allocation3 + $0xbc] sm:$0x1]  ;;  %v3206_v27 = vrot.slane %v3205_v39, 4  ;;  %v3228_v38 = vrot.slane %v3226_v34, 4 }
 0x101   : > { %v2298_v24 = vsel %vm10179_vm13, %v10560_v26, %v2297_v56  ;;  %v2142_v53 = vld [vmem:[#allocation3 + $0xbc] sm:$0x1]  ;;  %v3201_v30 = vsel %vm10186_vm14, %v3196_v61, %v3200_v16  ;;  %v1706_v44 = vshll.u32 %v1322_v45, 16  ;;  %v3237_v60 = vshrl.u32 %v3146_v55, 16  ;;  %v3150_v10 = vld [vmem:[#allocation3 + $0x34] sm:$0xf] }
 0x102   : > { %v8474_v7 = vcombine.low %v10558_v1, %v2298_v24  ;;  %v1685_v63 = vsel %vm10186_vm14, %v1680_v20, %v1684_v12  ;;  %v2304_v51 = vrot.slane %v2142_v53, 5  ;;  %v3220_v19 = vrot.slane %v3219_v35, 4  ;;  %v3151_v29 = vld [vmem:[#allocation3 + $0x38] sm:$0x1]  ;;  %v9617_v35 = vld [vmem:[#allocation3 + $0x24] sm:$0xff]  }
 0x103   : > { %v8434_v25 = vcombine.low %v1675_v0, %v1685_v63  ;;  %v3211_v26 = vsel %vm10186_vm14, %v3206_v27, %v3210_v50  ;;  %v3234_v1 = vrot.slane %v3232_v46, 5  ;;  %v1708_v58 = vrot.slane %v1706_v44, 5  ;;  %v9614_v39 = vld [vmem:[#allocation3 + $0x18] sm:$0xff]   ;;  %v3153_v53 = vld [vmem:[#allocation3 + $0x40] sm:$0xf]  ;;  %v9619_v44 = vld [vmem:[#allocation7 + $0x170] sm:$0xff]  }
 0x104   : > { %9184 = vmatprep.mubr.bf16.mxu0 %v8474_v7  ;;  %v2305_v49 = vsel %vm10179_vm13, %v2303_v42, %v2304_v51  ;;  %v8508_v6 = vcombine.low %v3201_v30, %v3211_v26  ;;  %v3225_v20 = vsel %vm10186_vm14, %v3220_v19, %v3224_v8  ;;  %v3229_v23 = vor.u32 %v3228_v38, %v3224_v8  ;;  %v3152_v45 = vld [vmem:[#allocation3 + $0x3c] sm:$0xf]  ;;  %v3154_v51 = vld [vmem:[#allocation3 + $0x44] sm:$0x1]  ;;  %v3960_v36 = vld [vmem:[#allocation3 + $0x18] sm:$0xe] }
 0x105   : > { %9136 = vmatprep.mubr.bf16.mxu1 %v8434_v25  ;;  %v8475_v0 = vcombine.low %v10583_v62, %v2305_v49  ;;  %v3240_v52 = vshll.u32 %v3146_v55, 16  ;;  %v1709_v28 = vsel %vm10186_vm14, %v1704_v11, %v1708_v58  ;;  %v3246_v14 = vshll.u32 %v3147_v18, 16  ;;  %v355_v62 = vld [vmem:[%s9954_s29 + $0xf0] sm:$0xff] }
 0x106   : > { %v3250_v2 = vshrl.u32 %v3147_v18, 16  ;;  %v3256_v48 = vshll.u32 %v3148_v22, 16  ;;  %v8435_v32 = vcombine.low %v1699_v54, %v1709_v28  ;;  %v3230_v9 = vrot.slane %v3229_v23, 4  ;;  %v3155_v55 = vld [vmem:[#allocation3 + $0x48] sm:$0xf] }
 0x107   : > { %9185 = vmatmul.mubr.bf16.gmra.mxu0 %v8475_v0  ;;  %v3239_v42 = vrot.slane %v3237_v60, 4  ;;  %v3242_v16 = vrot.slane %v3240_v52, 5  ;;  %v3248_v47 = vrot.slane %v3246_v14, 5  ;;  %v3261_v21 = vshrl.u32 %v3149_v13, 16  ;;  %v9620_v49 = vld [vmem:[#allocation7 + $0x1b0] sm:$0xff]   ;;  %v9677_v0 = vld [vmem:[#allocation7 + $0x1b8] sm:$0xff]  }
 0x108   : > { %9252 = vmatprep.mubr.bf16.mxu0 %v8508_v6  ;;  %v3252_v37 = vrot.slane %v3250_v2, 4  ;;  %v3258_v40 = vrot.slane %v3256_v48, 5  ;;  %9137 = vmatmul.mubr.bf16.gmra.mxu1 %v8435_v32  ;;  %v3235_v11 = vsel %vm10186_vm14, %v3230_v9, %v3234_v1  ;;  %v3264_v15 = vshll.u32 %v3149_v13, 16  ;;  %v3156_v22 = vld [vmem:[#allocation3 + $0x4c] sm:$0xf]  ;;  %v9624_v32 = vld [vmem:[#allocation7 + $0x1a8] sm:$0xff]  }
 0x109   : > { %v3243_v50 = vor.u32 %v3242_v16, %v3239_v42  ;;  %v3270_v56 = vshll.u32 %v3150_v10, 16  ;;  %9204 = vmatprep.mubr.bf16.mxu1 %v9613_v57  ;;  %v8509_v54 = vcombine.low %v3225_v20, %v3235_v11  ;;  %v3263_v3 = vrot.slane %v3261_v21, 4  ;;  %v3157_v28 = vld [vmem:[#allocation3 + $0x50] sm:$0x1]  ;;  %v9628_v11 = vld [vmem:[#allocation7 + $0x1a0] sm:$0xff]  }
 0x10a   : > { %v3253_v31 = vor.u32 %v3252_v37, %v3248_v47  ;;  %v3274_v61 = vshrl.u32 %v3150_v10, 16  ;;  %v3266_v34 = vrot.slane %v3264_v15, 5  ;;  %v3280_v24 = vshll.u32 %v3151_v29, 16  ;;  %v9623_v10 = vld [vmem:[#allocation7 + $0x168] sm:$0xff]  }
 0x10b   : > { %v3244_v17 = vrot.slane %v3243_v50, 4  ;;  %v3272_v12 = vrot.slane %v3270_v56, 5  ;;  %v10612_v30 = vpack.c.bf16 %v355_v62, %v355_v62  ;;  %v3285_v19 = vshrl.u32 %v3152_v45, 16  ;;  %v9618_v62 = vld [vmem:[#allocation3 + $0x30] sm:$0xff]  }
 0x10c   : > { %v3254_v46 = vrot.slane %v3253_v31, 4  ;;  %v3276_v7 = vrot.slane %v3274_v61, 4  ;;  %v3267_v8 = vor.u32 %v3266_v34, %v3263_v3  ;;  %v3282_v63 = vrot.slane %v3280_v24, 5  ;;  %v3158_v3 = vld [vmem:[#allocation3 + $0x54] sm:$0xf] }
 0x10d   : > { %v3249_v27 = vsel %vm10186_vm14, %v3244_v17, %v3248_v47  ;;  %v3288_v38 = vshll.u32 %v3152_v45, 16  ;;  %v3294_v1 = vshll.u32 %v3153_v53, 16  ;;  %v3287_v6 = vrot.slane %v3285_v19, 4  ;;  %v3159_v61 = vld [vmem:[#allocation3 + $0x58] sm:$0xf]  ;;  %v9621_v17 = vld [vmem:[#allocation3 + $0x3c] sm:$0xff]  }
 0x10e   : > { %v3259_v25 = vsel %vm10186_vm14, %v3254_v46, %v3258_v40  ;;  %v3277_v26 = vor.u32 %v3276_v7, %v3272_v12  ;;  %v3268_v58 = vrot.slane %v3267_v8, 4  ;;  %v3298_v20 = vshrl.u32 %v3153_v53, 16  ;;  %v9627_v8 = vld [vmem:[#allocation7 + $0x160] sm:$0xff]  }
 0x10f   : > { %9253 = vmatmul.mubr.bf16.vlgmr.msra.gmra.mxu0 %v8509_v54  ;;  %v8510_v18 = vcombine.low %v3249_v27, %v3259_v25  ;;  %v3290_v60 = vrot.slane %v3288_v38, 5  ;;  %v3296_v52 = vrot.slane %v3294_v1, 5  ;;  %v3304_v13 = vshll.u32 %v3154_v51, 16  ;;  %v3161_v25 = vld [vmem:[#allocation3 + $0x60] sm:$0xf] }
 0x110   : > { %9333 = vmatpush3.bf16.msra.mxu0 %v9677_v0  ;;  %v3278_v23 = vrot.slane %v3277_v26, 4  ;;  %9205 = vmatmul.mubr.bf16.vlgmr.msra.gmra.mxu1 %v9614_v39  ;;  %v3273_v57 = vsel %vm10186_vm14, %v3268_v58, %v3272_v12  ;;  %v3300_v14 = vrot.slane %v3298_v20, 4  ;;  %v3309_v2 = vshrl.u32 %v3155_v55, 16  ;;  %v9632_v58 = vld [vmem:[#allocation7 + $0x198] sm:$0xff]   ;;  %v3163_v20 = vld [vmem:[#allocation3 + $0x68] sm:$0x1] }
 0x111   : > { %9256 = vmatprep.mubr.bf16.mxu0 %v8510_v18  ;;  %v3312_v48 = vshll.u32 %v3155_v55, 16  ;;  %9285 = vmatpush3.bf16.msra.mxu1 %v10377_v59  ;;  %v3291_v42 = vor.u32 %v3290_v60, %v3287_v6  ;;  %v3306_v16 = vrot.slane %v3304_v13, 5  ;;  %v3318_v29 = vshll.u32 %v3156_v22, 16  ;;  %v3162_v18 = vld [vmem:[#allocation3 + $0x64] sm:$0xf] }
 0x112   : > { %9208 = vmatprep.mubr.bf16.mxu1 %v9617_v35  ;;  %v3283_v9 = vsel %vm10186_vm14, %v3278_v23, %v3282_v63  ;;  %9286 = vmatprep.subr.bf16.mxu1 %v9619_v44  ;;  %v3301_v37 = vor.u32 %v3300_v14, %v3296_v52  ;;  %v3311_v40 = vrot.slane %v3309_v2, 4  ;;  %v3322_v56 = vshrl.u32 %v3156_v22, 16  ;;  %v3160_v35 = vld [vmem:[#allocation3 + $0x5c] sm:$0x1]  ;;  %v9622_v23 = vld [vmem:[#allocation3 + $0x48] sm:$0xff]   ;;  %v9625_v2 = vld [vmem:[#allocation3 + $0x54] sm:$0xff]  }
 0x113   : > { %v8511_v47 = vcombine.low %v3273_v57, %v3283_v9  ;;  %9334 = vmatprep.subr.bf16.mxu0 %v9620_v49  ;;  %v3314_v21 = vrot.slane %v3312_v48, 5  ;;  %v3292_v50 = vrot.slane %v3291_v42, 4  ;;  %v3320_v15 = vrot.slane %v3318_v29, 5  ;;  %v9631_v57 = vld [vmem:[#allocation7 + $0x158] sm:$0xff]  }
 0x114   : > { %9335 = vmatpush3.bf16.msra.mxu0 %v9620_v49  ;;  %v3328_v59 = vshll.u32 %v3157_v28, 16  ;;  %v3302_v54 = vrot.slane %v3301_v37, 4  ;;  %v711_v39 = vshrl.u32 %v10612_v30, 16  ;;  %v3324_v12 = vrot.slane %v3322_v56, 4  ;;  %v3165_v56 = vld [vmem:[#allocation3 + $0x70] sm:$0xf] }
 0x115   : > { %v3315_v31 = vor.u32 %v3314_v21, %v3311_v40  ;;  %9336 = vmatprep.subr.bf16.mxu0 %v9624_v32  ;;  %9287 = vmatpush3.bf16.msra.mxu1 %v9619_v44  ;;  %v3297_v34 = vsel %vm10186_vm14, %v3292_v50, %v3296_v52  ;;  %v3333_v46 = vshrl.u32 %v3158_v3, 16  ;;  %v3336_v53 = vshll.u32 %v3158_v3, 16 }
 0x116   : > { %v3330_v24 = vrot.slane %v3328_v59, 5  ;;  %v3307_v7 = vsel %vm10186_vm14, %v3302_v54, %v3306_v16  ;;  %9288 = vmatprep.subr.bf16.mxu1 %v9623_v10  ;;  %v3342_v27 = vshll.u32 %v3159_v61, 16  ;;  %v3325_v51 = vor.u32 %v3324_v12, %v3320_v15  ;;  %v3166_v59 = vld [vmem:[#allocation3 + $0x74] sm:$0x1] }
 0x117   : > { %9257 = vmatmul.mubr.bf16.gmra.mxu0 %v8511_v47  ;;  %v3316_v45 = vrot.slane %v3315_v31, 4  ;;  %v8512_v63 = vcombine.low %v3297_v34, %v3307_v7  ;;  %v3335_v44 = vrot.slane %v3333_v46, 4  ;;  %v3346_v19 = vshrl.u32 %v3159_v61, 16  ;;  %v9635_v61 = vld [vmem:[#allocation7 + $0x150] sm:$0xff]  }
 0x118   : > { %9337 = vmatpush3.bf16.msra.mxu0 %v9624_v32  ;;  %9209 = vmatmul.mubr.bf16.gmra.mxu1 %v9618_v62  ;;  %v3338_v38 = vrot.slane %v3336_v53, 5  ;;  %v3344_v1 = vrot.slane %v3342_v27, 5  ;;  %v3352_v55 = vshll.u32 %v3160_v35, 16  ;;  %v3326_v49 = vrot.slane %v3325_v51, 4  ;;  %v9640_v35 = vld [vmem:[#allocation7 + $0x188] sm:$0xff]  }
 0x119   : > { %v3321_v26 = vsel %vm10186_vm14, %v3316_v45, %v3320_v15  ;;  %9338 = vmatprep.subr.bf16.mxu0 %v9628_v11  ;;  %9212 = vmatprep.mubr.bf16.mxu1 %v9621_v17  ;;  %v3348_v6 = vrot.slane %v3346_v19, 4  ;;  %v3357_v22 = vshrl.u32 %v3161_v25, 16  ;;  %v3360_v0 = vshll.u32 %v3161_v25, 16  ;;  %v3164_v15 = vld [vmem:[#allocation3 + $0x6c] sm:$0xf] }
 0x11a   : > { %9260 = vmatprep.mubr.bf16.mxu0 %v8512_v63  ;;  %9289 = vmatpush3.bf16.msra.mxu1 %v9623_v10  ;;  %v3339_v60 = vor.u32 %v3338_v38, %v3335_v44  ;;  %v3354_v52 = vrot.slane %v3352_v55, 5  ;;  %v3366_v13 = vshll.u32 %v3162_v18, 16  ;;  %v3370_v28 = vshrl.u32 %v3162_v18, 16  ;;  %v9636_v10 = vld [vmem:[#allocation7 + $0x190] sm:$0xff]   ;;  %v3167_v27 = vld [vmem:[#allocation3 + $0x78] sm:$0xf] }
 0x11b   : > { %v3331_v14 = vsel %vm10186_vm14, %v3326_v49, %v3330_v24  ;;  %v3349_v48 = vor.u32 %v3348_v6, %v3344_v1  ;;  %v3359_v32 = vrot.slane %v3357_v22, 4  ;;  %v3362_v9 = vrot.slane %v3360_v0, 5  ;;  %9290 = vmatprep.subr.bf16.mxu1 %v9627_v8  ;;  %v3168_v19 = vld [vmem:[#allocation3 + $0x7c] sm:$0xf]  ;;  %v3169_v25 = vld [vmem:[#allocation3 + $0x80] sm:$0x1] }
 0x11c   : > { %9339 = vmatpush3.bf16.msra.mxu0 %v9628_v11  ;;  %v8513_v42 = vcombine.low %v3321_v26, %v3331_v14  ;;  %v3340_v16 = vrot.slane %v3339_v60, 4  ;;  %v3368_v29 = vrot.slane %v3366_v13, 5  ;;  %v3372_v62 = vrot.slane %v3370_v28, 4  ;;  %v9629_v38 = vld [vmem:[#allocation3 + $0x6c] sm:$0xff]   ;;  %v9644_v0 = vld [vmem:[#allocation7 + $0x180] sm:$0xff]  }
 0x11d   : > { %9340 = vmatprep.subr.bf16.mxu0 %v9632_v58  ;;  %v3350_v47 = vrot.slane %v3349_v48, 4  ;;  %v3363_v37 = vor.u32 %v3362_v9, %v3359_v32  ;;  %v3376_v40 = vshll.u32 %v3163_v20, 16  ;;  %v3381_v3 = vshrl.u32 %v3164_v15, 16  ;;  %v9643_v13 = vld [vmem:[#allocation7 + $0x140] sm:$0xff]   ;;  %v3170_v9 = vld [vmem:[#allocation3 + $0x84] sm:$0xf] }
 0x11e   : > { %v3345_v21 = vsel %vm10186_vm14, %v3340_v16, %v3344_v1  ;;  %v3373_v50 = vor.u32 %v3372_v62, %v3368_v29  ;;  %9291 = vmatpush3.bf16.msra.mxu1 %v9627_v8  ;;  %v3384_v12 = vshll.u32 %v3164_v15, 16  ;;  %v3390_v24 = vshll.u32 %v3165_v56, 16  ;;  %v9626_v8 = vld [vmem:[#allocation3 + $0x60] sm:$0xff]  }
 0x11f   : > { %9261 = vmatmul.mubr.bf16.gmra.mxu0 %v8513_v42  ;;  %v3355_v11 = vsel %vm10186_vm14, %v3350_v47, %v3354_v52  ;;  %v3364_v54 = vrot.slane %v3363_v37, 4  ;;  %v3378_v31 = vrot.slane %v3376_v40, 5  ;;  %9292 = vmatprep.subr.bf16.mxu1 %v9631_v57  ;;  %v3383_v7 = vrot.slane %v3381_v3, 4  ;;  %v3172_v47 = vld [vmem:[#allocation3 + $0x8c] sm:$0x1]  ;;  %v10644_v40 = vld [vmem:[#allocation7 + $0x238] sm:$0xff]  }
 0x120   : > { %9341 = vmatpush3.bf16.msra.mxu0 %v9632_v58  ;;  %9213 = vmatmul.mubr.bf16.gmra.mxu1 %v9622_v23  ;;  %v8514_v17 = vcombine.low %v3345_v21, %v3355_v11  ;;  %v3374_v34 = vrot.slane %v3373_v50, 4  ;;  %v3394_v45 = vshrl.u32 %v3165_v56, 16  ;;  %v3400_v53 = vshll.u32 %v3166_v59, 16  ;;  %v9639_v58 = vld [vmem:[#allocation7 + $0x148] sm:$0xff]   ;;  %v9630_v11 = vld [vmem:[#allocation3 + $0x78] sm:$0xff]  }
 0x121   : > { %9342 = vmatprep.subr.bf16.mxu0 %v9636_v10  ;;  %9216 = vmatprep.mubr.bf16.mxu1 %v9625_v2  ;;  %v3369_v46 = vsel %vm10186_vm14, %v3364_v54, %v3368_v29  ;;  %v3386_v51 = vrot.slane %v3384_v12, 5  ;;  %v3392_v44 = vrot.slane %v3390_v24, 5  ;;  %v3405_v18 = vshrl.u32 %v3167_v27, 16 }
 0x122   : > { %9264 = vmatprep.mubr.bf16.mxu0 %v8514_v17  ;;  %v3379_v63 = vsel %vm10186_vm14, %v3374_v34, %v3378_v31  ;;  %9293 = vmatpush3.bf16.msra.mxu1 %v9631_v57  ;;  %v3396_v1 = vrot.slane %v3394_v45, 4  ;;  %v3402_v55 = vrot.slane %v3400_v53, 5  ;;  %v3408_v6 = vshll.u32 %v3167_v27, 16  ;;  %v3174_v53 = vld [vmem:[#allocation3 + $0x94] sm:$0xf] }
 0x123   : > { %v8515_v26 = vcombine.low %v3369_v46, %v3379_v63  ;;  %9294 = vmatprep.subr.bf16.mxu1 %v9635_v61  ;;  %v3387_v49 = vor.u32 %v3386_v51, %v3383_v7  ;;  %v3414_v20 = vshll.u32 %v3168_v19, 16  ;;  %v3418_v22 = vshrl.u32 %v3168_v19, 16  ;;  %v3173_v46 = vld [vmem:[#allocation3 + $0x90] sm:$0xf]  ;;  %v3175_v27 = vld [vmem:[#allocation3 + $0x98] sm:$0x1] }
 0x124   : > { %9343 = vmatpush3.bf16.msra.mxu0 %v9636_v10  ;;  %v3397_v23 = vor.u32 %v3396_v1, %v3392_v44  ;;  %v3407_v60 = vrot.slane %v3405_v18, 4  ;;  %v3424_v52 = vshll.u32 %v3169_v25, 16  ;;  %v3410_v57 = vrot.slane %v3408_v6, 5  ;;  %v3171_v10 = vld [vmem:[#allocation3 + $0x88] sm:$0xf] }
 0x125   : > { %9344 = vmatprep.subr.bf16.mxu0 %v9640_v35  ;;  %v3388_v28 = vrot.slane %v3387_v49, 4  ;;  %v3416_v14 = vrot.slane %v3414_v20, 5  ;;  %v3420_v2 = vrot.slane %v3418_v22, 4  ;;  %v3429_v37 = vshrl.u32 %v3170_v9, 16  ;;  %v9633_v19 = vld [vmem:[#allocation3 + $0x84] sm:$0xff]  }
 0x126   : > { %9295 = vmatpush3.bf16.msra.mxu1 %v9635_v61  ;;  %v3398_v48 = vrot.slane %v3397_v23, 4  ;;  %v3426_v32 = vrot.slane %v3424_v52, 5  ;;  %v3411_v29 = vor.u32 %v3410_v57, %v3407_v60  ;;  %v3432_v50 = vshll.u32 %v3170_v9, 16  ;;  %v10648_v61 = vld [vmem:[#allocation7 + $0x1f8] sm:$0xff]  }
 0x127   : > { %9265 = vmatmul.mubr.bf16.gmra.mxu0 %v8515_v26  ;;  %9296 = vmatprep.subr.bf16.mxu1 %v9639_v58  ;;  %v3393_v16 = vsel %vm10186_vm14, %v3388_v28, %v3392_v44  ;;  %v3421_v62 = vor.u32 %v3420_v2, %v3416_v14  ;;  %v3438_v15 = vshll.u32 %v3171_v10, 16  ;;  %v3442_v56 = vshrl.u32 %v3171_v10, 16  ;;  %v3176_v2 = vld [vmem:[#allocation3 + $0x9c] sm:$0xf]  ;;  %v3178_v10 = vld [vmem:[#allocation3 + $0xa4] sm:$0x1] }
 0x128   : > { %9345 = vmatpush3.bf16.msra.mxu0 %v9640_v35  ;;  %9217 = vmatmul.mubr.bf16.gmra.mxu1 %v9626_v8  ;;  %v3403_v21 = vsel %vm10186_vm14, %v3398_v48, %v3402_v55  ;;  %v3412_v54 = vrot.slane %v3411_v29, 4  ;;  %v3431_v3 = vrot.slane %v3429_v37, 4  ;;  %v3434_v34 = vrot.slane %v3432_v50, 5  ;;  %v3177_v48 = vld [vmem:[#allocation3 + $0xa0] sm:$0xf] }
 0x129   : > { %9346 = vmatprep.subr.bf16.mxu0 %v9644_v0  ;;  %9220 = vmatprep.mubr.bf16.mxu1 %v9629_v38  ;;  %v8516_v59 = vcombine.low %v3393_v16, %v3403_v21  ;;  %v3422_v31 = vrot.slane %v3421_v62, 4  ;;  %v3440_v12 = vrot.slane %v3438_v15, 5  ;;  %v3444_v24 = vrot.slane %v3442_v56, 4  ;;  %v9634_v16 = vld [vmem:[#allocation3 + $0x90] sm:$0xff]   ;;  %v9637_v21 = vld [vmem:[#allocation3 + $0x9c] sm:$0xff]  }
 0x12a   : > { %9297 = vmatpush3.bf16.msra.mxu1 %v9639_v58  ;;  %v3448_v35 = vshll.u32 %v3172_v47, 16  ;;  %v3417_v7 = vsel %vm10186_vm14, %v3412_v54, %v3416_v14  ;;  %v3453_v8 = vshrl.u32 %v3173_v46, 16  ;;  %v3456_v63 = vshll.u32 %v3173_v46, 16 }
 0x12b   : > { %9298 = vmatprep.subr.bf16.mxu1 %v9643_v13  ;;  %9268 = vmatprep.mubr.bf16.mxu0 %v8516_v59  ;;  %v3427_v45 = vsel %vm10186_vm14, %v3422_v31, %v3426_v32  ;;  %v3435_v25 = vor.u32 %v3434_v34, %v3431_v3  ;;  %v3445_v26 = vor.u32 %v3444_v24, %v3440_v12  ;;  %v3462_v18 = vshll.u32 %v3174_v53, 16  ;;  %v3179_v31 = vld [vmem:[#allocation3 + $0xa8] sm:$0xf]  ;;  %v3180_v3 = vld [vmem:[#allocation3 + $0xac] sm:$0xf] }
 0x12c   : > { %9347 = vmatpush3.bf16.msra.mxu0 %v9644_v0  ;;  %v8517_v44 = vcombine.low %v3417_v7, %v3427_v45  ;;  %v3450_v38 = vrot.slane %v3448_v35, 5  ;;  %v3455_v1 = vrot.slane %v3453_v8, 4  ;;  %v3458_v55 = vrot.slane %v3456_v63, 5  ;;  %v356_v0 = vld [vmem:[%s9954_s29 + $0xf8] sm:$0xff] }
 0x12d   : > { %v10640_v42 = vpop.f32.mrf.mxu0  ;;  %9428 = vmatprep.subr.bf16.mxu0 %v10644_v40  ;;  %v10657_v51 = vpop.f32.mrf.mxu1  ;;  %v3466_v58 = vshrl.u32 %v3174_v53, 16  ;;  %v3436_v6 = vrot.slane %v3435_v25, 4  ;;  %v3446_v20 = vrot.slane %v3445_v26, 4  ;;  %v3472_v22 = vshll.u32 %v3175_v27, 16  ;;  %v3181_v45 = vld [vmem:[#allocation3 + $0xb0] sm:$0x1] }
 0x12e   : > { %9299 = vmatpush3.bf16.msra.mxu1 %v9643_v13  ;;  %v3459_v23 = vor.u32 %v3458_v55, %v3455_v1  ;;  %v3464_v60 = vrot.slane %v3462_v18, 5  ;;  %v10671_v32 = vrot.slane %v711_v39, 7  ;;  %v3477_v47 = vshrl.u32 %v3176_v2, 16 }
 0x12f   : > { %v10650_v17 = vpop.f32.mrf.mxu0  ;;  %9269 = vmatmul.mubr.bf16.gmra.mxu0 %v8517_v44  ;;  %9380 = vmatprep.subr.bf16.mxu1 %v10648_v61  ;;  %v3468_v52 = vrot.slane %v3466_v58, 4  ;;  %v10663_v28 = vpop.f32.mrf.mxu1  ;;  %v3441_v57 = vsel %vm10186_vm14, %v3436_v6, %v3440_v12  ;;  %v3451_v13 = vsel %vm10186_vm14, %v3446_v20, %v3450_v38  ;;  %v3474_v14 = vrot.slane %v3472_v22, 5 }
 0x130   : > { %9221 = vmatmul.mubr.bf16.gmra.mxu1 %v9630_v11  ;;  %v8518_v9 = vcombine.low %v3441_v57, %v3451_v13  ;;  %v3460_v29 = vrot.slane %v3459_v23, 4  ;;  %v3480_v50 = vshll.u32 %v3176_v2, 16  ;;  %v3486_v15 = vshll.u32 %v3177_v48, 16  ;;  %v3182_v57 = vld [vmem:[#allocation3 + $0xb4] sm:$0xf] }
 0x131   : > { %v10659_v49 = vpop.f32.mrf.mxu0  ;;  %9224 = vmatprep.mubr.bf16.mxu1 %v9633_v19  ;;  %v3469_v62 = vor.u32 %v3468_v52, %v3464_v60  ;;  %v3490_v56 = vshrl.u32 %v3177_v48, 16  ;;  %v3496_v59 = vshll.u32 %v3178_v10, 16  ;;  %v3479_v39 = vrot.slane %v3477_v47, 4  ;;  %v10679_v12 = vpop.f32.mrf.mxu1 }
 0x132   : > { %9272 = vmatprep.mubr.bf16.mxu0 %v8518_v9  ;;  %v3465_v11 = vsel %vm10186_vm14, %v3460_v29, %v3464_v60  ;;  %v10677_v34 = vpack.c.bf16 %v356_v0, %v356_v0  ;;  %12044 = vst [vmem:[#allocation14_spill] sm:$0xff] %v10679_v12  ;;  %v3482_v24 = vrot.slane %v3480_v50, 5  ;;  %v3488_v35 = vrot.slane %v3486_v15, 5  ;;  %v9638_v9 = vld [vmem:[#allocation3 + $0xa8] sm:$0xff]   ;;  %v3183_v29 = vld [vmem:[#allocation3 + $0xb8] sm:$0xf] }
 0x133   : > { %v10673_v37 = vpop.f32.mrf.mxu0  ;;  %v3470_v54 = vrot.slane %v3469_v62, 4  ;;  %v3492_v46 = vrot.slane %v3490_v56, 4  ;;  %v3498_v7 = vrot.slane %v3496_v59, 5  ;;  %v3501_v27 = vshrl.u32 %v3179_v31, 16  ;;  %v10685_v6 = vpop.f32.mrf.mxu1  ;;  %v3184_v62 = vld [vmem:[#allocation3 + $0xbc] sm:$0x1] }
 0x134   : > { %v3504_v8 = vshll.u32 %v3179_v31, 16  ;;  %v3510_v63 = vshll.u32 %v3180_v3, 16  ;;  %v3483_v25 = vor.u32 %v3482_v24, %v3479_v39  ;;  %v3514_v38 = vshrl.u32 %v3180_v3, 16  ;;  %12045 = vst [vmem:[#allocation15_spill] sm:$0xff] %v10685_v6  ;;  %v263_v56 = vld [vmem:[#allocation3 + $0xc0] sm:$0x1] }
 0x135   : > { %v3475_v53 = vsel %vm10186_vm14, %v3470_v54, %v3474_v14  ;;  %v3493_v26 = vor.u32 %v3492_v46, %v3488_v35  ;;  %v3503_v1 = vrot.slane %v3501_v27, 4  ;;  %v3520_v58 = vshll.u32 %v3181_v45, 16  ;;  %v319_v3 = vld [vmem:[#allocation3 + $0xc8] sm:$0x1] }
 0x136   : > { %v8519_v19 = vcombine.low %v3465_v11, %v3475_v53  ;;  %v3506_v55 = vrot.slane %v3504_v8, 5  ;;  %v3512_v18 = vrot.slane %v3510_v63, 5  ;;  %v3484_v20 = vrot.slane %v3483_v25, 4 }
 0x137   : > { %v3494_v22 = vrot.slane %v3493_v26, 4  ;;  %v3516_v0 = vrot.slane %v3514_v38, 4  ;;  %v714_v23 = vshll.u32 %v10612_v30, 16  ;;  %v3522_v52 = vrot.slane %v3520_v58, 5  ;;  %v3958_v58 = vld [vmem:[#allocation3 + $0x10] sm:$0xf] }
 0x138   : > { %v10683_v44 = vpop.f32.mrf.mxu0  ;;  %9225 = vmatmul.mubr.bf16.gmra.mxu1 %v9634_v16  ;;  %9273 = vmatmul.mubr.bf16.gmra.mxu0 %v8519_v19  ;;  %v3507_v60 = vor.u32 %v3506_v55, %v3503_v1  ;;  %v719_v13 = vshrl.u32 %v10677_v34, 16  ;;  %v3489_v2 = vsel %vm10186_vm14, %v3484_v20, %v3488_v35  ;;  %v3525_v10 = vshrl.u32 %v3182_v57, 16 }
 0x139   : > { %9228 = vmatprep.mubr.bf16.mxu1 %v9637_v21  ;;  %v3499_v48 = vsel %vm10186_vm14, %v3494_v22, %v3498_v7  ;;  %v3517_v16 = vor.u32 %v3516_v0, %v3512_v18  ;;  %v9641_v21 = vld [vmem:[#allocation3 + $0xb4] sm:$0xff]   ;;  %v3528_v50 = vshll.u32 %v3182_v57, 16  ;;  %v3534_v15 = vshll.u32 %v3183_v29, 16  ;;  %v3957_v0 = vld [vmem:[#allocation3 + $0xc] sm:$0xe] }
 0x13a   : > { %v10689_v14 = vpop.f32.mrf.mxu0  ;;  %v8520_v47 = vcombine.low %v3489_v2, %v3499_v48  ;;  %v3508_v30 = vrot.slane %v3507_v60, 4  ;;  %v3527_v54 = vrot.slane %v3525_v10, 4  ;;  %v3538_v39 = vshrl.u32 %v3183_v29, 16  ;;  %v3959_v60 = vld [vmem:[#allocation3 + $0x14] sm:$0x1] }
 0x13b   : > { %v3518_v11 = vrot.slane %v3517_v16, 4  ;;  %v3544_v31 = vshll.u32 %v3184_v62, 16  ;;  %v3530_v35 = vrot.slane %v3528_v50, 5  ;;  %v3536_v46 = vrot.slane %v3534_v15, 5  ;;  %v3961_v50 = vld [vmem:[#allocation3 + $0x1c] sm:$0xf] }
 0x13c   : > { %9276 = vmatprep.mubr.bf16.mxu0 %v8520_v47  ;;  %v3513_v24 = vsel %vm10186_vm14, %v3508_v30, %v3512_v18  ;;  %v264_v7 = vsel %vm9965_vm2, 0, %v263_v56  ;;  %v10701_v45 = vpop.f32.mrf.mxu0  ;;  %v3540_v27 = vrot.slane %v3538_v39, 4  ;;  %v717_v8 = vrot.slane %v10671_v32, 4 }
 0x13d   : > { %v3523_v53 = vsel %vm10186_vm14, %v3518_v11, %v3522_v52  ;;  %265 = vst [vmem:[#allocation3 + $0xc0] sm:$0x1] %v264_v7  ;;  %v721_v63 = vrot.slane %v719_v13, 7  ;;  %v3531_v25 = vor.u32 %v3530_v35, %v3527_v54  ;;  %v722_v26 = vshll.u32 %v10677_v34, 16  ;;  %v3962_v54 = vld [vmem:[#allocation3 + $0x20] sm:$0x1] }
 0x13e   : > { %v10695_v59 = vpop.f32.mrf.mxu1  ;;  %v8521_v19 = vcombine.low %v3513_v24, %v3523_v53  ;;  %v320_v38 = vsel %vm9970_vm4, 0, %v319_v3  ;;  %v3541_v55 = vor.u32 %v3540_v27, %v3536_v46  ;;  %v3546_v18 = vrot.slane %v3544_v31, 5  ;;  %v10711_v57 = vpop.f32.mrf.mxu0  ;;  %v3964_v31 = vld [vmem:[#allocation3 + $0x28] sm:$0xf]  ;;  %v3963_v3 = vld [vmem:[#allocation3 + $0x24] sm:$0xe] }
 0x13f   : > { %12046 = vst [vmem:[#allocation16_spill] sm:$0xff] %v10695_v59  ;;  %321 = vst [vmem:[#allocation3 + $0xc8] sm:$0x1] %v320_v38  ;;  %v3532_v20 = vrot.slane %v3531_v25, 4  ;;  %v724_v22 = vor.u32 %v722_v26, %v721_v63  ;;  %v4055_v52 = vrot.slane %v3958_v58, 5  ;;  %v716_v34 = vor.u32 %v714_v23, %v10671_v32 }
 0x140   : > { %9229 = vmatmul.mubr.bf16.gmra.mxu1 %v9638_v9  ;;  %v10709_v1 = vpop.f32.mrf.mxu1  ;;  %9277 = vmatmul.mubr.bf16.gmra.mxu0 %v8521_v19  ;;  %v3542_v13 = vrot.slane %v3541_v55, 4  ;;  %v726_v9 = vrot.slane %v721_v63, 4  ;;  %v8532_v62 = vrot.slane %v3957_v0, 9  ;;  %v4058_v47 = vrot.slane %v3959_v60, 5  ;;  %v3965_v7 = vld [vmem:[#allocation3 + $0x2c] sm:$0x1] }
 0x141   : > { %12047 = vst [vmem:[#allocation17_spill] sm:$0xff] %v10709_v1  ;;  %9232 = vmatprep.mubr.bf16.mxu1 %v9641_v21  ;;  %v3537_v2 = vsel %vm10186_vm14, %v3532_v20, %v3536_v46  ;;  %v725_v48 = vsel %vm9994_vm7, %v717_v8, %v724_v22  ;;  %v4057_v10 = vrot.slane %v4055_v52, 4  ;;  %v4062_v39 = vrot.slane %v3961_v50, 5  ;;  %v3967_v55 = vld [vmem:[#allocation3 + $0x34] sm:$0xf] }
 0x142   : > { %v10718_v16 = vpop.f32.mrf.mxu1  ;;  %v3547_v29 = vsel %vm10186_vm14, %v3542_v13, %v3546_v18  ;;  %886 = vst [vmem:[#allocation3 + $0xc4] sm:$0xf] %v725_v48  ;;  %v4069_v24 = vrot.slane %v3964_v31, 5  ;;  %v4056_v41 = vsel %vm10179_vm13, %v8532_v62, %v4055_v52  ;;  %v8533_v27 = vrot.slane %v3960_v36, 9  ;;  %v3966_v48 = vld [vmem:[#allocation3 + $0x30] sm:$0xe] }
 0x143   : > { %12048 = vst [vmem:[#allocation18_spill] sm:$0xff] %v10718_v16  ;;  %v8522_v30 = vcombine.low %v3537_v2, %v3547_v29  ;;  %v4059_v46 = vsel %vm10179_vm13, %v4057_v10, %v4058_v47  ;;  %v4065_v8 = vrot.slane %v3962_v54, 5  ;;  %v4064_v26 = vrot.slane %v4062_v39, 4  ;;  %v3969_v31 = vld [vmem:[#allocation3 + $0x3c] sm:$0xe] }
 0x144   : > { %v883_v21 = vld [vmem:[#allocation3 + $0xc0] sm:$0xf]  ;;  %v10726_v56 = vpop.f32.mrf.mxu1  ;;  %v8534_v38 = vrot.slane %v3963_v3, 9  ;;  %v8548_v18 = vcombine.low %v4056_v41, %v4059_v46  ;;  %v4071_v58 = vrot.slane %v4069_v24, 4  ;;  %v4072_v20 = vrot.slane %v3965_v7, 5 }
 0x145   : > { %v884_v23 = vsel %vm10000_vm8, %v716_v34, %v883_v21  ;;  %9280 = vmatprep.mubr.bf16.mxu0 %v8522_v30  ;;  %12049 = vst [vmem:[#allocation19_spill] sm:$0xff] %v10726_v56  ;;  %v4076_v29 = vrot.slane %v3967_v55, 5  ;;  %v4063_v47 = vsel %vm10179_vm13, %v8533_v27, %v4062_v39  ;;  %v4066_v30 = vsel %vm10179_vm13, %v4064_v26, %v4065_v8  ;;  %v3970_v3 = vld [vmem:[#allocation3 + $0x40] sm:$0xf]  ;;  %v3971_v41 = vld [vmem:[#allocation3 + $0x44] sm:$0x1] }
 0x146   : > { %885 = vst [vmem:[#allocation3 + $0xc0] sm:$0xf] %v884_v23  ;;  %v887_v15 = vld [vmem:[#allocation3 + $0xc8] sm:$0x1]  ;;  %v4073_v54 = vsel %vm10179_vm13, %v4071_v58, %v4072_v20  ;;  %v8535_v8 = vrot.slane %v3966_v48, 9  ;;  %v4083_v26 = vrot.slane %v3970_v3, 5 }
 0x147   : > { %v888_v11 = vsel %vm9965_vm2, %v726_v9, %v887_v15  ;;  %v3968_v9 = vld [vmem:[#allocation3 + $0x38] sm:$0x1]  ;;  %v9651_v58 = vld [vmem:[#allocation7 + $0x1f0] sm:$0xff]   ;;  %v8536_v20 = vrot.slane %v3969_v31, 9  ;;  %v9655_v3 = vld [vmem:[#allocation7 + $0x1e8] sm:$0xff]   ;;  %vm8183_vm7 = vcmask 1044484  }
 0x148   : > { %889 = vst [vmem:[#allocation3 + $0xc8] sm:$0x1] %v888_v11  ;;  %v4070_v11 = vsel %vm10179_vm13, %v8534_v38, %v4069_v24  ;;  %v9645_v38 = vld [vmem:[#allocation3 + $0x18] sm:$0xff]   ;;  %vm8185_vm8 = vcmask 1045509   ;;  %vm8187_vm9 = vcmask 1046534   ;;  %vm8189_vm10 = vcmask 1047559  }
 0x149   : > { %v10722_v32 = vpop.f32.mrf.mxu0  ;;  %v3186_v53 = vld [vmem:[#allocation3 + $0xc4] sm:$0xf]  ;;  %v4084_v31 = vsel %vm10179_vm13, %v8536_v20, %v4083_v26  ;;  %v3978_v20 = vld [vmem:[#allocation3 + $0x60] sm:$0xe]  ;;  %v5825_v56 = vld [vmem:[#allocation3 + $0x38] sm:$0x1] }
 0x14a   : > { %v3558_v19 = vshll.u32 %v3186_v53, 16  ;;  %v3562_v25 = vshrl.u32 %v3186_v53, 16  ;;  %v8549_v53 = vcombine.low %v4063_v47, %v4066_v30  ;;  %v5009_v16 = vld [vmem:[#allocation3 + $0x3c] sm:$0xf]  ;;  %v5932_v1 = vrot.slane %v5825_v56, 5 }
 0x14b   : > { %v10730_v35 = vpop.f32.mrf.mxu0 }
 0x14c   : > { %v3560_v52 = vrot.slane %v3558_v19, 5  ;;  %v3564_v2 = vrot.slane %v3562_v25, 4  ;;  %v4078_v19 = vrot.slane %v4076_v29, 4  ;;  %v4079_v25 = vrot.slane %v3968_v9, 5 }
 0x14d   : > { %v10736_v63 = vpop.f32.mrf.mxu1  ;;  %v10738_v22 = vpop.f32.mrf.mxu0  ;;  %v9642_v0 = vld [vmem:[#allocation3 + $0xc0] sm:$0xff]  }
 0x14e   : > { %12050 = vst [vmem:[#allocation20_spill] sm:$0xff] %v10736_v63  ;;  %v3185_v60 = vld [vmem:[#allocation3 + $0xc0] sm:$0xf]  ;;  %9233 = vmatmul.mubr.bf16.gmra.mxu1 %v9642_v0  ;;  %v3565_v23 = vor.u32 %v3564_v2, %v3560_v52  ;;  %v3973_v0 = vld [vmem:[#allocation3 + $0x4c] sm:$0xf] }
 0x14f   : > { %v3549_v13 = vshrl.u32 %v3185_v60, 16  ;;  %v3552_v34 = vshll.u32 %v3185_v60, 16  ;;  %v10740_v62 = vpop.f32.mrf.mxu1  ;;  %v3187_v10 = vld [vmem:[#allocation3 + $0xc8] sm:$0x1]  ;;  %9300 = vmatprep.mubr.bf16.mxu1 %v8548_v18  ;;  %v10746_v15 = vpop.f32.mrf.mxu0  ;;  %v8550_v18 = vcombine.low %v4070_v11, %v4073_v54  ;;  %v3972_v2 = vld [vmem:[#allocation3 + $0x48] sm:$0xe] }
 0x150   : > { %12051 = vst [vmem:[#allocation21_spill] sm:$0xff] %v10740_v62  ;;  %v3568_v36 = vshll.u32 %v3187_v10, 16  ;;  %v3566_v46 = vrot.slane %v3565_v23, 4  ;;  %v3974_v10 = vld [vmem:[#allocation3 + $0x50] sm:$0x1]  ;;  %v4090_v23 = vrot.slane %v3973_v0, 5 }
 0x151   : > { %v3551_v21 = vrot.slane %v3549_v13, 4  ;;  %v3554_v50 = vrot.slane %v3552_v34, 5  ;;  %v10752_v27 = vpop.f32.mrf.mxu1  ;;  %v4085_v13 = vrot.slane %v4083_v26, 4  ;;  %v4086_v34 = vrot.slane %v3971_v41, 5  ;;  %v3976_v11 = vld [vmem:[#allocation3 + $0x58] sm:$0xf] }
 0x152   : > { %v3570_v7 = vrot.slane %v3568_v36, 5  ;;  %12052 = vst [vmem:[#allocation22_spill] sm:$0xff] %v10752_v27  ;;  %v3975_v36 = vld [vmem:[#allocation3 + $0x54] sm:$0xe]  ;;  %v4097_v41 = vrot.slane %v3976_v11, 5  ;;  %v9673_v59 = vld [vmem:[#allocation3 + $0xc0] sm:$0xff]  }
 0x153   : > { %v3555_v39 = vor.u32 %v3554_v50, %v3551_v21  ;;  %v10760_v9 = vpop.f32.mrf.mxu1  ;;  %v4077_v21 = vsel %vm10179_vm13, %v8535_v8, %v4076_v29  ;;  %v4080_v50 = vsel %vm10179_vm13, %v4078_v19, %v4079_v25  ;;  %v4087_v29 = vsel %vm10179_vm13, %v4085_v13, %v4086_v34 }
 0x154   : > { %v3571_v24 = vsel %vm10186_vm14, %v3566_v46, %v3570_v7  ;;  %12053 = vst [vmem:[#allocation23_spill] sm:$0xff] %v10760_v9  ;;  %v8537_v46 = vrot.slane %v3972_v2, 9  ;;  %v4092_v8 = vrot.slane %v4090_v23, 4  ;;  %v4093_v19 = vrot.slane %v3974_v10, 5  ;;  %v10786_v10 = vld [vmem:[#allocation3 + $0x6c] sm:$0xe] }
 0x155   : > { %v3556_v55 = vrot.slane %v3555_v39, 4  ;;  %v8551_v39 = vcombine.low %v4077_v21, %v4080_v50  ;;  %v8538_v25 = vrot.slane %v3975_v36, 9  ;;  %v8552_v26 = vcombine.low %v4084_v31, %v4087_v29  ;;  %v10788_v21 = vld [vmem:[#allocation3 + $0x70] sm:$0xf] }
 0x156   : > { %9301 = vmatmul.mubr.bf16.vlgmr.msra.gmra.mxu1 %v8549_v53  ;;  %v9646_v53 = vld [vmem:[#allocation3 + $0x24] sm:$0xff]   ;;  %v4099_v34 = vrot.slane %v4097_v41, 4  ;;  %v4091_v50 = vsel %vm10179_vm13, %v8537_v46, %v4090_v23  ;;  %v4094_v36 = vsel %vm10179_vm13, %v4092_v8, %v4093_v19  ;;  %v10803_v46 = vld [vmem:[#allocation3 + $0x7c] sm:$0xf]  ;;  %v10808_v19 = vld [vmem:[#allocation3 + $0x78] sm:$0xe] }
 0x157   : > { %v10756_v60 = vpop.f32.mrf.mxu0  ;;  %v3561_v48 = vsel %vm10186_vm14, %v3556_v55, %v3560_v52  ;;  %9381 = vmatpush3.bf16.msra.mxu1 %v10648_v61  ;;  %9304 = vmatprep.mubr.bf16.mxu1 %v8550_v18  ;;  %v3977_v52 = vld [vmem:[#allocation3 + $0x5c] sm:$0x1]  ;;  %v10775_v61 = vld [vmem:[#allocation3 + $0x64] sm:$0xf]  ;;  %v9649_v18 = vld [vmem:[#allocation3 + $0x30] sm:$0xff]   ;;  %v4098_v11 = vsel %vm10179_vm13, %v8538_v25, %v4097_v41  ;;  %v8540_v41 = vrot.slane %v10786_v10, 9 }
 0x158   : > { %v8523_v30 = vcombine.low %v3561_v48, %v3571_v24  ;;  %9382 = vmatprep.subr.bf16.mxu1 %v9651_v58  ;;  %v4100_v55 = vrot.slane %v3977_v52, 5  ;;  %v9659_v24 = vld [vmem:[#allocation7 + $0x1e0] sm:$0xff]   ;;  %v4104_v2 = vrot.slane %v10775_v61, 5  ;;  %v3980_v48 = vld [vmem:[#allocation3 + $0x68] sm:$0x1]  ;;  %v4111_v52 = vrot.slane %v10788_v21, 5 }
 0x159   : > { %v10762_v47 = vpop.f32.mrf.mxu0  ;;  %v4107_v23 = vrot.slane %v3980_v48, 5  ;;  %v9650_v25 = vld [vmem:[#allocation3 + $0x3c] sm:$0xff]  }
 0x15a   : > { %9281 = vmatmul.mubr.bf16.gmra.mxu0 %v8523_v30  ;;  %v4101_v61 = vsel %vm10179_vm13, %v4099_v34, %v4100_v55  ;;  %v8553_v55 = vcombine.low %v4091_v50, %v4094_v36  ;;  %v9667_v34 = vld [vmem:[#allocation7 + $0x1d0] sm:$0xff]  }
 0x15b   : > { %v10769_v54 = vpop.f32.mrf.mxu0  ;;  %9348 = vmatprep.mubr.bf16.mxu0 %v9645_v38  ;;  %9383 = vmatpush3.bf16.msra.mxu1 %v9651_v58  ;;  %v9652_v38 = vld [vmem:[#allocation7 + $0x230] sm:$0xff]   ;;  %v10790_v58 = vld [vmem:[#allocation3 + $0x74] sm:$0x1]  ;;  %v8554_v21 = vcombine.low %v4098_v11, %v4101_v61  ;;  %v9660_v11 = vld [vmem:[#allocation7 + $0x220] sm:$0xff]   ;;  %v8541_v61 = vrot.slane %v10808_v19, 9 }
 0x15c   : > { %v10777_v7 = vpop.f32.mrf.mxu1  ;;  %9384 = vmatprep.subr.bf16.mxu1 %v9655_v3  ;;  %v4114_v8 = vrot.slane %v10790_v58, 5  ;;  %v10814_v58 = vld [vmem:[#allocation3 + $0x84] sm:$0xe]  ;;  %v9653_v36 = vld [vmem:[#allocation3 + $0x48] sm:$0xff]  }
 0x15d   : > { %12054 = vst [vmem:[#allocation24_spill] sm:$0xff] %v10777_v7  ;;  %v10781_v13 = vpop.f32.mrf.mxu0  ;;  %v5005_v7 = vld [vmem:[#allocation3 + $0x2c] sm:$0x1] }
 0x15e   : > { %v10779_v0 = vpop.f32.mrf.mxu1  ;;  %9305 = vmatmul.mubr.bf16.gmra.mxu1 %v8551_v39  ;;  %v9656_v39 = vld [vmem:[#allocation7 + $0x228] sm:$0xff]  }
 0x15f   : > { %12055 = vst [vmem:[#allocation25_spill] sm:$0xff] %v10779_v0  ;;  %9308 = vmatprep.mubr.bf16.mxu1 %v8552_v26  ;;  %9385 = vmatpush3.bf16.msra.mxu1 %v9655_v3  ;;  %v8539_v26 = vrot.slane %v3978_v20, 9  ;;  %v9663_v3 = vld [vmem:[#allocation7 + $0x1d8] sm:$0xff]   ;;  %v10810_v20 = vld [vmem:[#allocation3 + $0x80] sm:$0x1] }
 0x160   : > { %v10784_v30 = vpop.f32.mrf.mxu1  ;;  %9386 = vmatprep.subr.bf16.mxu1 %v9659_v24  ;;  %v10816_v0 = vld [vmem:[#allocation3 + $0x88] sm:$0xf] }
 0x161   : > { %12056 = vst [vmem:[#allocation26_spill] sm:$0xff] %v10784_v30  ;;  %v9158_v29 = vpop.f32.mrf.mxu0  ;;  %v4106_v30 = vrot.slane %v4104_v2, 4 }
 0x162   : > { %v10799_v31 = vpop.f32.mrf.mxu1  ;;  %9349 = vmatmul.mubr.bf16.vlgmr.msra.gmra.mxu0 %v9646_v53 }
 0x163   : > { %12057 = vst [vmem:[#allocation27_spill] sm:$0xff] %v10799_v31  ;;  %9429 = vmatpush3.bf16.msra.mxu0 %v10644_v40  ;;  %9352 = vmatprep.mubr.bf16.mxu0 %v9649_v18  ;;  %v4113_v31 = vrot.slane %v4111_v52, 4  ;;  %v4118_v40 = vrot.slane %v10803_v46, 5  ;;  %v2468_v10 = vpop.f32.mrf.mxu0 }
 0x164   : > { %v9110_v53 = vpop.f32.mrf.mxu1  ;;  %9430 = vmatprep.subr.bf16.mxu0 %v9652_v38  ;;  %9387 = vmatpush3.bf16.msra.mxu1 %v9659_v24  ;;  %v4108_v24 = vsel %vm10179_vm13, %v4106_v30, %v4107_v23  ;;  %v8542_v30 = vrot.slane %v10814_v58, 9  ;;  %v10834_v23 = vld [vmem:[#allocation3 + $0x94] sm:$0xf] }
 0x165   : > { %v2033_v48 = vadd.f32 %v9110_v53, %v10640_v42  ;;  %9388 = vmatprep.subr.bf16.mxu1 %v9663_v3  ;;  %v4105_v42 = vsel %vm10179_vm13, %v8539_v26, %v4104_v2  ;;  %v4121_v53 = vrot.slane %v10810_v20, 5  ;;  %v4120_v2 = vrot.slane %v4118_v40, 4  ;;  %v10832_v26 = vld [vmem:[#allocation3 + $0x90] sm:$0xe]  ;;  %v9159_v19 = vpop.f32.mrf.mxu0 }
 0x166   : > { %v1872_v18 = vpop.f32.mrf.mxu1  ;;  %9309 = vmatmul.mubr.bf16.gmra.mxu1 %v8553_v55  ;;  %v4112_v55 = vsel %vm10179_vm13, %v8540_v41, %v4111_v52  ;;  %v9664_v20 = vld [vmem:[#allocation7 + $0x218] sm:$0xff]   ;;  %v4132_v52 = vrot.slane %v10834_v23, 5  ;;  %v9675_v41 = vld [vmem:[#allocation7 + $0x1c0] sm:$0xff]  }
 0x167   : > { %v10818_v5 = vadd.f32 %v9158_v29, %v2033_v48  ;;  %v2031_v50 = vadd.f32 %v1872_v18, %v10650_v17  ;;  %9431 = vmatpush3.bf16.msra.mxu0 %v9652_v38  ;;  %v3989_v29 = vld [vmem:[#allocation3 + $0x8c] sm:$0x1]  ;;  %v4125_v48 = vrot.slane %v10816_v0, 5  ;;  %v9671_v17 = vld [vmem:[#allocation7 + $0x1c8] sm:$0xff]   ;;  %9312 = vmatprep.mubr.bf16.mxu1 %v8554_v21  ;;  %v4115_v0 = vsel %vm10179_vm13, %v4113_v31, %v4114_v8  ;;  %v9654_v21 = vld [vmem:[#allocation3 + $0x54] sm:$0xff]  }
 0x168   : > { %v9111_v46 = vpop.f32.mrf.mxu1  ;;  %9432 = vmatprep.subr.bf16.mxu0 %v9656_v39  ;;  %9389 = vmatpush3.bf16.msra.mxu1 %v9663_v3  ;;  %v8555_v3 = vcombine.low %v4105_v42, %v4108_v24  ;;  %v8556_v31 = vcombine.low %v4112_v55, %v4115_v0  ;;  %v3993_v8 = vld [vmem:[#allocation3 + $0x9c] sm:$0xe]  ;;  %v4119_v42 = vsel %vm10179_vm13, %v8541_v61, %v4118_v40  ;;  %v3998_v23 = vld [vmem:[#allocation3 + $0xb0] sm:$0x1] }
 0x169   : > { %12058 = vst [vmem:[#allocation28_spill] sm:$0xff] %v10818_v5  ;;  %v10828_v38 = vadd.f32 %v2468_v10, %v2031_v50  ;;  %v2034_v18 = vadd.f32 %v9111_v46, %v10659_v49  ;;  %v10840_v10 = vld [vmem:[#allocation3 + $0x98] sm:$0x1]  ;;  %9390 = vmatprep.subr.bf16.mxu1 %v9667_v34  ;;  %v4127_v58 = vrot.slane %v4125_v48, 4  ;;  %v4128_v50 = vrot.slane %v3989_v29, 5  ;;  %v9657_v46 = vld [vmem:[#allocation3 + $0x60] sm:$0xff]  }
 0x16a   : > { %9353 = vmatmul.mubr.bf16.gmra.mxu0 %v9650_v25  ;;  %v8543_v25 = vrot.slane %v10832_v26, 9  ;;  %v3995_v5 = vld [vmem:[#allocation3 + $0xa4] sm:$0x1]  ;;  %v4122_v24 = vsel %vm10179_vm13, %v4120_v2, %v4121_v53  ;;  %v3996_v29 = vld [vmem:[#allocation3 + $0xa8] sm:$0xe]  ;;  %v1875_v53 = vpop.f32.mrf.mxu1 }
 0x16b   : > { %12059 = vst [vmem:[#allocation29_spill] sm:$0xff] %v10828_v38  ;;  %v10842_v49 = vadd.f32 %v9159_v19, %v2034_v18  ;;  %9356 = vmatprep.mubr.bf16.mxu0 %v9653_v36  ;;  %9433 = vmatpush3.bf16.msra.mxu0 %v9656_v39  ;;  %v3994_v38 = vld [vmem:[#allocation3 + $0xa0] sm:$0xf]  ;;  %v4135_v18 = vrot.slane %v10840_v10, 5  ;;  %v9668_v36 = vld [vmem:[#allocation7 + $0x210] sm:$0xff]   ;;  %v8544_v19 = vrot.slane %v3993_v8, 9 }
 0x16c   : > { %9434 = vmatprep.subr.bf16.mxu0 %v9660_v11  ;;  %9391 = vmatpush3.bf16.msra.mxu1 %v9667_v34  ;;  %v4139_v39 = vrot.slane %v3994_v38, 5  ;;  %v3997_v26 = vld [vmem:[#allocation3 + $0xac] sm:$0xf]  ;;  %v4134_v34 = vrot.slane %v4132_v52, 4  ;;  %v4142_v55 = vrot.slane %v3995_v5, 5  ;;  %v4126_v38 = vsel %vm10179_vm13, %v8542_v30, %v4125_v48 }
 0x16d   : > { %12060 = vst [vmem:[#allocation30_spill] sm:$0xff] %v10842_v49  ;;  %9392 = vmatprep.subr.bf16.mxu1 %v9671_v17  ;;  %v4146_v0 = vrot.slane %v3997_v26, 5  ;;  %v8545_v61 = vrot.slane %v3996_v29, 9  ;;  %v4149_v10 = vrot.slane %v3998_v23, 5  ;;  %v2471_v49 = vpop.f32.mrf.mxu0  ;;  %v8557_v5 = vcombine.low %v4119_v42, %v4122_v24  ;;  %v4000_v8 = vld [vmem:[#allocation3 + $0xb8] sm:$0xf] }
 0x16e   : > { %9313 = vmatmul.mubr.bf16.gmra.mxu1 %v8555_v3  ;;  %v4141_v40 = vrot.slane %v4139_v39, 4  ;;  %v9672_v3 = vld [vmem:[#allocation7 + $0x208] sm:$0xff]   ;;  %v9658_v26 = vld [vmem:[#allocation3 + $0x6c] sm:$0xff]   ;;  %v4001_v30 = vld [vmem:[#allocation3 + $0xbc] sm:$0x1] }
 0x16f   : > { %9435 = vmatpush3.bf16.msra.mxu0 %v9660_v11  ;;  %9316 = vmatprep.mubr.bf16.mxu1 %v8556_v31  ;;  %v4129_v11 = vsel %vm10179_vm13, %v4127_v58, %v4128_v50  ;;  %v4148_v2 = vrot.slane %v4146_v0, 4  ;;  %v3999_v31 = vld [vmem:[#allocation3 + $0xb4] sm:$0xe]  ;;  %v4153_v50 = vrot.slane %v4000_v8, 5  ;;  %v9661_v29 = vld [vmem:[#allocation3 + $0x78] sm:$0xff]   ;;  %v4156_v42 = vrot.slane %v4001_v30, 5 }
 0x170   : > { %9436 = vmatprep.subr.bf16.mxu0 %v9664_v20  ;;  %9393 = vmatpush3.bf16.msra.mxu1 %v9671_v17  ;;  %v8558_v48 = vcombine.low %v4126_v38, %v4129_v11  ;;  %v8546_v58 = vrot.slane %v3999_v31, 9  ;;  %v2032_v17 = vadd.f32 %v1875_v53, %v10673_v37  ;;  %v4002_v24 = vld [vmem:[#allocation3 + $0xc0] sm:$0xe]  ;;  %v10870_v23 = vsel %vm10179_vm13, %v4141_v40, %v4142_v55  ;;  %v4004_v38 = vld [vmem:[#allocation3 + $0xc8] sm:$0x1]  ;;  %v9676_v40 = vld [vmem:[#allocation7 + $0x200] sm:$0xff]  }
 0x171   : > { %9394 = vmatprep.subr.bf16.mxu1 %v9675_v41  ;;  %v10874_v37 = vsel %vm10179_vm13, %v8545_v61, %v4146_v0  ;;  %v4163_v55 = vrot.slane %v4004_v38, 5  ;;  %v266_v11 = vld [vmem:[#allocation3 + $0xcc] sm:$0x1]  ;;  %v5818_v38 = vld [vmem:[#allocation3 + $0x1c] sm:$0xf] }
 0x172   : > { %9357 = vmatmul.mubr.bf16.gmra.mxu0 %v9654_v21  ;;  %v10858_v21 = vsel %vm10179_vm13, %v8543_v25, %v4132_v52  ;;  %v4155_v25 = vrot.slane %v4153_v50, 4  ;;  %v4003_v52 = vld [vmem:[#allocation3 + $0xc4] sm:$0xf] }
 0x173   : > { %9360 = vmatprep.mubr.bf16.mxu0 %v9657_v46  ;;  %9437 = vmatpush3.bf16.msra.mxu0 %v9664_v20  ;;  %v10862_v46 = vsel %vm10179_vm13, %v4134_v34, %v4135_v18  ;;  %v10866_v20 = vsel %vm10179_vm13, %v8544_v19, %v4139_v39  ;;  %v8547_v18 = vrot.slane %v4002_v24, 9  ;;  %v10878_v39 = vsel %vm10179_vm13, %v4148_v2, %v4149_v10  ;;  %v9662_v24 = vld [vmem:[#allocation3 + $0x84] sm:$0xff]  }
 0x174   : > { %9438 = vmatprep.subr.bf16.mxu0 %v9668_v36  ;;  %9395 = vmatpush3.bf16.msra.mxu1 %v9675_v41  ;;  %v10882_v41 = vsel %vm10179_vm13, %v8546_v58, %v4153_v50  ;;  %v4160_v19 = vrot.slane %v4003_v52, 5  ;;  %v10886_v0 = vsel %vm10179_vm13, %v4155_v25, %v4156_v42  ;;  %v8559_v4 = vcombine.low %v10858_v21, %v10862_v46  ;;  %v5000_v58 = vld [vmem:[#allocation3 + $0x18] sm:$0xf]  ;;  %v5001_v50 = vld [vmem:[#allocation3 + $0x1c] sm:$0xf] }
 0x175   : > { %v8560_v8 = vcombine.low %v10866_v20, %v10870_v23  ;;  %v5002_v42 = vld [vmem:[#allocation3 + $0x20] sm:$0x1]  ;;  %v5052_v21 = vshll.u32 %v5000_v58, 16  ;;  %v5058_v46 = vshll.u32 %v5001_v50, 16  ;;  %v5817_v20 = vld [vmem:[#allocation3 + $0x18] sm:$0xe] }
 0x176   : > { %9317 = vmatmul.mubr.bf16.gmra.mxu1 %v8557_v5  ;;  %v10894_v2 = vsel %vm10179_vm13, %v8547_v18, %v4160_v19  ;;  %v4162_v10 = vrot.slane %v4160_v19, 4  ;;  %v10896_v5 = vadd.f32 %v2471_v49, %v2032_v17  ;;  %v5062_v25 = vshrl.u32 %v5001_v50, 16  ;;  %v5819_v18 = vld [vmem:[#allocation3 + $0x20] sm:$0x1]  ;;  %v9665_v50 = vld [vmem:[#allocation3 + $0x90] sm:$0xff]  }
 0x177   : > { %9439 = vmatpush3.bf16.msra.mxu0 %v9668_v36  ;;  %v267_v36 = vsel %vm9965_vm2, 0, %v266_v11  ;;  %9320 = vmatprep.mubr.bf16.mxu1 %v8558_v48  ;;  %v5068_v52 = vshll.u32 %v5002_v42, 16  ;;  %v5060_v11 = vrot.slane %v5058_v46, 5  ;;  %v5915_v48 = vrot.slane %v5818_v38, 5 }
 0x178   : > { %v9162_v34 = vpop.f32.mrf.mxu0  ;;  %9440 = vmatprep.subr.bf16.mxu0 %v9672_v3  ;;  %268 = vst [vmem:[#allocation3 + $0xcc] sm:$0x1] %v267_v36  ;;  %12061 = vst [vmem:[#allocation31_spill] sm:$0xff] %v10896_v5  ;;  %v8620_v36 = vrot.slane %v5817_v20, 9  ;;  %v5918_v23 = vrot.slane %v5819_v18, 5  ;;  %vm8177_vm2 = vcmask 1041409  }
 0x179   : > { %v9114_v61 = vpop.f32.mrf.mxu1  ;;  %v5070_v30 = vrot.slane %v5068_v52, 5  ;;  %v5004_v5 = vld [vmem:[#allocation3 + $0x28] sm:$0xf]  ;;  %v5917_v46 = vrot.slane %v5915_v48, 4  ;;  %v5820_v18 = vld [vmem:[#allocation3 + $0x24] sm:$0xe] }
 0x17a   : > { %v10890_v53 = vpop.f32.mrf.mxu0  ;;  %v2037_v31 = vadd.f32 %v9114_v61, %v10683_v44  ;;  %9361 = vmatmul.mubr.bf16.gmra.mxu0 %v9658_v26  ;;  %v10913_v44 = vsel %vm10179_vm13, %v4162_v10, %v4163_v55  ;;  %v5049_v26 = vshrl.u32 %v5000_v58, 16  ;;  %v5054_v55 = vrot.slane %v5052_v21, 5  ;;  %v5003_v61 = vld [vmem:[#allocation3 + $0x24] sm:$0xf] }
 0x17b   : > { %v10907_v49 = vpop.f32.mrf.mxu1  ;;  %9364 = vmatprep.mubr.bf16.mxu0 %v9661_v29  ;;  %9441 = vmatpush3.bf16.msra.mxu0 %v9672_v3  ;;  %v5064_v58 = vrot.slane %v5062_v25, 4  ;;  %v10927_v21 = vsel %vm10179_vm13, %v8620_v36, %v5915_v48  ;;  %v5086_v20 = vshrl.u32 %v5004_v5, 16  ;;  %v5821_v36 = vld [vmem:[#allocation3 + $0x28] sm:$0xf] }
 0x17c   : > { %v10909_v17 = vpop.f32.mrf.mxu0  ;;  %9442 = vmatprep.subr.bf16.mxu0 %v9676_v40  ;;  %v10917_v19 = vadd.f32 %v9162_v34, %v2037_v31  ;;  %v5051_v29 = vrot.slane %v5049_v26, 4  ;;  %v5073_v34 = vshrl.u32 %v5003_v61, 16  ;;  %v5076_v31 = vshll.u32 %v5003_v61, 16 }
 0x17d   : > { %v10919_v3 = vpop.f32.mrf.mxu1  ;;  %v5065_v26 = vor.u32 %v5064_v58, %v5060_v11  ;;  %v5088_v61 = vrot.slane %v5086_v20, 4  ;;  %v5092_v58 = vshll.u32 %v5005_v7, 16  ;;  %v5922_v7 = vrot.slane %v5821_v36, 5 }
 0x17e   : > { %12062 = vst [vmem:[#allocation32_spill] sm:$0xff] %v10917_v19  ;;  %v10921_v10 = vpop.f32.mrf.mxu0  ;;  %v5055_v42 = vor.u32 %v5054_v55, %v5051_v29  ;;  %v5082_v19 = vshll.u32 %v5004_v5, 16  ;;  %9321 = vmatmul.mubr.bf16.gmra.mxu1 %v8559_v4  ;;  %v5075_v52 = vrot.slane %v5073_v34, 4  ;;  %v5078_v38 = vrot.slane %v5076_v31, 5  ;;  %v5006_v34 = vld [vmem:[#allocation3 + $0x30] sm:$0xf] }
 0x17f   : > { %9443 = vmatpush3.bf16.msra.mxu0 %v9676_v40  ;;  %v10923_v9 = vpop.f32.mrf.mxu1  ;;  %9324 = vmatprep.mubr.bf16.mxu1 %v8560_v8  ;;  %v5066_v55 = vrot.slane %v5065_v26, 4  ;;  %v10933_v4 = vsel %vm10179_vm13, %v5917_v46, %v5918_v23  ;;  %v5094_v26 = vrot.slane %v5092_v58, 5  ;;  %v5007_v46 = vld [vmem:[#allocation3 + $0x34] sm:$0xf]  ;;  %v5008_v8 = vld [vmem:[#allocation3 + $0x38] sm:$0x1] }
 0x180   : > { %v5056_v25 = vrot.slane %v5055_v42, 4  ;;  %v5084_v40 = vrot.slane %v5082_v19, 5  ;;  %v5079_v48 = vor.u32 %v5078_v38, %v5075_v52  ;;  %v5822_v19 = vld [vmem:[#allocation3 + $0x2c] sm:$0x1]  ;;  %v8621_v42 = vrot.slane %v5820_v18, 9  ;;  %v9666_v38 = vld [vmem:[#allocation3 + $0x9c] sm:$0xff]  }
 0x181   : > { %v5071_v23 = vsel %vm10186_vm14, %v5066_v55, %v5070_v30  ;;  %v5097_v52 = vshrl.u32 %v5006_v34, 16  ;;  %v5924_v62 = vrot.slane %v5922_v7, 4  ;;  %v5100_v30 = vshll.u32 %v5006_v34, 16  ;;  %v5823_v55 = vld [vmem:[#allocation3 + $0x30] sm:$0xe]  ;;  %v9669_v58 = vld [vmem:[#allocation3 + $0xa8] sm:$0xff]  }
 0x182   : > { %9365 = vmatmul.mubr.bf16.gmra.mxu0 %v9662_v24  ;;  %v5061_v5 = vsel %vm10186_vm14, %v5056_v25, %v5060_v11  ;;  %v5089_v31 = vor.u32 %v5088_v61, %v5084_v40  ;;  %v5080_v11 = vrot.slane %v5079_v48, 4  ;;  %v5925_v25 = vrot.slane %v5822_v19, 5 }
 0x183   : > { %v10929_v29 = vpop.f32.mrf.mxu0  ;;  %9368 = vmatprep.mubr.bf16.mxu0 %v9665_v50  ;;  %v10945_v20 = vcombine.low %v5061_v5, %v5071_v23  ;;  %v10949_v27 = vsel %vm10179_vm13, %v8621_v42, %v5922_v7  ;;  %v5099_v5 = vrot.slane %v5097_v52, 4  ;;  %v5106_v48 = vshll.u32 %v5007_v46, 16  ;;  %v5824_v23 = vld [vmem:[#allocation3 + $0x34] sm:$0xf]  ;;  %v5010_v52 = vld [vmem:[#allocation3 + $0x40] sm:$0xf] }
 0x184   : > { %v10939_v24 = vpop.f32.mrf.mxu1  ;;  %v5090_v18 = vrot.slane %v5089_v31, 4  ;;  %v5085_v36 = vsel %vm10186_vm14, %v5080_v11, %v5084_v40  ;;  %v5110_v19 = vshrl.u32 %v5007_v46, 16  ;;  %v12063_v31 = vcombine.low %v10874_v37, %v10878_v39 }
 0x185   : > { %v10943_v50 = vpop.f32.mrf.mxu0  ;;  %v10962_v34 = vsel %vm10179_vm13, %v5924_v62, %v5925_v25  ;;  %v5102_v7 = vrot.slane %v5100_v30, 5  ;;  %v5116_v63 = vshll.u32 %v5008_v8, 16  ;;  %v12064_v46 = vcombine.low %v10882_v41, %v10886_v0  ;;  %v5011_v41 = vld [vmem:[#allocation3 + $0x44] sm:$0x1] }
 0x186   : > { %v10951_v61 = vpop.f32.mrf.mxu1  ;;  %9325 = vmatmul.mubr.bf16.gmra.mxu1 %v12063_v31  ;;  %v5095_v42 = vsel %vm10186_vm14, %v5090_v18, %v5094_v26  ;;  %v5108_v39 = vrot.slane %v5106_v48, 5  ;;  %v5112_v26 = vrot.slane %v5110_v19, 4  ;;  %v8622_v8 = vrot.slane %v5823_v55, 9 }
 0x187   : > { %v10964_v40 = vpop.f32.mrf.mxu0  ;;  %9328 = vmatprep.mubr.bf16.mxu1 %v12064_v46  ;;  %v10969_v11 = vcombine.low %v5085_v36, %v5095_v42  ;;  %v5103_v62 = vor.u32 %v5102_v7, %v5099_v5  ;;  %v5118_v25 = vrot.slane %v5116_v63, 5  ;;  %v5929_v18 = vrot.slane %v5824_v23, 5 }
 0x188   : > { %v10973_v30 = vpop.f32.mrf.mxu1  ;;  %v5113_v31 = vor.u32 %v5112_v26, %v5108_v39  ;;  %v5121_v0 = vshrl.u32 %v5009_v16, 16  ;;  %v5124_v36 = vshll.u32 %v5009_v16, 16  ;;  %v5130_v19 = vshll.u32 %v5010_v52, 16  ;;  %v9670_v26 = vld [vmem:[#allocation3 + $0xb4] sm:$0xff]  }
 0x189   : > { %v5104_v42 = vrot.slane %v5103_v62, 4  ;;  %v10977_v46 = vsel %vm10179_vm13, %v8622_v8, %v5929_v18  ;;  %v5931_v48 = vrot.slane %v5929_v18, 4  ;;  %v10979_v5 = vpop.f32.mrf.mxu0  ;;  %v5134_v7 = vshrl.u32 %v5010_v52, 16  ;;  %v5828_v18 = vld [vmem:[#allocation3 + $0x44] sm:$0x1] }
 0x18a   : > { %9369 = vmatmul.mubr.bf16.gmra.mxu0 %v9666_v38  ;;  %v5826_v38 = vld [vmem:[#allocation3 + $0x3c] sm:$0xe]  ;;  %v5114_v63 = vrot.slane %v5113_v31, 4  ;;  %v5123_v55 = vrot.slane %v5121_v0, 4  ;;  %v5126_v23 = vrot.slane %v5124_v36, 5  ;;  %v5132_v62 = vrot.slane %v5130_v19, 5  ;;  %v10987_v37 = vpop.f32.mrf.mxu1 }
 0x18b   : > { %9372 = vmatprep.mubr.bf16.mxu0 %v9669_v58  ;;  %v5827_v58 = vld [vmem:[#allocation3 + $0x40] sm:$0xf]  ;;  %v5109_v56 = vsel %vm10186_vm14, %v5104_v42, %v5108_v39  ;;  %v10985_v16 = vsel %vm10179_vm13, %v5931_v48, %v5932_v1  ;;  %v5140_v8 = vshll.u32 %v5011_v41, 16  ;;  %v5136_v36 = vrot.slane %v5134_v7, 4  ;;  %v5012_v19 = vld [vmem:[#allocation3 + $0x48] sm:$0xf] }
 0x18c   : > { %v5119_v31 = vsel %vm10186_vm14, %v5114_v63, %v5118_v25  ;;  %v8638_v52 = vcombine.low %v10977_v46, %v10985_v16  ;;  %v5127_v0 = vor.u32 %v5126_v23, %v5123_v55  ;;  %v12065_v39 = vcombine.low %v10894_v2, %v10913_v44  ;;  %v5013_v7 = vld [vmem:[#allocation3 + $0x4c] sm:$0xf] }
 0x18d   : > { %v8598_v1 = vcombine.low %v5109_v56, %v5119_v31  ;;  %v5142_v42 = vrot.slane %v5140_v8, 5  ;;  %v8623_v48 = vrot.slane %v5826_v38, 9  ;;  %v5936_v41 = vrot.slane %v5827_v58, 5  ;;  %v5829_v8 = vld [vmem:[#allocation3 + $0x48] sm:$0xe] }
 0x18e   : > { %9329 = vmatmul.mubr.bf16.gmra.mxu1 %v12065_v39  ;;  %v5128_v12 = vrot.slane %v5127_v0, 4  ;;  %v5137_v25 = vor.u32 %v5136_v36, %v5132_v62  ;;  %v5939_v63 = vrot.slane %v5828_v18, 5  ;;  %v2035_v55 = vadd.f32 %v10907_v49, %v10689_v14  ;;  %v9674_v39 = vld [vmem:[#allocation3 + $0xcc] sm:$0xff]  }
 0x18f   : > { %9396 = vmatprep.mubr.bf16.mxu1 %v10945_v20  ;;  %v11003_v2 = vsel %vm10179_vm13, %v8623_v48, %v5936_v41  ;;  %v5938_v44 = vrot.slane %v5936_v41, 4  ;;  %v2038_v38 = vadd.f32 %v10919_v3, %v10701_v45  ;;  %v2036_v23 = vadd.f32 %v10923_v9, %v10711_v57  ;;  %v5830_v9 = vld [vmem:[#allocation3 + $0x4c] sm:$0xf]  ;;  %v5831_v3 = vld [vmem:[#allocation3 + $0x50] sm:$0x1] }
 0x190   : > { %v5133_v58 = vsel %vm10186_vm14, %v5128_v12, %v5132_v62  ;;  %v5138_v14 = vrot.slane %v5137_v25, 4  ;;  %v11014_v49 = vadd.f32 %v10890_v53, %v2035_v55  ;;  %v5145_v56 = vshrl.u32 %v5012_v19, 16 }
 0x191   : > { %v11020_v45 = vsel %vm10179_vm13, %v5938_v44, %v5939_v63  ;;  %v11023_v57 = vadd.f32 %v10909_v17, %v2038_v38  ;;  %v5148_v12 = vshll.u32 %v5012_v19, 16  ;;  %v5154_v0 = vshll.u32 %v5013_v7, 16  ;;  %v5016_v38 = vld [vmem:[#allocation3 + $0x58] sm:$0xf] }
 0x192   : > { %v10996_v6 = vpop.f32.mrf.mxu0  ;;  %9373 = vmatmul.mubr.bf16.gmra.mxu0 %v9670_v26  ;;  %v5014_v26 = vld [vmem:[#allocation3 + $0x50] sm:$0x1]  ;;  %v5143_v53 = vsel %vm10186_vm14, %v5138_v14, %v5142_v42  ;;  %v5147_v31 = vrot.slane %v5145_v56, 4  ;;  %v5158_v41 = vshrl.u32 %v5013_v7, 16  ;;  %v8624_v19 = vrot.slane %v5829_v8, 9 }
 0x193   : > { %v11009_v20 = vpop.f32.mrf.mxu1  ;;  %9376 = vmatprep.mubr.bf16.mxu0 %v9673_v59  ;;  %v11026_v59 = vadd.f32 %v10921_v10, %v2036_v23  ;;  %v8599_v48 = vcombine.low %v5133_v58, %v5143_v53  ;;  %v5150_v17 = vrot.slane %v5148_v12, 5  ;;  %v5164_v25 = vshll.u32 %v5014_v26, 16  ;;  %v5015_v10 = vld [vmem:[#allocation3 + $0x54] sm:$0xf]  ;;  %v5017_v26 = vld [vmem:[#allocation3 + $0x5c] sm:$0x1] }
 0x194   : > { %v11016_v18 = vpop.f32.mrf.mxu0  ;;  %v5156_v63 = vrot.slane %v5154_v0, 5  ;;  %v5943_v55 = vrot.slane %v5830_v9, 5  ;;  %v5946_v44 = vrot.slane %v5831_v3, 5  ;;  %v5160_v14 = vrot.slane %v5158_v41, 4  ;;  %v5832_v0 = vld [vmem:[#allocation3 + $0x54] sm:$0xe] }
 0x195   : > { %v11032_v36 = vpop.f32.mrf.mxu1  ;;  %v5151_v42 = vor.u32 %v5150_v17, %v5147_v31  ;;  %v5166_v56 = vrot.slane %v5164_v25, 5  ;;  %v2041_v62 = vadd.f32 %v10939_v24, %v10722_v32  ;;  %v5169_v8 = vshrl.u32 %v5015_v10, 16  ;;  %v5833_v32 = vld [vmem:[#allocation3 + $0x58] sm:$0xf] }
 0x196   : > { %v11034_v23 = vpop.f32.mrf.mxu0  ;;  %9397 = vmatmul.mubr.bf16.vlgmr.msra.gmra.mxu1 %v10969_v11  ;;  %v11041_v7 = vsel %vm10179_vm13, %v8624_v19, %v5943_v55  ;;  %v5945_v58 = vrot.slane %v5943_v55, 4  ;;  %v5172_v12 = vshll.u32 %v5015_v10, 16  ;;  %v5161_v11 = vor.u32 %v5160_v14, %v5156_v63 }
 0x197   : > { %9400 = vmatprep.mubr.bf16.mxu1 %v8598_v1  ;;  %v11043_v9 = vpop.f32.mrf.mxu1  ;;  %v5152_v3 = vrot.slane %v5151_v42, 4  ;;  %v11046_v53 = vadd.f32 %v10929_v29, %v2041_v62  ;;  %v5178_v31 = vshll.u32 %v5016_v38, 16  ;;  %v12066_v24 = vcombine.low %v10927_v21, %v10933_v4 }
 0x198   : > { %v11053_v1 = vsel %vm10179_vm13, %v5945_v58, %v5946_v44  ;;  %v5171_v17 = vrot.slane %v5169_v8, 4  ;;  %v5174_v41 = vrot.slane %v5172_v12, 5  ;;  %v5182_v25 = vshrl.u32 %v5016_v38, 16  ;;  %v11055_v10 = vpop.f32.mrf.mxu0 }
 0x199   : > { %v5157_v29 = vsel %vm10186_vm14, %v5152_v3, %v5156_v63  ;;  %v5162_v62 = vrot.slane %v5161_v11, 4  ;;  %v5180_v55 = vrot.slane %v5178_v31, 5  ;;  %v5188_v42 = vshll.u32 %v5017_v26, 16  ;;  %v11061_v44 = vpop.f32.mrf.mxu1  ;;  %v5018_v63 = vld [vmem:[#allocation3 + $0x60] sm:$0xf] }
 0x19a   : > { %9377 = vmatmul.mubr.bf16.gmra.mxu0 %v9674_v39  ;;  %v5834_v39 = vld [vmem:[#allocation3 + $0x5c] sm:$0x1]  ;;  %v5175_v21 = vor.u32 %v5174_v41, %v5171_v17  ;;  %v5184_v4 = vrot.slane %v5182_v25, 4  ;;  %v8625_v14 = vrot.slane %v5832_v0, 9  ;;  %v5950_v58 = vrot.slane %v5833_v32, 5 }
 0x19b   : > { %9444 = vmatprep.mubr.bf16.mxu0 %v12066_v24  ;;  %v5167_v38 = vsel %vm10186_vm14, %v5162_v62, %v5166_v56  ;;  %v5953_v8 = vrot.slane %v5834_v39, 5  ;;  %v2039_v12 = vadd.f32 %v10951_v61, %v10730_v35  ;;  %v5190_v19 = vrot.slane %v5188_v42, 5  ;;  %v5019_v31 = vld [vmem:[#allocation3 + $0x64] sm:$0xf]  ;;  %v5835_v39 = vld [vmem:[#allocation3 + $0x60] sm:$0xe] }
 0x19c   : > { %v8600_v3 = vcombine.low %v5157_v29, %v5167_v38  ;;  %v5176_v11 = vrot.slane %v5175_v21, 4  ;;  %v5185_v24 = vor.u32 %v5184_v4, %v5180_v55  ;;  %v11071_v26 = vsel %vm10179_vm13, %v8625_v14, %v5950_v58  ;;  %v5837_v21 = vld [vmem:[#allocation3 + $0x68] sm:$0x1] }
 0x19d   : > { %v5952_v0 = vrot.slane %v5950_v58, 4  ;;  %v11074_v56 = vadd.f32 %v10943_v50, %v2039_v12  ;;  %v2042_v35 = vadd.f32 %v10973_v30, %v10738_v22  ;;  %v2040_v41 = vadd.f32 %v10987_v37, %v10746_v15  ;;  %v5836_v37 = vld [vmem:[#allocation3 + $0x64] sm:$0xf] }
 0x19e   : > { %9401 = vmatmul.mubr.bf16.gmra.mxu1 %v8599_v48  ;;  %v5181_v61 = vsel %vm10186_vm14, %v5176_v11, %v5180_v55  ;;  %v5186_v32 = vrot.slane %v5185_v24, 4  ;;  %v5020_v48 = vld [vmem:[#allocation3 + $0x68] sm:$0x1]  ;;  %v5193_v25 = vshrl.u32 %v5018_v63, 16  ;;  %v12067_v50 = vcombine.low %v10949_v27, %v10962_v34 }
 0x19f   : > { %9404 = vmatprep.mubr.bf16.mxu1 %v8600_v3  ;;  %v11091_v22 = vsel %vm10179_vm13, %v5952_v0, %v5953_v8  ;;  %v11094_v30 = vadd.f32 %v10964_v40, %v2042_v35  ;;  %v5196_v55 = vshll.u32 %v5018_v63, 16  ;;  %v5202_v15 = vshll.u32 %v5019_v31, 16  ;;  %v5021_v40 = vld [vmem:[#allocation3 + $0x6c] sm:$0xf]  ;;  %v5022_v0 = vld [vmem:[#allocation3 + $0x70] sm:$0xf] }
 0x1a0   : > { %v5191_v4 = vsel %vm10186_vm14, %v5186_v32, %v5190_v19  ;;  %v8641_v27 = vcombine.low %v11071_v26, %v11091_v22  ;;  %v11104_v34 = vadd.f32 %v10979_v5, %v2040_v41  ;;  %v5195_v42 = vrot.slane %v5193_v25, 4 }
 0x1a1   : > { %v11067_v17 = vpop.f32.mrf.mxu0  ;;  %v8601_v58 = vcombine.low %v5181_v61, %v5191_v4  ;;  %v5198_v8 = vrot.slane %v5196_v55, 5  ;;  %v5204_v12 = vrot.slane %v5202_v15, 5  ;;  %v5206_v46 = vshrl.u32 %v5019_v31, 16  ;;  %v5023_v31 = vld [vmem:[#allocation3 + $0x74] sm:$0x1] }
 0x1a2   : > { %v11082_v29 = vpop.f32.mrf.mxu1  ;;  %9445 = vmatmul.mubr.bf16.vlgmr.msra.gmra.mxu0 %v12067_v50  ;;  %v5212_v16 = vshll.u32 %v5020_v48, 16  ;;  %v5957_v63 = vrot.slane %v5836_v37, 5  ;;  %v5960_v19 = vrot.slane %v5837_v21, 5  ;;  %v2045_v5 = vadd.f32 %v11009_v20, %v10756_v60  ;;  %v5838_v60 = vld [vmem:[#allocation3 + $0x6c] sm:$0xe] }
 0x1a3   : > { %v11084_v62 = vpop.f32.mrf.mxu0  ;;  %9448 = vmatprep.mubr.bf16.mxu0 %v8638_v52  ;;  %v8626_v52 = vrot.slane %v5835_v39, 9  ;;  %v5199_v11 = vor.u32 %v5198_v8, %v5195_v42  ;;  %v5208_v24 = vrot.slane %v5206_v46, 4  ;;  %v5217_v35 = vshrl.u32 %v5021_v40, 16  ;;  %v5839_v20 = vld [vmem:[#allocation3 + $0x70] sm:$0xf] }
 0x1a4   : > { %v11106_v14 = vpop.f32.mrf.mxu1  ;;  %v5214_v32 = vrot.slane %v5212_v16, 5  ;;  %v5959_v41 = vrot.slane %v5957_v63, 4  ;;  %v5220_v48 = vshll.u32 %v5021_v40, 16  ;;  %v11121_v55 = vadd.f32 %v10996_v6, %v2045_v5  ;;  %v5840_v8 = vld [vmem:[#allocation3 + $0x74] sm:$0x1] }
 0x1a5   : > { %v11108_v38 = vpop.f32.mrf.mxu0  ;;  %v11116_v61 = vsel %vm10179_vm13, %v8626_v52, %v5957_v63  ;;  %v5200_v39 = vrot.slane %v5199_v11, 4  ;;  %v5209_v50 = vor.u32 %v5208_v24, %v5204_v12  ;;  %v5219_v15 = vrot.slane %v5217_v35, 4 }
 0x1a6   : > { %v11110_v3 = vpop.f32.mrf.mxu1  ;;  %9405 = vmatmul.mubr.bf16.gmra.mxu1 %v8601_v58  ;;  %v5961_v37 = vsel %vm10179_vm13, %v5959_v41, %v5960_v19  ;;  %v5222_v21 = vrot.slane %v5220_v48, 5  ;;  %v5226_v4 = vshll.u32 %v5022_v0, 16  ;;  %v5230_v42 = vshrl.u32 %v5022_v0, 16  ;;  %v5024_v41 = vld [vmem:[#allocation3 + $0x78] sm:$0xf] }
 0x1a7   : > { %v11118_v25 = vpop.f32.mrf.mxu0  ;;  %v12068_v40 = vcombine.low %v11003_v2, %v11020_v45  ;;  %v5205_v6 = vsel %vm10186_vm14, %v5200_v39, %v5204_v12  ;;  %v5210_v58 = vrot.slane %v5209_v50, 4  ;;  %v8642_v16 = vcombine.low %v11116_v61, %v5961_v37 }
 0x1a8   : > { %v11125_v46 = vpop.f32.mrf.mxu1  ;;  %v5236_v52 = vshll.u32 %v5023_v31, 16  ;;  %v12069_v63 = vcombine.low %v11041_v7, %v11053_v1  ;;  %v5223_v19 = vor.u32 %v5222_v21, %v5219_v15  ;;  %v5228_v11 = vrot.slane %v5226_v4, 5  ;;  %v5026_v21 = vld [vmem:[#allocation3 + $0x80] sm:$0x1] }
 0x1a9   : > { %v5232_v24 = vrot.slane %v5230_v42, 4  ;;  %v8627_v5 = vrot.slane %v5838_v60, 9  ;;  %v5215_v2 = vsel %vm10186_vm14, %v5210_v58, %v5214_v32  ;;  %v5964_v35 = vrot.slane %v5839_v20, 5  ;;  %v5025_v20 = vld [vmem:[#allocation3 + $0x7c] sm:$0xf] }
 0x1aa   : > { %9449 = vmatmul.mubr.bf16.gmra.mxu0 %v12068_v40  ;;  %v5238_v45 = vrot.slane %v5236_v52, 5  ;;  %v5967_v12 = vrot.slane %v5840_v8, 5  ;;  %v8602_v48 = vcombine.low %v5205_v6, %v5215_v2  ;;  %v5224_v61 = vrot.slane %v5223_v19, 4  ;;  %v5841_v42 = vld [vmem:[#allocation3 + $0x78] sm:$0xe] }
 0x1ab   : > { %9452 = vmatprep.mubr.bf16.mxu0 %v12069_v63  ;;  %v5233_v31 = vor.u32 %v5232_v24, %v5228_v11  ;;  %v2043_v7 = vadd.f32 %v11032_v36, %v10762_v47  ;;  %v11148_v50 = vsel %vm10179_vm13, %v8627_v5, %v5964_v35  ;;  %v5966_v15 = vrot.slane %v5964_v35, 4  ;;  %v5842_v6 = vld [vmem:[#allocation3 + $0x7c] sm:$0xf]  ;;  %v5027_v2 = vld [vmem:[#allocation3 + $0x84] sm:$0xf] }
 0x1ac   : > { %v2046_v32 = vadd.f32 %v11043_v9, %v10769_v54  ;;  %v2044_v60 = vadd.f32 %v11061_v44, %v10781_v13  ;;  %9408 = vmatprep.mubr.bf16.mxu1 %v8602_v48  ;;  %v5229_v47 = vsel %vm10186_vm14, %v5224_v61, %v5228_v11  ;;  %v5241_v4 = vshrl.u32 %v5024_v41, 16  ;;  %v5028_v61 = vld [vmem:[#allocation3 + $0x88] sm:$0xf] }
 0x1ad   : > { %v5234_v36 = vrot.slane %v5233_v31, 4  ;;  %v11157_v37 = vadd.f32 %v11016_v18, %v2043_v7  ;;  %v5968_v54 = vsel %vm10179_vm13, %v5966_v15, %v5967_v12  ;;  %v5244_v44 = vshll.u32 %v5024_v41, 16  ;;  %v5843_v18 = vld [vmem:[#allocation3 + $0x80] sm:$0x1] }
 0x1ae   : > { %v11166_v13 = vadd.f32 %v11034_v23, %v2046_v32  ;;  %v11169_v9 = vadd.f32 %v11055_v10, %v2044_v60  ;;  %v8643_v52 = vcombine.low %v11148_v50, %v5968_v54  ;;  %v5243_v63 = vrot.slane %v5241_v4, 4  ;;  %v5029_v32 = vld [vmem:[#allocation3 + $0x8c] sm:$0x1]  ;;  %v5844_v4 = vld [vmem:[#allocation3 + $0x84] sm:$0xe] }
 0x1af   : > { %v11136_v0 = vpop.f32.mrf.mxu0  ;;  %12070 = vst [vmem:[#allocation33_spill] sm:$0xff] %v11157_v37  ;;  %v5239_v58 = vsel %vm10186_vm14, %v5234_v36, %v5238_v45  ;;  %v5250_v19 = vshll.u32 %v5025_v20, 16  ;;  %v5246_v24 = vrot.slane %v5244_v44, 5  ;;  %v5254_v10 = vshrl.u32 %v5025_v20, 16  ;;  %v12099_v37 = vld [vmem:[#allocation26_spill] sm:$0xff] }
 0x1b0   : > { %v11142_v1 = vpop.f32.mrf.mxu1  ;;  %12071 = vst [vmem:[#allocation34_spill] sm:$0xff] %v11166_v13  ;;  %12072 = vst [vmem:[#allocation35_spill] sm:$0xff] %v11169_v9  ;;  %v8603_v23 = vcombine.low %v5229_v47, %v5239_v58  ;;  %v5260_v5 = vshll.u32 %v5026_v21, 16  ;;  %v8628_v45 = vrot.slane %v5841_v42, 9  ;;  %v5971_v41 = vrot.slane %v5842_v6, 5 }
 0x1b1   : > { %v11144_v39 = vpop.f32.mrf.mxu0  ;;  %v5252_v12 = vrot.slane %v5250_v19, 5  ;;  %v5974_v48 = vrot.slane %v5843_v18, 5  ;;  %v5247_v31 = vor.u32 %v5246_v24, %v5243_v63  ;;  %v5256_v7 = vrot.slane %v5254_v10, 4  ;;  %v5845_v42 = vld [vmem:[#allocation3 + $0x88] sm:$0xf] }
 0x1b2   : > { %v11159_v8 = vpop.f32.mrf.mxu1  ;;  %9453 = vmatmul.mubr.bf16.gmra.mxu0 %v8641_v27  ;;  %9409 = vmatmul.mubr.bf16.gmra.mxu1 %v8603_v23  ;;  %v5262_v50 = vrot.slane %v5260_v5, 5  ;;  %v2049_v26 = vadd.f32 %v11082_v29, %v10657_v51  ;;  %v5972_v27 = vsel %vm10179_vm13, %v8628_v45, %v5971_v41  ;;  %v5973_v15 = vrot.slane %v5971_v41, 4  ;;  %v5846_v18 = vld [vmem:[#allocation3 + $0x8c] sm:$0x1] }
 0x1b3   : > { %v11161_v40 = vpop.f32.mrf.mxu0  ;;  %9456 = vmatprep.mubr.bf16.mxu0 %v8642_v16  ;;  %v5265_v16 = vshrl.u32 %v5027_v2, 16  ;;  %v5268_v60 = vshll.u32 %v5027_v2, 16  ;;  %v5248_v20 = vrot.slane %v5247_v31, 4  ;;  %v5257_v47 = vor.u32 %v5256_v7, %v5252_v12  ;;  %v5030_v31 = vld [vmem:[#allocation3 + $0x90] sm:$0xf] }
 0x1b4   : > { %v11174_v11 = vpop.f32.mrf.mxu1  ;;  %v11188_v36 = vadd.f32 %v11067_v17, %v2049_v26  ;;  %v5274_v21 = vshll.u32 %v5028_v61, 16  ;;  %v5975_v51 = vsel %vm10179_vm13, %v5973_v15, %v5974_v48  ;;  %v5278_v6 = vshrl.u32 %v5028_v61, 16 }
 0x1b5   : > { %v11179_v35 = vpop.f32.mrf.mxu0  ;;  %v5267_v29 = vrot.slane %v5265_v16, 4  ;;  %v5270_v44 = vrot.slane %v5268_v60, 5  ;;  %v5253_v58 = vsel %vm10186_vm14, %v5248_v20, %v5252_v12  ;;  %v5258_v63 = vrot.slane %v5257_v47, 4  ;;  %v5031_v16 = vld [vmem:[#allocation3 + $0x94] sm:$0xf]  ;;  %v12075_v20 = vld [vmem:[#allocation14_spill] sm:$0xff] }
 0x1b6   : > { %v11183_v22 = vpop.f32.mrf.mxu1  ;;  %12073 = vst [vmem:[#allocation36_spill] sm:$0xff] %v11188_v36  ;;  %v8644_v19 = vcombine.low %v5972_v27, %v5975_v51  ;;  %v5276_v23 = vrot.slane %v5274_v21, 5  ;;  %v5280_v10 = vrot.slane %v5278_v6, 4  ;;  %v5284_v5 = vshll.u32 %v5029_v32, 16  ;;  %v12076_v21 = vld [vmem:[#allocation15_spill] sm:$0xff] }
 0x1b7   : > { %v5271_v24 = vor.u32 %v5270_v44, %v5267_v29  ;;  %v8629_v2 = vrot.slane %v5844_v4, 9  ;;  %v5263_v41 = vsel %vm10186_vm14, %v5258_v63, %v5262_v50  ;;  %v5978_v48 = vrot.slane %v5845_v42, 5  ;;  %v5032_v42 = vld [vmem:[#allocation3 + $0x98] sm:$0x1]  ;;  %v5847_v29 = vld [vmem:[#allocation3 + $0x90] sm:$0xe] }
 0x1b8   : > { %v11190_v54 = vpop.f32.mrf.mxu0  ;;  %v5981_v61 = vrot.slane %v5846_v18, 5  ;;  %v2047_v12 = vadd.f32 %v11106_v14, %v10663_v28  ;;  %v8604_v7 = vcombine.low %v5253_v58, %v5263_v41  ;;  %v5281_v27 = vor.u32 %v5280_v10, %v5276_v23  ;;  %v5848_v58 = vld [vmem:[#allocation3 + $0x94] sm:$0xf]  ;;  %v5849_v63 = vld [vmem:[#allocation3 + $0x98] sm:$0x1] }
 0x1b9   : > { %v11196_v17 = vpop.f32.mrf.mxu1  ;;  %v5272_v26 = vrot.slane %v5271_v24, 4  ;;  %v5286_v15 = vrot.slane %v5284_v5, 5  ;;  %v5980_v60 = vrot.slane %v5978_v48, 4  ;;  %v2050_v47 = vadd.f32 %v11110_v3, %v12075_v20  ;;  %v5033_v10 = vld [vmem:[#allocation3 + $0x9c] sm:$0xf] }
 0x1ba   : > { %v11198_v45 = vpop.f32.mrf.mxu0  ;;  %9457 = vmatmul.mubr.bf16.gmra.mxu0 %v8643_v52  ;;  %v5979_v52 = vsel %vm10179_vm13, %v8629_v2, %v5978_v48  ;;  %v11209_v50 = vadd.f32 %v11084_v62, %v2047_v12  ;;  %9412 = vmatprep.mubr.bf16.mxu1 %v8604_v7  ;;  %v5282_v14 = vrot.slane %v5281_v27, 4  ;;  %v2048_v4 = vadd.f32 %v11125_v46, %v12076_v21 }
 0x1bb   : > { %9460 = vmatprep.mubr.bf16.mxu0 %v8644_v19  ;;  %v11204_v32 = vpop.f32.mrf.mxu1  ;;  %v5277_v28 = vsel %vm10186_vm14, %v5272_v26, %v5276_v23  ;;  %v5289_v51 = vshrl.u32 %v5030_v31, 16  ;;  %v5982_v62 = vsel %vm10179_vm13, %v5980_v60, %v5981_v61  ;;  %v11222_v6 = vadd.f32 %v11108_v38, %v2050_v47  ;;  %v5034_v60 = vld [vmem:[#allocation3 + $0xa0] sm:$0xf] }
 0x1bc   : > { %12074 = vst [vmem:[#allocation37_spill] sm:$0xff] %v11209_v50  ;;  %v11217_v44 = vpop.f32.mrf.mxu0  ;;  %v5292_v3 = vshll.u32 %v5030_v31, 16  ;;  %v5298_v18 = vshll.u32 %v5031_v16, 16  ;;  %v5287_v19 = vsel %vm10186_vm14, %v5282_v14, %v5286_v15  ;;  %v8645_v23 = vcombine.low %v5979_v52, %v5982_v62  ;;  %v5035_v14 = vld [vmem:[#allocation3 + $0xa4] sm:$0x1] }
 0x1bd   : > { %12077 = vst [vmem:[#allocation14_spill] sm:$0xff] %v11222_v6  ;;  %v11227_v46 = vadd.f32 %v11118_v25, %v2048_v4  ;;  %v5291_v24 = vrot.slane %v5289_v51, 4  ;;  %v11229_v5 = vpop.f32.mrf.mxu1  ;;  %v8605_v2 = vcombine.low %v5277_v28, %v5287_v19  ;;  %v5302_v38 = vshrl.u32 %v5031_v16, 16  ;;  %v12079_v25 = vld [vmem:[#allocation16_spill] sm:$0xff] }
 0x1be   : > { %v5294_v41 = vrot.slane %v5292_v3, 5  ;;  %v5300_v48 = vrot.slane %v5298_v18, 5  ;;  %v5308_v61 = vshll.u32 %v5032_v42, 16  ;;  %v8630_v12 = vrot.slane %v5847_v29, 9  ;;  %v11231_v26 = vpop.f32.mrf.mxu0  ;;  %v5850_v3 = vld [vmem:[#allocation3 + $0x9c] sm:$0xe] }
 0x1bf   : > { %12078 = vst [vmem:[#allocation15_spill] sm:$0xff] %v11227_v46  ;;  %v5985_v31 = vrot.slane %v5848_v58, 5  ;;  %v5988_v7 = vrot.slane %v5849_v63, 5  ;;  %9413 = vmatmul.mubr.bf16.gmra.mxu1 %v8605_v2  ;;  %v5304_v15 = vrot.slane %v5302_v38, 4  ;;  %v2053_v52 = vadd.f32 %v11142_v1, %v12079_v25  ;;  %v11237_v4 = vpop.f32.mrf.mxu1  ;;  %v5851_v18 = vld [vmem:[#allocation3 + $0xa0] sm:$0xf] }
 0x1c0   : > { %v5295_v27 = vor.u32 %v5294_v41, %v5291_v24  ;;  %v5313_v20 = vshrl.u32 %v5033_v10, 16  ;;  %v5310_v47 = vrot.slane %v5308_v61, 5  ;;  %v5316_v21 = vshll.u32 %v5033_v10, 16 }
 0x1c1   : > { %v5986_v28 = vsel %vm10179_vm13, %v8630_v12, %v5985_v31  ;;  %v5987_v16 = vrot.slane %v5985_v31, 4  ;;  %v5305_v51 = vor.u32 %v5304_v15, %v5300_v48  ;;  %v11240_v29 = vadd.f32 %v11136_v0, %v2053_v52 }
 0x1c2   : > { %9461 = vmatmul.mubr.bf16.gmra.mxu0 %v8645_v23  ;;  %v5296_v42 = vrot.slane %v5295_v27, 4  ;;  %v5315_v62 = vrot.slane %v5313_v20, 4  ;;  %v5318_v58 = vrot.slane %v5316_v21, 5  ;;  %v5322_v63 = vshll.u32 %v5034_v60, 16  ;;  %v5852_v23 = vld [vmem:[#allocation3 + $0xa4] sm:$0x1] }
 0x1c3   : > { %12080 = vst [vmem:[#allocation16_spill] sm:$0xff] %v11240_v29  ;;  %v5989_v1 = vsel %vm10179_vm13, %v5987_v16, %v5988_v7  ;;  %v5326_v19 = vshrl.u32 %v5034_v60, 16  ;;  %v5306_v2 = vrot.slane %v5305_v51, 4  ;;  %v5332_v38 = vshll.u32 %v5035_v14, 16  ;;  %v5036_v20 = vld [vmem:[#allocation3 + $0xa8] sm:$0xf] }
 0x1c4   : > { %v5301_v10 = vsel %vm10186_vm14, %v5296_v42, %v5300_v48  ;;  %v8646_v41 = vcombine.low %v5986_v28, %v5989_v1  ;;  %v5319_v0 = vor.u32 %v5318_v58, %v5315_v62  ;;  %v5324_v61 = vrot.slane %v5322_v63, 5  ;;  %v12081_v14 = vld [vmem:[#allocation17_spill] sm:$0xff]  ;;  %v5037_v63 = vld [vmem:[#allocation3 + $0xac] sm:$0xf] }
 0x1c5   : > { %v5328_v12 = vrot.slane %v5326_v19, 4  ;;  %v8631_v31 = vrot.slane %v5850_v3, 9  ;;  %v5311_v7 = vsel %vm10186_vm14, %v5306_v2, %v5310_v47  ;;  %v5334_v25 = vrot.slane %v5332_v38, 5  ;;  %v12082_v47 = vld [vmem:[#allocation18_spill] sm:$0xff] }
 0x1c6   : > { %9464 = vmatprep.mubr.bf16.mxu0 %v8646_v41  ;;  %v5992_v52 = vrot.slane %v5851_v18, 5  ;;  %v5995_v60 = vrot.slane %v5852_v23, 5  ;;  %v8606_v48 = vcombine.low %v5301_v10, %v5311_v7  ;;  %v5320_v16 = vrot.slane %v5319_v0, 4  ;;  %v12083_v18 = vld [vmem:[#allocation19_spill] sm:$0xff]  ;;  %v5038_v10 = vld [vmem:[#allocation3 + $0xb0] sm:$0x1] }
 0x1c7   : > { %v11244_v24 = vpop.f32.mrf.mxu0  ;;  %v5329_v28 = vor.u32 %v5328_v12, %v5324_v61  ;;  %v2051_v21 = vadd.f32 %v11159_v8, %v12081_v14  ;;  %v2054_v1 = vadd.f32 %v11174_v11, %v12082_v47  ;;  %v2052_v58 = vadd.f32 %v11183_v22, %v12083_v18  ;;  %v5853_v41 = vld [vmem:[#allocation3 + $0xa8] sm:$0xe]  ;;  %v5039_v47 = vld [vmem:[#allocation3 + $0xb4] sm:$0xf] }
 0x1c8   : > { %v11248_v27 = vpop.f32.mrf.mxu1  ;;  %v5993_v62 = vsel %vm10179_vm13, %v8631_v31, %v5992_v52  ;;  %v5994_v3 = vrot.slane %v5992_v52, 4  ;;  %9416 = vmatprep.mubr.bf16.mxu1 %v8606_v48  ;;  %v5325_v19 = vsel %vm10186_vm14, %v5320_v16, %v5324_v61  ;;  %v5337_v2 = vshrl.u32 %v5036_v20, 16  ;;  %v5854_v31 = vld [vmem:[#allocation3 + $0xac] sm:$0xf] }
 0x1c9   : > { %v11250_v15 = vpop.f32.mrf.mxu0  ;;  %v5330_v8 = vrot.slane %v5329_v28, 4  ;;  %v11269_v23 = vadd.f32 %v11144_v39, %v2051_v21  ;;  %v11278_v22 = vadd.f32 %v11161_v40, %v2054_v1  ;;  %v11281_v12 = vadd.f32 %v11179_v35, %v2052_v58  ;;  %v5855_v39 = vld [vmem:[#allocation3 + $0xb0] sm:$0x1]  ;;  %v5040_v58 = vld [vmem:[#allocation3 + $0xb8] sm:$0xf] }
 0x1ca   : > { %v11256_v42 = vpop.f32.mrf.mxu1  ;;  %v5996_v11 = vsel %vm10179_vm13, %v5994_v3, %v5995_v60  ;;  %v5340_v61 = vshll.u32 %v5036_v20, 16  ;;  %v5339_v48 = vrot.slane %v5337_v2, 4  ;;  %v5346_v16 = vshll.u32 %v5037_v63, 16 }
 0x1cb   : > { %v11258_v51 = vpop.f32.mrf.mxu0  ;;  %12084 = vst [vmem:[#allocation17_spill] sm:$0xff] %v11269_v23  ;;  %12085 = vst [vmem:[#allocation18_spill] sm:$0xff] %v11278_v22  ;;  %v5335_v7 = vsel %vm10186_vm14, %v5330_v8, %v5334_v25  ;;  %v8647_v52 = vcombine.low %v5993_v62, %v5996_v11  ;;  %v5350_v40 = vshrl.u32 %v5037_v63, 16  ;;  %v5356_v3 = vshll.u32 %v5038_v10, 16  ;;  %v12087_v11 = vld [vmem:[#allocation20_spill] sm:$0xff] }
 0x1cc   : > { %v11271_v38 = vpop.f32.mrf.mxu1  ;;  %12086 = vst [vmem:[#allocation19_spill] sm:$0xff] %v11281_v12  ;;  %v8607_v60 = vcombine.low %v5325_v19, %v5335_v7  ;;  %v5342_v21 = vrot.slane %v5340_v61, 5  ;;  %v5348_v35 = vrot.slane %v5346_v16, 5  ;;  %v8632_v20 = vrot.slane %v5853_v41, 9  ;;  %v5041_v61 = vld [vmem:[#allocation3 + $0xbc] sm:$0x1] }
 0x1cd   : > { %v11273_v0 = vpop.f32.mrf.mxu0  ;;  %9465 = vmatmul.mubr.bf16.gmra.mxu0 %v8647_v52  ;;  %v5999_v1 = vrot.slane %v5854_v31, 5  ;;  %v6002_v18 = vrot.slane %v5855_v39, 5  ;;  %v5352_v8 = vrot.slane %v5350_v40, 4  ;;  %v5358_v2 = vrot.slane %v5356_v3, 5  ;;  %v5857_v40 = vld [vmem:[#allocation3 + $0xb8] sm:$0xf] }
 0x1ce   : > { %v11285_v28 = vpop.f32.mrf.mxu1  ;;  %9417 = vmatmul.mubr.bf16.gmra.mxu1 %v8607_v60  ;;  %v5343_v62 = vor.u32 %v5342_v21, %v5339_v48  ;;  %v2057_v19 = vadd.f32 %v11196_v17, %v12087_v11  ;;  %v5361_v41 = vshrl.u32 %v5039_v47, 16  ;;  %v5364_v31 = vshll.u32 %v5039_v47, 16  ;;  %v5856_v21 = vld [vmem:[#allocation3 + $0xb4] sm:$0xe]  ;;  %v5858_v11 = vld [vmem:[#allocation3 + $0xbc] sm:$0x1] }
 0x1cf   : > { %v11287_v14 = vpop.f32.mrf.mxu0  ;;  %v6000_v63 = vsel %vm10179_vm13, %v8632_v20, %v5999_v1  ;;  %v6001_v10 = vrot.slane %v5999_v1, 4  ;;  %v5353_v16 = vor.u32 %v5352_v8, %v5348_v35  ;;  %v5370_v60 = vshll.u32 %v5040_v58, 16 }
 0x1d0   : > { %v11289_v12 = vpop.f32.mrf.mxu1  ;;  %v5344_v52 = vrot.slane %v5343_v62, 4  ;;  %v11302_v48 = vadd.f32 %v11190_v54, %v2057_v19  ;;  %v5363_v3 = vrot.slane %v5361_v41, 4  ;;  %v5366_v20 = vrot.slane %v5364_v31, 5  ;;  %v12089_v31 = vld [vmem:[#allocation21_spill] sm:$0xff] }
 0x1d1   : > { %v11291_v25 = vpop.f32.mrf.mxu0  ;;  %v6003_v17 = vsel %vm10179_vm13, %v6001_v10, %v6002_v18  ;;  %v5374_v1 = vshrl.u32 %v5040_v58, 16  ;;  %v5354_v8 = vrot.slane %v5353_v16, 4  ;;  %v5372_v19 = vrot.slane %v5370_v60, 5 }
 0x1d2   : > { %v11297_v39 = vpop.f32.mrf.mxu1  ;;  %12088 = vst [vmem:[#allocation20_spill] sm:$0xff] %v11302_v48  ;;  %v5349_v62 = vsel %vm10186_vm14, %v5344_v52, %v5348_v35  ;;  %v8648_v54 = vcombine.low %v6000_v63, %v6003_v17  ;;  %v5367_v48 = vor.u32 %v5366_v20, %v5363_v3  ;;  %v5380_v29 = vshll.u32 %v5041_v61, 16  ;;  %v5042_v52 = vld [vmem:[#allocation3 + $0xc0] sm:$0xf]  ;;  %v5043_v61 = vld [vmem:[#allocation3 + $0xc4] sm:$0xf] }
 0x1d3   : > { %v11299_v7 = vpop.f32.mrf.mxu0  ;;  %v5376_v23 = vrot.slane %v5374_v1, 4  ;;  %v8633_v46 = vrot.slane %v5856_v21, 9  ;;  %v5359_v58 = vsel %vm10186_vm14, %v5354_v8, %v5358_v2  ;;  %v6006_v10 = vrot.slane %v5857_v40, 5  ;;  %v12091_v1 = vld [vmem:[#allocation22_spill] sm:$0xff] }
 0x1d4   : > { %v11306_v47 = vpop.f32.mrf.mxu1  ;;  %9468 = vmatprep.mubr.bf16.mxu0 %v8648_v54  ;;  %v6009_v41 = vrot.slane %v5858_v11, 5  ;;  %v2055_v35 = vadd.f32 %v11204_v32, %v12089_v31  ;;  %v8608_v63 = vcombine.low %v5349_v62, %v5359_v58  ;;  %v5368_v16 = vrot.slane %v5367_v48, 4  ;;  %v12092_v48 = vld [vmem:[#allocation23_spill] sm:$0xff]  ;;  %v5859_v54 = vld [vmem:[#allocation3 + $0xc0] sm:$0xe] }
 0x1d5   : > { %v11308_v22 = vpop.f32.mrf.mxu0  ;;  %v5377_v60 = vor.u32 %v5376_v23, %v5372_v19  ;;  %v5382_v17 = vrot.slane %v5380_v29, 5  ;;  %v6007_v20 = vsel %vm10179_vm13, %v8633_v46, %v6006_v10  ;;  %v6008_v2 = vrot.slane %v6006_v10, 4  ;;  %v5044_v62 = vld [vmem:[#allocation3 + $0xc8] sm:$0x1] }
 0x1d6   : > { %v11312_v6 = vpop.f32.mrf.mxu1  ;;  %v11327_v40 = vadd.f32 %v11198_v45, %v2055_v35  ;;  %v2058_v32 = vadd.f32 %v11229_v5, %v12091_v1  ;;  %9420 = vmatprep.mubr.bf16.mxu1 %v8608_v63  ;;  %v5373_v23 = vsel %vm10186_vm14, %v5368_v16, %v5372_v19  ;;  %v2056_v11 = vadd.f32 %v11237_v4, %v12092_v48  ;;  %v5860_v19 = vld [vmem:[#allocation3 + $0xc4] sm:$0xf]  ;;  %v5861_v35 = vld [vmem:[#allocation3 + $0xc8] sm:$0x1]  ;;  %v322_v1 = vld [vmem:[#allocation3 + $0xd4] sm:$0x1] }
 0x1d7   : > { %v11314_v18 = vpop.f32.mrf.mxu0  ;;  %v5378_v29 = vrot.slane %v5377_v60, 4  ;;  %v5385_v8 = vshrl.u32 %v5042_v52, 16  ;;  %v6010_v45 = vsel %vm10179_vm13, %v6008_v2, %v6009_v41  ;;  %v5388_v10 = vshll.u32 %v5042_v52, 16 }
 0x1d8   : > { %v11320_v21 = vpop.f32.mrf.mxu1  ;;  %12090 = vst [vmem:[#allocation21_spill] sm:$0xff] %v11327_v40  ;;  %v11342_v5 = vadd.f32 %v11217_v44, %v2058_v32  ;;  %v5394_v31 = vshll.u32 %v5043_v61, 16  ;;  %v8649_v63 = vcombine.low %v6007_v20, %v6010_v45  ;;  %v11347_v16 = vadd.f32 %v11231_v26, %v2056_v11  ;;  %v5045_v32 = vld [vmem:[#allocation3 + $0xcc] sm:$0xf] }
 0x1d9   : > { %v11322_v3 = vpop.f32.mrf.mxu0  ;;  %v5383_v4 = vsel %vm10186_vm14, %v5378_v29, %v5382_v17  ;;  %v5387_v60 = vrot.slane %v5385_v8, 4  ;;  %v5390_v44 = vrot.slane %v5388_v10, 5  ;;  %v5398_v52 = vshrl.u32 %v5043_v61, 16  ;;  %v12095_v8 = vld [vmem:[#allocation24_spill] sm:$0xff] }
 0x1da   : > { %v11335_v58 = vpop.f32.mrf.mxu1  ;;  %12093 = vst [vmem:[#allocation22_spill] sm:$0xff] %v11342_v5  ;;  %12094 = vst [vmem:[#allocation23_spill] sm:$0xff] %v11347_v16  ;;  %v8609_v41 = vcombine.low %v5373_v23, %v5383_v4  ;;  %v5396_v2 = vrot.slane %v5394_v31, 5  ;;  %9469 = vmatmul.mubr.bf16.gmra.mxu0 %v8649_v63  ;;  %v5404_v5 = vshll.u32 %v5044_v62, 16  ;;  %v8634_v50 = vrot.slane %v5859_v54, 9 }
 0x1db   : > { %v11337_v46 = vpop.f32.mrf.mxu0  ;;  %v6013_v36 = vrot.slane %v5860_v19, 5  ;;  %v6016_v17 = vrot.slane %v5861_v35, 5  ;;  %v5391_v29 = vor.u32 %v5390_v44, %v5387_v60  ;;  %v5400_v11 = vrot.slane %v5398_v52, 4  ;;  %v5046_v61 = vld [vmem:[#allocation3 + $0xd0] sm:$0xf] }
 0x1dc   : > { %v11349_v48 = vpop.f32.mrf.mxu1  ;;  %9421 = vmatmul.mubr.bf16.gmra.mxu1 %v8609_v41  ;;  %v2061_v45 = vadd.f32 %v11248_v27, %v12095_v8  ;;  %v323_v10 = vsel %vm9970_vm4, 0, %v322_v1  ;;  %v5406_v31 = vrot.slane %v5404_v5, 5  ;;  %v5409_v19 = vshrl.u32 %v5045_v32, 16  ;;  %v5862_v44 = vld [vmem:[#allocation3 + $0xcc] sm:$0xe] }
 0x1dd   : > { %v11351_v40 = vpop.f32.mrf.mxu0  ;;  %v6014_v62 = vsel %vm10179_vm13, %v8634_v50, %v6013_v36  ;;  %v6015_v54 = vrot.slane %v6013_v36, 4  ;;  %324 = vst [vmem:[#allocation3 + $0xd4] sm:$0x1] %v323_v10  ;;  %v5392_v63 = vrot.slane %v5391_v29, 4  ;;  %v5401_v60 = vor.u32 %v5400_v11, %v5396_v2  ;;  %v5863_v1 = vld [vmem:[#allocation3 + $0xd0] sm:$0xf] }
 0x1de   : > { %v11353_v20 = vpop.f32.mrf.mxu1  ;;  %v11368_v41 = vadd.f32 %v11244_v24, %v2061_v45  ;;  %v5412_v27 = vshll.u32 %v5045_v32, 16  ;;  %v5411_v52 = vrot.slane %v5409_v19, 4  ;;  %v5418_v50 = vshll.u32 %v5046_v61, 16 }
 0x1df   : > { %v11355_v26 = vpop.f32.mrf.mxu0  ;;  %v6017_v5 = vsel %vm10179_vm13, %v6015_v54, %v6016_v17  ;;  %v5422_v36 = vshrl.u32 %v5046_v61, 16  ;;  %v5397_v29 = vsel %vm10186_vm14, %v5392_v63, %v5396_v2  ;;  %v5402_v11 = vrot.slane %v5401_v60, 4  ;;  %v12098_v54 = vld [vmem:[#allocation25_spill] sm:$0xff] }
 0x1e0   : > { %v11363_v35 = vpop.f32.mrf.mxu1  ;;  %12097 = vst [vmem:[#allocation24_spill] sm:$0xff] %v11368_v41  ;;  %v8650_v10 = vcombine.low %v6014_v62, %v6017_v5  ;;  %v5414_v24 = vrot.slane %v5412_v27, 5  ;;  %v5420_v45 = vrot.slane %v5418_v50, 5  ;;  %v8635_v41 = vrot.slane %v5862_v44, 9 }
 0x1e1   : > { %v11365_v4 = vpop.f32.mrf.mxu0  ;;  %v5424_v32 = vrot.slane %v5422_v36, 4  ;;  %v6020_v16 = vrot.slane %v5863_v1, 5  ;;  %v5407_v17 = vsel %vm10186_vm14, %v5402_v11, %v5406_v31  ;;  %v2059_v19 = vadd.f32 %v11256_v42, %v12098_v54  ;;  %v12100_v42 = vld [vmem:[#allocation27_spill] sm:$0xff] }
 0x1e2   : > { %v11372_v8 = vpop.f32.mrf.mxu1  ;;  %9472 = vmatprep.mubr.bf16.mxu0 %v8650_v10  ;;  %v5415_v61 = vor.u32 %v5414_v24, %v5411_v52  ;;  %v2062_v2 = vadd.f32 %v11271_v38, %v12099_v37  ;;  %v8610_v62 = vcombine.low %v5397_v29, %v5407_v17  ;;  %v2060_v37 = vadd.f32 %v11285_v28, %v12100_v42 }
 0x1e3   : > { %v11374_v23 = vpop.f32.mrf.mxu0  ;;  %v5425_v63 = vor.u32 %v5424_v32, %v5420_v45  ;;  %v6021_v60 = vsel %vm10179_vm13, %v8635_v41, %v6020_v16  ;;  %v6022_v27 = vrot.slane %v6020_v16, 4  ;;  %v11389_v31 = vadd.f32 %v11250_v15, %v2059_v19  ;;  %v12101_v41 = vld [vmem:[#allocation28_spill] sm:$0xff] }
 0x1e4   : > { %v9215_v9 = vpop.f32.mrf.mxu1  ;;  %v5047_v5 = vld [vmem:[#allocation3 + $0xd4] sm:$0x1]  ;;  %v5416_v50 = vrot.slane %v5415_v61, 4  ;;  %v11392_v52 = vadd.f32 %v11258_v51, %v2062_v2  ;;  %9424 = vmatprep.mubr.bf16.mxu1 %v8610_v62  ;;  %v3078_v16 = vadd.f32 %v11289_v12, %v12101_v41  ;;  %v11401_v15 = vadd.f32 %v11273_v0, %v2060_v37  ;;  %v12102_v51 = vld [vmem:[#allocation29_spill] sm:$0xff]  ;;  %v12103_v61 = vld [vmem:[#allocation30_spill] sm:$0xff] }
 0x1e5   : > { %v11378_v13 = vpop.f32.mrf.mxu0  ;;  %v5864_v36 = vld [vmem:[#allocation3 + $0xd4] sm:$0x1]  ;;  %v5426_v38 = vrot.slane %v5425_v63, 4  ;;  %v5428_v29 = vshll.u32 %v5047_v5, 16  ;;  %v3076_v17 = vadd.f32 %v11297_v39, %v12102_v51  ;;  %v3079_v28 = vadd.f32 %v11306_v47, %v12103_v61  ;;  %v12104_v2 = vld [vmem:[#allocation31_spill] sm:$0xff]  ;;  %v12111_v51 = vld [vmem:[#allocation14_spill] sm:$0xff] }
 0x1e6   : > { %v2952_v44 = vpop.f32.mrf.mxu1  ;;  %v6023_v11 = vrot.slane %v5864_v36, 5  ;;  %v5421_v32 = vsel %vm10186_vm14, %v5416_v50, %v5420_v45  ;;  %v11410_v12 = vadd.f32 %v11287_v14, %v3078_v16  ;;  %v3077_v62 = vadd.f32 %v11312_v6, %v12104_v2  ;;  %v12105_v47 = vld [vmem:[#allocation32_spill] sm:$0xff]  ;;  %v12110_v16 = vld [vmem:[#allocation37_spill] sm:$0xff] }
 0x1e7   : > { %v9266_v1 = vpop.f32.mrf.mxu0  ;;  %v5430_v54 = vrot.slane %v5428_v29, 5  ;;  %v11415_v5 = vadd.f32 %v11291_v25, %v3076_v17  ;;  %v11418_v39 = vadd.f32 %v11299_v7, %v3079_v28  ;;  %v3082_v50 = vadd.f32 %v11320_v21, %v12105_v47 }
 0x1e8   : > { %v9218_v10 = vpop.f32.mrf.mxu1  ;;  %v6024_v19 = vsel %vm10179_vm13, %v6022_v27, %v6023_v11  ;;  %v11425_v14 = vadd.f32 %v11308_v22, %v3077_v62  ;;  %v3080_v6 = vadd.f32 %v11335_v58, %v11014_v49  ;;  %v3081_v43 = vadd.f32 %v11353_v20, %v11026_v59 }
 0x1e9   : > { %v3782_v24 = vpop.f32.mrf.mxu0  ;;  %v8651_v0 = vcombine.low %v6021_v60, %v6024_v19  ;;  %v5431_v33 = vsel %vm10186_vm14, %v5426_v38, %v5430_v54  ;;  %v3083_v60 = vadd.f32 %v11349_v48, %v11023_v57  ;;  %v11432_v7 = vadd.f32 %v11314_v18, %v3082_v50 }
 0x1ea   : > { %v2965_v45 = vpop.f32.mrf.mxu1  ;;  %v8611_v36 = vcombine.low %v5421_v32, %v5431_v33  ;;  %v3086_v22 = vadd.f32 %v11363_v35, %v11046_v53  ;;  %v11439_v21 = vadd.f32 %v11322_v3, %v3080_v6  ;;  %v3084_v57 = vadd.f32 %v11372_v8, %v11074_v56  ;;  %v12107_v35 = vld [vmem:[#allocation34_spill] sm:$0xff]  ;;  %v12114_v33 = vld [vmem:[#allocation17_spill] sm:$0xff] }
 0x1eb   : > { %v9267_v63 = vpop.f32.mrf.mxu0  ;;  %9473 = vmatmul.mubr.bf16.gmra.mxu0 %v8651_v0  ;;  %v11442_v49 = vadd.f32 %v11337_v46, %v3083_v60  ;;  %v3087_v58 = vadd.f32 %v9215_v9, %v11094_v30  ;;  %v11448_v18 = vadd.f32 %v11351_v40, %v3081_v43  ;;  %v3085_v53 = vadd.f32 %v2952_v44, %v11104_v34  ;;  %v12106_v30 = vld [vmem:[#allocation33_spill] sm:$0xff]  ;;  %v12108_v34 = vld [vmem:[#allocation35_spill] sm:$0xff] }
 0x1ec   : > { %v9219_v25 = vpop.f32.mrf.mxu1  ;;  %9425 = vmatmul.mubr.bf16.gmra.mxu1 %v8611_v36  ;;  %v11451_v59 = vadd.f32 %v11355_v26, %v3086_v22  ;;  %v3090_v3 = vadd.f32 %v9218_v10, %v11121_v55  ;;  %v11456_v46 = vadd.f32 %v11365_v4, %v3084_v57  ;;  %v3088_v9 = vadd.f32 %v2965_v45, %v12106_v30  ;;  %v12109_v55 = vld [vmem:[#allocation36_spill] sm:$0xff]  ;;  %v12115_v36 = vld [vmem:[#allocation18_spill] sm:$0xff] }
 0x1ed   : > { %v3785_v27 = vpop.f32.mrf.mxu0  ;;  %v11459_v56 = vadd.f32 %v11374_v23, %v3087_v58  ;;  %v3091_v8 = vadd.f32 %v9219_v25, %v12107_v35  ;;  %v11464_v42 = vadd.f32 %v11378_v13, %v3085_v53  ;;  %v12113_v45 = vld [vmem:[#allocation16_spill] sm:$0xff]  ;;  %vm8181_vm4 = vcmask 1043459  }
 0x1ee   : > { %v2968_v48 = vpop.f32.mrf.mxu1  ;;  %v11466_v26 = vadd.f32 %v9266_v1, %v3090_v3  ;;  %v11470_v4 = vadd.f32 %v3782_v24, %v3088_v9  ;;  %v12112_v24 = vld [vmem:[#allocation15_spill] sm:$0xff]  ;;  %v12117_v9 = vld [vmem:[#allocation20_spill] sm:$0xff] }
 0x1ef   : > { %v9270_v20 = vpop.f32.mrf.mxu0  ;;  %v3089_v44 = vadd.f32 %v2968_v48, %v12108_v34  ;;  %v11472_v29 = vadd.f32 %v9267_v63, %v3091_v8  ;;  %v12116_v48 = vld [vmem:[#allocation19_spill] sm:$0xff] }
 0x1f0   : > { %v9222_v40 = vpop.f32.mrf.mxu1 }
 0x1f1   : > { %v3094_v37 = vadd.f32 %v9222_v40, %v12109_v55  ;;  %v3798_v38 = vpop.f32.mrf.mxu0  ;;  %v11474_v11 = vadd.f32 %v3785_v27, %v3089_v44  ;;  %v12118_v44 = vld [vmem:[#allocation21_spill] sm:$0xff] }
 0x1f2   : > { %v2981_v23 = vpop.f32.mrf.mxu1 }
 0x1f3   : > { %v11476_v41 = vadd.f32 %v9270_v20, %v3094_v37  ;;  %v3092_v10 = vadd.f32 %v2981_v23, %v12110_v16  ;;  %v9271_v13 = vpop.f32.mrf.mxu0  ;;  %v12119_v16 = vld [vmem:[#allocation22_spill] sm:$0xff] }
 0x1f4   : > { %v9223_v32 = vpop.f32.mrf.mxu1 }
 0x1f5   : > { %v11479_v1 = vadd.f32 %v3798_v38, %v3092_v10  ;;  %v3095_v17 = vadd.f32 %v9223_v32, %v12111_v51  ;;  %v3801_v61 = vpop.f32.mrf.mxu0 }
 0x1f6   : > { %v2984_v28 = vpop.f32.mrf.mxu1 }
 0x1f7   : > { %v11482_v54 = vadd.f32 %v9271_v13, %v3095_v17  ;;  %v3093_v19 = vadd.f32 %v2984_v28, %v12112_v24  ;;  %v12120_v17 = vld [vmem:[#allocation23_spill] sm:$0xff] }
 0x1f8   : > { %v9226_v2 = vpop.f32.mrf.mxu1  ;;  %v9274_v0 = vpop.f32.mrf.mxu0 }
 0x1f9   : > { %v11485_v62 = vadd.f32 %v3801_v61, %v3093_v19  ;;  %v3098_v63 = vadd.f32 %v9226_v2, %v12113_v45  ;;  %v12121_v2 = vld [vmem:[#allocation24_spill] sm:$0xff] }
 0x1fa   : > { %v2997_v47 = vpop.f32.mrf.mxu1  ;;  %v3814_v60 = vpop.f32.mrf.mxu0 }
 0x1fb   : > { %v11488_v50 = vadd.f32 %v9274_v0, %v3098_v63  ;;  %v3096_v6 = vadd.f32 %v2997_v47, %v12114_v33 }
 0x1fc   : > { %v9227_v25 = vpop.f32.mrf.mxu1  ;;  %v9275_v22 = vpop.f32.mrf.mxu0 }
 0x1fd   : > { %v11491_v27 = vadd.f32 %v3814_v60, %v3096_v6  ;;  %v3099_v43 = vadd.f32 %v9227_v25, %v12115_v36 }
 0x1fe   : > { %v3000_v57 = vpop.f32.mrf.mxu1  ;;  %v3817_v3 = vpop.f32.mrf.mxu0 }
 0x1ff   : > { %v11494_v58 = vadd.f32 %v9275_v22, %v3099_v43  ;;  %v3097_v53 = vadd.f32 %v3000_v57, %v12116_v48 }
 0x200   : > { %v9230_v20 = vpop.f32.mrf.mxu1  ;;  %v9278_v8 = vpop.f32.mrf.mxu0 }
 0x201   : > { %v11497_v30 = vadd.f32 %v3817_v3, %v3097_v53  ;;  %v3102_v35 = vadd.f32 %v9230_v20, %v12117_v9 }
 0x202   : > { %v3013_v40 = vpop.f32.mrf.mxu1  ;;  %v3830_v37 = vpop.f32.mrf.mxu0 }
 0x203   : > { %v11500_v34 = vadd.f32 %v9278_v8, %v3102_v35  ;;  %v3100_v55 = vadd.f32 %v3013_v40, %v12118_v44 }
 0x204   : > { %v9231_v38 = vpop.f32.mrf.mxu1  ;;  %v9279_v13 = vpop.f32.mrf.mxu0 }
 0x205   : > { %v11503_v23 = vadd.f32 %v3830_v37, %v3100_v55  ;;  %v3103_v10 = vadd.f32 %v9231_v38, %v12119_v16 }
 0x206   : > { %v3016_v32 = vpop.f32.mrf.mxu1  ;;  %v3833_v28 = vpop.f32.mrf.mxu0 }
 0x207   : > { %v11506_v51 = vadd.f32 %v9279_v13, %v3103_v10  ;;  %v3101_v61 = vadd.f32 %v3016_v32, %v12120_v17 }
 0x209   : > { %v11509_v24 = vadd.f32 %v3833_v28, %v3101_v61 }
 0x20e   : > { %v9234_v19 = vpop.f32.mrf.mxu1 }
 0x20f   : > { %v3106_v45 = vadd.f32 %v9234_v19, %v12121_v2 }
 0x210   : > { %v3029_v63 = vpop.f32.mrf.mxu1 }
 0x211   : > { %v3104_v0 = vadd.f32 %v3029_v63, %v11389_v31 }
 0x212   : > { %v9235_v47 = vpop.f32.mrf.mxu1 }
 0x213   : > { %v3107_v33 = vadd.f32 %v9235_v47, %v11392_v52 }
 0x214   : > { %v3032_v6 = vpop.f32.mrf.mxu1 }
 0x215   : > { %v3105_v60 = vadd.f32 %v3032_v6, %v11401_v15 }
 0x216   : > { %v11515_v25 = vpop.f32.mrf.mxu1 }
 0x218   : > { %v11517_v43 = vpop.f32.mrf.mxu1 }
 0x21a   : > { %v9282_v36 = vpop.f32.mrf.mxu0  ;;  %v11521_v48 = vpop.f32.mrf.mxu1 }
 0x21b   : > { %v11519_v22 = vadd.f32 %v9282_v36, %v3106_v45 }
 0x21c   : > { %v3846_v57 = vpop.f32.mrf.mxu0  ;;  %v11525_v31 = vpop.f32.mrf.mxu1 }
 0x21d   : > { %v11523_v53 = vadd.f32 %v3846_v57, %v3104_v0 }
 0x21e   : > { %v9283_v3 = vpop.f32.mrf.mxu0  ;;  %v9306_v9 = vpop.f32.mrf.mxu1 }
 0x21f   : > { %v11527_v20 = vadd.f32 %v9283_v3, %v3107_v33  ;;  %v4492_v35 = vadd.f32 %v9306_v9, %v11432_v7 }
 0x220   : > { %v3849_v52 = vpop.f32.mrf.mxu0  ;;  %v4343_v40 = vpop.f32.mrf.mxu1 }
 0x221   : > { %v11529_v15 = vadd.f32 %v3849_v52, %v3105_v60  ;;  %v4490_v44 = vadd.f32 %v4343_v40, %v11439_v21 }
 0x222   : > { %v11532_v8 = vpop.f32.mrf.mxu0  ;;  %v9307_v37 = vpop.f32.mrf.mxu1 }
 0x223   : > { %v4493_v38 = vadd.f32 %v9307_v37, %v11442_v49 }
 0x224   : > { %v11535_v55 = vpop.f32.mrf.mxu0  ;;  %v4346_v10 = vpop.f32.mrf.mxu1 }
 0x225   : > { %v4491_v13 = vadd.f32 %v4346_v10, %v11448_v18 }
 0x226   : > { %v11538_v16 = vpop.f32.mrf.mxu0  ;;  %v9310_v17 = vpop.f32.mrf.mxu1 }
 0x227   : > { %v4496_v7 = vadd.f32 %v9310_v17, %v11451_v59 }
 0x228   : > { %v11541_v32 = vpop.f32.mrf.mxu0  ;;  %v4359_v28 = vpop.f32.mrf.mxu1 }
 0x229   : > { %v4494_v21 = vadd.f32 %v4359_v28, %v11456_v46 }
 0x22a   : > { %v9354_v61 = vpop.f32.mrf.mxu0  ;;  %v9311_v45 = vpop.f32.mrf.mxu1 }
 0x22b   : > { %v11544_v19 = vadd.f32 %v9354_v61, %v4492_v35  ;;  %v4497_v49 = vadd.f32 %v9311_v45, %v11459_v56 }
 0x22c   : > { %v4793_v2 = vpop.f32.mrf.mxu0  ;;  %v4362_v47 = vpop.f32.mrf.mxu1 }
 0x22d   : > { %v11547_v63 = vadd.f32 %v4793_v2, %v4490_v44  ;;  %v4495_v33 = vadd.f32 %v4362_v47, %v11464_v42 }
 0x22e   : > { %v9355_v0 = vpop.f32.mrf.mxu0  ;;  %v9314_v59 = vpop.f32.mrf.mxu1 }
 0x22f   : > { %v11550_v18 = vadd.f32 %v9355_v0, %v4493_v38  ;;  %v4500_v36 = vadd.f32 %v9314_v59, %v11466_v26 }
 0x230   : > { %v4796_v6 = vpop.f32.mrf.mxu0  ;;  %v4375_v46 = vpop.f32.mrf.mxu1 }
 0x231   : > { %v11553_v60 = vadd.f32 %v4796_v6, %v4491_v13  ;;  %v4498_v52 = vadd.f32 %v4375_v46, %v11470_v4 }
 0x232   : > { %v9358_v57 = vpop.f32.mrf.mxu0  ;;  %v9315_v56 = vpop.f32.mrf.mxu1 }
 0x233   : > { %v11556_v3 = vadd.f32 %v9358_v57, %v4496_v7  ;;  %v4501_v40 = vadd.f32 %v9315_v56, %v11472_v29 }
 0x234   : > { %v4809_v9 = vpop.f32.mrf.mxu0  ;;  %v4378_v42 = vpop.f32.mrf.mxu1 }
 0x235   : > { %v11559_v35 = vadd.f32 %v4809_v9, %v4494_v21  ;;  %v4499_v38 = vadd.f32 %v4378_v42, %v11474_v11 }
 0x236   : > { %v9359_v44 = vpop.f32.mrf.mxu0  ;;  %v9318_v26 = vpop.f32.mrf.mxu1 }
 0x237   : > { %v11562_v37 = vadd.f32 %v9359_v44, %v4497_v49  ;;  %v4504_v17 = vadd.f32 %v9318_v26, %v11476_v41 }
 0x238   : > { %v4812_v10 = vpop.f32.mrf.mxu0  ;;  %v4391_v4 = vpop.f32.mrf.mxu1 }
 0x239   : > { %v11565_v13 = vadd.f32 %v4812_v10, %v4495_v33  ;;  %v4502_v28 = vadd.f32 %v4391_v4, %v11479_v1 }
 0x23a   : > { %v9362_v7 = vpop.f32.mrf.mxu0  ;;  %v9319_v29 = vpop.f32.mrf.mxu1 }
 0x23b   : > { %v11568_v61 = vadd.f32 %v9362_v7, %v4500_v36  ;;  %v4505_v45 = vadd.f32 %v9319_v29, %v11482_v54 }
 0x23c   : > { %v4825_v21 = vpop.f32.mrf.mxu0  ;;  %v4394_v11 = vpop.f32.mrf.mxu1 }
 0x23d   : > { %v11571_v2 = vadd.f32 %v4825_v21, %v4498_v52  ;;  %v4503_v47 = vadd.f32 %v4394_v11, %v11485_v62 }
 0x23e   : > { %v9363_v49 = vpop.f32.mrf.mxu0  ;;  %v9322_v41 = vpop.f32.mrf.mxu1 }
 0x23f   : > { %v11574_v0 = vadd.f32 %v9363_v49, %v4501_v40  ;;  %v4508_v59 = vadd.f32 %v9322_v41, %v11488_v50 }
 0x240   : > { %v4828_v33 = vpop.f32.mrf.mxu0  ;;  %v4407_v1 = vpop.f32.mrf.mxu1 }
 0x241   : > { %v11577_v6 = vadd.f32 %v4828_v33, %v4499_v38  ;;  %v4506_v46 = vadd.f32 %v4407_v1, %v11491_v27 }
 0x242   : > { %v9366_v36 = vpop.f32.mrf.mxu0  ;;  %v9323_v54 = vpop.f32.mrf.mxu1 }
 0x243   : > { %v11580_v57 = vadd.f32 %v9366_v36, %v4504_v17  ;;  %v4509_v56 = vadd.f32 %v9323_v54, %v11494_v58 }
 0x244   : > { %v4841_v52 = vpop.f32.mrf.mxu0  ;;  %v4410_v62 = vpop.f32.mrf.mxu1 }
 0x245   : > { %v11583_v9 = vadd.f32 %v4841_v52, %v4502_v28  ;;  %v4507_v42 = vadd.f32 %v4410_v62, %v11497_v30 }
 0x246   : > { %v9367_v40 = vpop.f32.mrf.mxu0  ;;  %v9326_v50 = vpop.f32.mrf.mxu1 }
 0x247   : > { %v11586_v44 = vadd.f32 %v9367_v40, %v4505_v45  ;;  %v4512_v26 = vadd.f32 %v9326_v50, %v11500_v34 }
 0x248   : > { %v4844_v38 = vpop.f32.mrf.mxu0  ;;  %v4423_v27 = vpop.f32.mrf.mxu1 }
 0x249   : > { %v11589_v10 = vadd.f32 %v4844_v38, %v4503_v47  ;;  %v4510_v4 = vadd.f32 %v4423_v27, %v11503_v23  ;;  %v4488_v38 = vadd.f32 %v11515_v25, %v11410_v12  ;;  %v9810_v12 = vmov 1983009808  }
 0x24a   : > { %v9370_v17 = vpop.f32.mrf.mxu0  ;;  %v9327_v58 = vpop.f32.mrf.mxu1  ;;  %v6611_v25 = vunpack.c.l.s4 %v9810_v12 }
 0x24b   : > { %v11592_v7 = vadd.f32 %v9370_v17, %v4508_v59  ;;  %v4513_v29 = vadd.f32 %v9327_v58, %v11506_v51  ;;  %v4486_v17 = vadd.f32 %v11517_v43, %v11415_v5  ;;  %v4487_v43 = vadd.f32 %v11525_v31, %v11425_v14 }
 0x24c   : > { %v4857_v28 = vpop.f32.mrf.mxu0  ;;  %v4426_v30 = vpop.f32.mrf.mxu1 }
 0x24d   : > { %v11595_v21 = vadd.f32 %v4857_v28, %v4506_v46  ;;  %v4511_v11 = vadd.f32 %v4426_v30, %v11509_v24  ;;  %v4938_v28 = vadd.f32 %v11532_v8, %v4488_v38  ;;  %v4937_v14 = vadd.f32 %v11541_v32, %v4487_v43 }
 0x24e   : > { %v9371_v45 = vpop.f32.mrf.mxu0  ;;  %v9330_v34 = vpop.f32.mrf.mxu1 }
 0x24f   : > { %v11598_v49 = vadd.f32 %v9371_v45, %v4509_v56  ;;  %v4516_v41 = vadd.f32 %v9330_v34, %v11519_v22  ;;  %v6613_v45 = vlaneseq }
 0x250   : > { %v4860_v47 = vpop.f32.mrf.mxu0  ;;  %v4439_v23 = vpop.f32.mrf.mxu1 }
 0x251   : > { %v11601_v33 = vadd.f32 %v4860_v47, %v4507_v42  ;;  %v4514_v1 = vadd.f32 %v4439_v23, %v11523_v53  ;;  %v11637_v23 = vld [vmem:[%s12011_s2] ss:$0 sm:$0xff] }
 0x252   : > { %v9374_v59 = vpop.f32.mrf.mxu0  ;;  %v9331_v51 = vpop.f32.mrf.mxu1 }
 0x253   : > { %v11604_v36 = vadd.f32 %v9374_v59, %v4512_v26  ;;  %v4517_v54 = vadd.f32 %v9331_v51, %v11527_v20 }
 0x254   : > { %v4873_v46 = vpop.f32.mrf.mxu0  ;;  %v4442_v24 = vpop.f32.mrf.mxu1 }
 0x255   : > { %v11607_v52 = vadd.f32 %v4873_v46, %v4510_v4  ;;  %v4515_v62 = vadd.f32 %v4442_v24, %v11529_v15  ;;  %v4489_v15 = vadd.f32 %v11521_v48, %v11418_v39 }
 0x256   : > { %v9375_v56 = vpop.f32.mrf.mxu0  ;;  %v9398_v22 = vpop.f32.mrf.mxu1 }
 0x257   : > { %v11610_v40 = vadd.f32 %v9375_v56, %v4513_v29  ;;  %v5755_v5 = vadd.f32 %v9398_v22, %v4938_v28 }
 0x258   : > { %v4876_v42 = vpop.f32.mrf.mxu0  ;;  %v5594_v26 = vpop.f32.mrf.mxu1 }
 0x259   : > { %v11615_v50 = vadd.f32 %v4876_v42, %v4511_v11  ;;  %v4936_v11 = vadd.f32 %v11535_v55, %v4486_v17  ;;  %v6612_v55 = vunpack.c.0.s8 %v6611_v25 }
 0x25a   : > { %v9378_v53 = vpop.f32.mrf.mxu0  ;;  %v9399_v4 = vpop.f32.mrf.mxu1 }
 0x25b   : > { %v11619_v27 = vadd.f32 %v9378_v53, %v4516_v41  ;;  %v4939_v41 = vadd.f32 %v11538_v16, %v4489_v15  ;;  %v5753_v48 = vadd.f32 %v5594_v26, %v4936_v11 }
 0x25c   : > { %v4889_v20 = vpop.f32.mrf.mxu0  ;;  %v5597_v30 = vpop.f32.mrf.mxu1 }
 0x25d   : > { %v11624_v58 = vadd.f32 %v4889_v20, %v4514_v1  ;;  %v6614_v1 = vshrl.u32 %v6613_v45, 7  ;;  %v5754_v22 = vadd.f32 %v5597_v30, %v4937_v14 }
 0x25e   : > { %v9379_v29 = vpop.f32.mrf.mxu0  ;;  %v9402_v8 = vpop.f32.mrf.mxu1 }
 0x25f   : > { %v11627_v47 = vadd.f32 %v9379_v29, %v4517_v54  ;;  %v5756_v54 = vadd.f32 %v9399_v4, %v4939_v41  ;;  %v5759_v38 = vadd.f32 %v9402_v8, %v11544_v19  ;;  %v11645_v4 = vsub.s32 0, %v6614_v1 }
 0x260   : > { %v4892_v34 = vpop.f32.mrf.mxu0  ;;  %v5610_v46 = vpop.f32.mrf.mxu1 }
 0x261   : > { %v11632_v39 = vadd.f32 %v4892_v34, %v4515_v62  ;;  %v11641_v62 = vsub.s32 %v6612_v55, %v6614_v1  ;;  %v11648_v28 = vadd.f32 %v5610_v46, %v11547_v63 }
 0x262   : > { %v9446_v59 = vpop.f32.mrf.mxu0  ;;  %v9403_v56 = vpop.f32.mrf.mxu1 }
 0x263   : > { %v6348_v51 = vadd.f32 %v9446_v59, %v5755_v5  ;;  %v11651_v15 = vadd.f32 %v9403_v56, %v11550_v18 }
 0x264   : > { %v6187_v31 = vpop.f32.mrf.mxu0  ;;  %v5613_v53 = vpop.f32.mrf.mxu1 }
 0x265   : > { %v6451_v16 = vadd.f32 %v11637_v23, %v6348_v51  ;;  %v6346_v24 = vadd.f32 %v6187_v31, %v5753_v48  ;;  %v11654_v29 = vadd.f32 %v5613_v53, %v11553_v60 }
 0x266   : > { %v9447_v42 = vpop.f32.mrf.mxu0  ;;  %v9406_v12 = vpop.f32.mrf.mxu1 }
 0x267   : > { %vm6483_vm15 = vcmp.gt.f32.partialorder %v6451_v16, 0.0  ;;  %v6515_v26 = vmul.f32 0.1, %v6451_v16  ;;  %v6449_v17 = vadd.f32 %v11637_v23, %v6346_v24  ;;  %v6349_v20 = vadd.f32 %v9447_v42, %v5756_v54 }
 0x268   : > { %v6190_v32 = vpop.f32.mrf.mxu0  ;;  %v11659_v63 = vadd.f32 %v9406_v12, %v11556_v3 }
 0x269   : > { %v6547_v19 = vsel %vm6483_vm15, %v6451_v16, %v6515_v26  ;;  %vm6481_vm0 = vcmp.gt.f32.partialorder %v6449_v17, 0.0  ;;  %v6513_v25 = vmul.f32 0.1, %v6449_v17  ;;  %v6452_v45 = vadd.f32 %v11637_v23, %v6349_v20 }
 0x26a   : > { %v6643_v30 = vcombine.high %v6547_v19, %v6547_v19  ;;  %v6650_v11 = vrot.slane %v6547_v19, %v11641_v62  ;;  %v6347_v5 = vadd.f32 %v6190_v32, %v5754_v22  ;;  %v9450_v43 = vpop.f32.mrf.mxu0 }
 0x26b   : > { %v6545_v34 = vsel %vm6481_vm0, %v6449_v17, %v6513_v25  ;;  %vm6484_vm1 = vcmp.gt.f32.partialorder %v6452_v45, 0.0  ;;  %v6516_v18 = vmul.f32 0.1, %v6452_v45  ;;  %v6352_v8 = vadd.f32 %v9450_v43, %v5759_v38 }
 0x26c   : > { %v6657_v60 = vrot.slane %v6643_v30, %v11641_v62  ;;  %v6658_v41 = vcombine.high %v6650_v11, %v6650_v11  ;;  %v8669_v48 = vrot.slane %v6650_v11, 9  ;;  %v6609_v59 = vcombine.high %v6545_v34, %v6545_v34 }
 0x26d   : > { %v6616_v55 = vrot.slane %v6545_v34, %v11641_v62  ;;  %v6548_v1 = vsel %vm6484_vm1, %v6452_v45, %v6516_v18  ;;  %v6450_v46 = vadd.f32 %v11637_v23, %v6347_v5  ;;  %v6455_v51 = vadd.f32 %v11637_v23, %v6352_v8 }
 0x26e   : > { %v6659_v54 = vcombine.high %v6657_v60, %v6657_v60  ;;  %v8670_v14 = vrot.slane %v6658_v41, 9  ;;  %v8671_v3 = vrot.slane %v6657_v60, 9  ;;  %v7673_v31 = vmax.f32 %v6650_v11, %v8669_v48  ;;  %v6203_v48 = vpop.f32.mrf.mxu0 }
 0x26f   : > { %v6623_v56 = vrot.slane %v6609_v59, %v11641_v62  ;;  %v6624_v16 = vcombine.high %v6616_v55, %v6616_v55  ;;  %v8661_v24 = vrot.slane %v6616_v55, 9  ;;  %v6660_v42 = vcombine.high %v6548_v1, %v6548_v1 }
 0x270   : > { %v8672_v22 = vrot.slane %v6659_v54, 9  ;;  %v7674_v38 = vmax.f32 %v6658_v41, %v8670_v14  ;;  %v7675_v53 = vmax.f32 %v6657_v60, %v8671_v3  ;;  %v6667_v26 = vrot.slane %v6548_v1, %v11641_v62 }
 0x271   : > { %v6625_v17 = vcombine.high %v6623_v56, %v6623_v56  ;;  %v8662_v20 = vrot.slane %v6624_v16, 9  ;;  %v8663_v32 = vrot.slane %v6623_v56, 9  ;;  %v7665_v12 = vmax.f32 %v6616_v55, %v8661_v24 }
 0x272   : > { %v7676_v19 = vmax.f32 %v6659_v54, %v8672_v22  ;;  %v6674_v25 = vrot.slane %v6660_v42, %v11641_v62  ;;  %v6675_v45 = vcombine.high %v6667_v26, %v6667_v26  ;;  %v8673_v30 = vrot.slane %v6667_v26, 9 }
 0x273   : > { %v8664_v11 = vrot.slane %v6625_v17, 9  ;;  %v7666_v5 = vmax.f32 %v6624_v16, %v8662_v20  ;;  %v7667_v43 = vmax.f32 %v6623_v56, %v8663_v32  ;;  %v7793_v34 = vmax.f32 %v7665_v12, %v7673_v31 }
 0x274   : > { %v6676_v18 = vcombine.high %v6674_v25, %v6674_v25  ;;  %v8674_v8 = vrot.slane %v6675_v45, 9  ;;  %v8675_v41 = vrot.slane %v6674_v25, 9  ;;  %v11668_v60 = vmax.f32 %v6667_v26, %v8673_v30 }
 0x275   : > { %v7668_v59 = vmax.f32 %v6625_v17, %v8664_v11  ;;  %v7794_v1 = vmax.f32 %v7666_v5, %v7674_v38  ;;  %v7795_v14 = vmax.f32 %v7667_v43, %v7675_v53  ;;  %v7924_v55 = vrot.slane %v7793_v34, %v11645_v4  ;;  %v9451_v53 = vpop.f32.mrf.mxu0 }
 0x276   : > { %v8676_v54 = vrot.slane %v6676_v18, 9  ;;  %v11671_v3 = vmax.f32 %v6675_v45, %v8674_v8  ;;  %v11673_v24 = vmax.f32 %v6674_v25, %v8675_v41  ;;  %vm6482_vm5 = vcmp.gt.f32.partialorder %v6450_v46, 0.0 }
 0x277   : > { %v7796_v16 = vmax.f32 %v7668_v59, %v7676_v19  ;;  %v7928_v31 = vrot.slane %v7794_v1, %v11645_v4  ;;  %v7932_v56 = vrot.slane %v7795_v14, %v11645_v4  ;;  %v6514_v42 = vmul.f32 0.1, %v6450_v46 }
 0x278   : > { %v11677_v22 = vmax.f32 %v6676_v18, %v8676_v54  ;;  %vm6487_vm6 = vcmp.gt.f32.partialorder %v6455_v51, 0.0  ;;  %v6519_v26 = vmul.f32 0.1, %v6455_v51  ;;  %v6350_v38 = vadd.f32 %v6203_v48, %v11648_v28 }
 0x279   : > { %v7936_v17 = vrot.slane %v7796_v16, %v11645_v4  ;;  %v8178_v20 = vsel %vm8177_vm2, %v7928_v31, %v7924_v55  ;;  %v6546_v32 = vsel %vm6482_vm5, %v6450_v46, %v6514_v42  ;;  %v6353_v12 = vadd.f32 %v9451_v53, %v11651_v15 }
 0x27a   : > { %v8180_v19 = vsel %vm8179_vm3, %v7932_v56, %v8178_v20  ;;  %v6626_v25 = vcombine.high %v6546_v32, %v6546_v32  ;;  %v6633_v45 = vrot.slane %v6546_v32, %v11641_v62  ;;  %v6551_v30 = vsel %vm6487_vm6, %v6455_v51, %v6519_v26 }
 0x27b   : > { %v8182_v11 = vsel %vm8181_vm4, %v7936_v17, %v8180_v19  ;;  %v6711_v5 = vcombine.high %v6551_v30, %v6551_v30  ;;  %v6718_v28 = vrot.slane %v6551_v30, %v11641_v62  ;;  %v6453_v43 = vadd.f32 %v11637_v23, %v6350_v38 }
 0x27c   : > { %v6640_v34 = vrot.slane %v6626_v25, %v11641_v62  ;;  %v6641_v46 = vcombine.high %v6633_v45, %v6633_v45  ;;  %v8665_v18 = vrot.slane %v6633_v45, 9  ;;  %v6456_v15 = vadd.f32 %v11637_v23, %v6353_v12 }
 0x27d   : > { %v6725_v8 = vrot.slane %v6711_v5, %v11641_v62  ;;  %v6726_v41 = vcombine.high %v6718_v28, %v6718_v28  ;;  %v8685_v51 = vrot.slane %v6718_v28, 9  ;;  %vm6485_vm11 = vcmp.gt.f32.partialorder %v6453_v43, 0.0 }
 0x27e   : > { %v6642_v48 = vcombine.high %v6640_v34, %v6640_v34  ;;  %v8666_v59 = vrot.slane %v6641_v46, 9  ;;  %v8667_v1 = vrot.slane %v6640_v34, 9  ;;  %v7669_v14 = vmax.f32 %v6633_v45, %v8665_v18 }
 0x27f   : > { %v6727_v55 = vcombine.high %v6725_v8, %v6725_v8  ;;  %v8686_v54 = vrot.slane %v6726_v41, 9  ;;  %v8687_v16 = vrot.slane %v6725_v8, 9  ;;  %v11691_v31 = vmax.f32 %v6718_v28, %v8685_v51  ;;  %v6206_v28 = vpop.f32.mrf.mxu0 }
 0x280   : > { %v8668_v56 = vrot.slane %v6642_v48, 9  ;;  %v7670_v42 = vmax.f32 %v6641_v46, %v8666_v59  ;;  %v7671_v26 = vmax.f32 %v6640_v34, %v8667_v1  ;;  %v7797_v38 = vmax.f32 %v7669_v14, %v11668_v60 }
 0x281   : > { %v8688_v53 = vrot.slane %v6727_v55, 9  ;;  %v11694_v17 = vmax.f32 %v6726_v41, %v8686_v54  ;;  %v11696_v20 = vmax.f32 %v6725_v8, %v8687_v16  ;;  %v6517_v32 = vmul.f32 0.1, %v6453_v43  ;;  %v9454_v16 = vpop.f32.mrf.mxu0 }
 0x282   : > { %v7672_v12 = vmax.f32 %v6642_v48, %v8668_v56  ;;  %v7798_v19 = vmax.f32 %v7670_v42, %v11671_v3  ;;  %v7799_v25 = vmax.f32 %v7671_v26, %v11673_v24  ;;  %v7940_v45 = vrot.slane %v7797_v38, %v11645_v4  ;;  %v5626_v48 = vpop.f32.mrf.mxu1 }
 0x283   : > { %v11702_v30 = vmax.f32 %v6727_v55, %v8688_v53  ;;  %v6549_v5 = vsel %vm6485_vm11, %v6453_v43, %v6517_v32  ;;  %vm6488_vm12 = vcmp.gt.f32.partialorder %v6456_v15, 0.0  ;;  %v6520_v60 = vmul.f32 0.1, %v6456_v15 }
 0x284   : > { %v7800_v34 = vmax.f32 %v7672_v12, %v11677_v22  ;;  %v7944_v46 = vrot.slane %v7798_v19, %v11645_v4  ;;  %v7948_v18 = vrot.slane %v7799_v25, %v11645_v4  ;;  %v8184_v3 = vsel %vm8183_vm7, %v7940_v45, %v8182_v11  ;;  %v9407_v12 = vpop.f32.mrf.mxu1 }
 0x285   : > { %v6677_v8 = vcombine.high %v6549_v5, %v6549_v5  ;;  %v6684_v24 = vrot.slane %v6549_v5, %v11641_v62  ;;  %v6552_v41 = vsel %vm6488_vm12, %v6456_v15, %v6520_v60  ;;  %v6351_v51 = vadd.f32 %v6206_v28, %v11654_v29 }
 0x286   : > { %v7952_v43 = vrot.slane %v7800_v34, %v11645_v4  ;;  %v8186_v59 = vsel %vm8185_vm8, %v7944_v46, %v8184_v3  ;;  %v6728_v1 = vcombine.high %v6552_v41, %v6552_v41  ;;  %v6735_v22 = vrot.slane %v6552_v41, %v11641_v62 }
 0x287   : > { %v8188_v14 = vsel %vm8187_vm9, %v7948_v18, %v8186_v59  ;;  %v6691_v55 = vrot.slane %v6677_v8, %v11641_v62  ;;  %v6692_v54 = vcombine.high %v6684_v24, %v6684_v24  ;;  %v8677_v11 = vrot.slane %v6684_v24, 9  ;;  %v6219_v18 = vpop.f32.mrf.mxu0 }
 0x288   : > { %v8190_v56 = vsel %vm8189_vm10, %v7952_v43, %v8188_v14  ;;  %v6742_v15 = vrot.slane %v6728_v1, %v11641_v62  ;;  %v6743_v29 = vcombine.high %v6735_v22, %v6735_v22  ;;  %v8689_v42 = vrot.slane %v6735_v22, 9  ;;  %v5629_v14 = vpop.f32.mrf.mxu1 }
 0x289   : > { %8248 = vst [vmem:[%s11718_s22] sm:$0xff] %v8190_v56  ;;  %v6693_v26 = vcombine.high %v6691_v55, %v6691_v55  ;;  %v8678_v38 = vrot.slane %v6692_v54, 9  ;;  %v8679_v53 = vrot.slane %v6691_v55, 9  ;;  %v7681_v32 = vmax.f32 %v6684_v24, %v8677_v11 }
 0x28a   : > { %v6744_v19 = vcombine.high %v6742_v15, %v6742_v15  ;;  %v8690_v25 = vrot.slane %v6743_v29, 9  ;;  %v8691_v45 = vrot.slane %v6742_v15, 9  ;;  %v11721_v5 = vmax.f32 %v6735_v22, %v8689_v42 }
 0x28b   : > { %v8680_v60 = vrot.slane %v6693_v26, 9  ;;  %v7682_v28 = vmax.f32 %v6692_v54, %v8678_v38  ;;  %v7683_v34 = vmax.f32 %v6691_v55, %v8679_v53  ;;  %v7801_v46 = vmax.f32 %v7681_v32, %v11691_v31 }
 0x28c   : > { %v8692_v3 = vrot.slane %v6744_v19, 9  ;;  %v11724_v8 = vmax.f32 %v6743_v29, %v8690_v25  ;;  %v11726_v41 = vmax.f32 %v6742_v15, %v8691_v45  ;;  %v6454_v43 = vadd.f32 %v11637_v23, %v6351_v51 }
 0x28d   : > { %v7684_v24 = vmax.f32 %v6693_v26, %v8680_v60  ;;  %v7802_v59 = vmax.f32 %v7682_v28, %v11694_v17  ;;  %v7803_v1 = vmax.f32 %v7683_v34, %v11696_v20  ;;  %v7956_v22 = vrot.slane %v7801_v46, %v11645_v4  ;;  %v9455_v17 = vpop.f32.mrf.mxu0 }
 0x28e   : > { %v11732_v54 = vmax.f32 %v6744_v19, %v8692_v3  ;;  %vm6486_vm13 = vcmp.gt.f32.partialorder %v6454_v43, 0.0  ;;  %v6518_v31 = vmul.f32 0.1, %v6454_v43  ;;  %v6356_v55 = vadd.f32 %v9454_v16, %v11659_v63 }
 0x28f   : > { %v7804_v11 = vmax.f32 %v7684_v24, %v11702_v30  ;;  %v7960_v56 = vrot.slane %v7802_v59, %v11645_v4  ;;  %v7964_v51 = vrot.slane %v7803_v1, %v11645_v4  ;;  %v5761_v15 = vadd.f32 %v5626_v48, %v11559_v35 }
 0x290   : > { %v6550_v29 = vsel %vm6486_vm13, %v6454_v43, %v6518_v31  ;;  %v6459_v20 = vadd.f32 %v11637_v23, %v6356_v55  ;;  %v5764_v42 = vadd.f32 %v9407_v12, %v11562_v37  ;;  %v5762_v26 = vadd.f32 %v5629_v14, %v11565_v13  ;;  %v6222_v12 = vpop.f32.mrf.mxu0 }
 0x291   : > { %v7968_v38 = vrot.slane %v7804_v11, %v11645_v4  ;;  %v8191_v63 = vsel %vm8177_vm2, %v7960_v56, %v7956_v22  ;;  %v6694_v16 = vcombine.high %v6550_v29, %v6550_v29  ;;  %v6701_v30 = vrot.slane %v6550_v29, %v11641_v62 }
 0x292   : > { %v8192_v53 = vsel %vm8179_vm3, %v7964_v51, %v8191_v63  ;;  %vm6491_vm14 = vcmp.gt.f32.partialorder %v6459_v20, 0.0  ;;  %v6523_v32 = vmul.f32 0.1, %v6459_v20  ;;  %v6354_v35 = vadd.f32 %v6219_v18, %v5761_v15 }
 0x293   : > { %v6708_v48 = vrot.slane %v6694_v16, %v11641_v62  ;;  %v6709_v19 = vcombine.high %v6701_v30, %v6701_v30  ;;  %v8681_v25 = vrot.slane %v6701_v30, 9  ;;  %v8193_v37 = vsel %vm8181_vm4, %v7968_v38, %v8192_v53 }
 0x294   : > { %v6555_v13 = vsel %vm6491_vm14, %v6459_v20, %v6523_v32  ;;  %v6457_v45 = vadd.f32 %v11637_v23, %v6354_v35  ;;  %v6357_v60 = vadd.f32 %v9455_v17, %v5764_v42  ;;  %v6355_v28 = vadd.f32 %v6222_v12, %v5762_v26  ;;  %v9410_v32 = vpop.f32.mrf.mxu1 }
 0x295   : > { %v6710_v34 = vcombine.high %v6708_v48, %v6708_v48  ;;  %v8682_v46 = vrot.slane %v6709_v19, 9  ;;  %v8683_v3 = vrot.slane %v6708_v48, 9  ;;  %v7685_v43 = vmax.f32 %v6701_v30, %v8681_v25 }
 0x296   : > { %v6779_v24 = vcombine.high %v6555_v13, %v6555_v13  ;;  %v6786_v59 = vrot.slane %v6555_v13, %v11641_v62  ;;  %vm6489_vm15 = vcmp.gt.f32.partialorder %v6457_v45, 0.0  ;;  %v6521_v18 = vmul.f32 0.1, %v6457_v45 }
 0x297   : > { %v8684_v1 = vrot.slane %v6710_v34, 9  ;;  %v7686_v22 = vmax.f32 %v6709_v19, %v8682_v46  ;;  %v7687_v14 = vmax.f32 %v6708_v48, %v8683_v3  ;;  %v7805_v31 = vmax.f32 %v7685_v43, %v11721_v5 }
 0x298   : > { %v6793_v55 = vrot.slane %v6779_v24, %v11641_v62  ;;  %v6794_v11 = vcombine.high %v6786_v59, %v6786_v59  ;;  %v8701_v56 = vrot.slane %v6786_v59, 9  ;;  %v6553_v51 = vsel %vm6489_vm15, %v6457_v45, %v6521_v18  ;;  %v5642_v24 = vpop.f32.mrf.mxu1 }
 0x299   : > { %v7688_v15 = vmax.f32 %v6710_v34, %v8684_v1  ;;  %v7806_v17 = vmax.f32 %v7686_v22, %v11724_v8  ;;  %v7807_v29 = vmax.f32 %v7687_v14, %v11726_v41  ;;  %v7972_v20 = vrot.slane %v7805_v31, %v11645_v4 }
 0x29a   : > { %v6795_v42 = vcombine.high %v6793_v55, %v6793_v55  ;;  %v8702_v26 = vrot.slane %v6794_v11, 9  ;;  %v8703_v38 = vrot.slane %v6793_v55, 9  ;;  %v7705_v63 = vmax.f32 %v6786_v59, %v8701_v56 }
 0x29b   : > { %v7808_v16 = vmax.f32 %v7688_v15, %v11732_v54  ;;  %v7976_v5 = vrot.slane %v7806_v17, %v11645_v4  ;;  %v7980_v30 = vrot.slane %v7807_v29, %v11645_v4  ;;  %v8194_v53 = vsel %vm8183_vm7, %v7972_v20, %v8193_v37  ;;  %v9458_v20 = vpop.f32.mrf.mxu0 }
 0x29c   : > { %v8704_v35 = vrot.slane %v6795_v42, 9  ;;  %v7706_v48 = vmax.f32 %v6794_v11, %v8702_v26  ;;  %v7707_v8 = vmax.f32 %v6793_v55, %v8703_v38  ;;  %v6745_v41 = vcombine.high %v6553_v51, %v6553_v51 }
 0x29d   : > { %v7984_v19 = vrot.slane %v7808_v16, %v11645_v4  ;;  %v8195_v25 = vsel %vm8185_vm8, %v7976_v5, %v8194_v53  ;;  %v6752_v12 = vrot.slane %v6553_v51, %v11641_v62  ;;  %v6460_v54 = vadd.f32 %v11637_v23, %v6357_v60 }
 0x29e   : > { %v8196_v13 = vsel %vm8187_vm9, %v7980_v30, %v8195_v25  ;;  %v7708_v45 = vmax.f32 %v6795_v42, %v8704_v35  ;;  %v6759_v34 = vrot.slane %v6745_v41, %v11641_v62  ;;  %v6458_v37 = vadd.f32 %v11637_v23, %v6355_v28 }
 0x29f   : > { %v8197_v46 = vsel %vm8189_vm10, %v7984_v19, %v8196_v13  ;;  %v6760_v3 = vcombine.high %v6752_v12, %v6752_v12  ;;  %v8693_v43 = vrot.slane %v6752_v12, 9  ;;  %vm6492_vm0 = vcmp.gt.f32.partialorder %v6460_v54, 0.0 }
 0x2a0   : > { %8249 = vst [vmem:[%s11718_s22 + $0x8] sm:$0xff] %v8197_v46  ;;  %v6761_v59 = vcombine.high %v6759_v34, %v6759_v34  ;;  %v8695_v18 = vrot.slane %v6759_v34, 9  ;;  %v6524_v1 = vmul.f32 0.1, %v6460_v54  ;;  %vm6490_vm1 = vcmp.gt.f32.partialorder %v6458_v37, 0.0 }
 0x2a1   : > { %v8694_v22 = vrot.slane %v6760_v3, 9  ;;  %v7697_v60 = vmax.f32 %v6752_v12, %v8693_v43  ;;  %v6522_v14 = vmul.f32 0.1, %v6458_v37  ;;  %v5767_v31 = vadd.f32 %v9410_v32, %v11568_v61 }
 0x2a2   : > { %v8696_v55 = vrot.slane %v6761_v59, 9  ;;  %v7699_v11 = vmax.f32 %v6759_v34, %v8695_v18  ;;  %v6556_v56 = vsel %vm6492_vm0, %v6460_v54, %v6524_v1  ;;  %v5765_v28 = vadd.f32 %v5642_v24, %v11571_v2  ;;  %v9411_v34 = vpop.f32.mrf.mxu1  ;;  %v6235_v1 = vpop.f32.mrf.mxu0 }
 0x2a3   : > { %v7698_v51 = vmax.f32 %v6760_v3, %v8694_v22  ;;  %v7809_v15 = vmax.f32 %v7697_v60, %v7705_v63  ;;  %v6796_v17 = vcombine.high %v6556_v56, %v6556_v56  ;;  %v6803_v29 = vrot.slane %v6556_v56, %v11641_v62 }
 0x2a4   : > { %v7700_v42 = vmax.f32 %v6761_v59, %v8696_v55  ;;  %v7811_v26 = vmax.f32 %v7699_v11, %v7707_v8  ;;  %v6554_v38 = vsel %vm6490_vm1, %v6458_v37, %v6522_v14  ;;  %v6360_v16 = vadd.f32 %v9458_v20, %v5767_v31 }
 0x2a5   : > { %v7810_v5 = vmax.f32 %v7698_v51, %v7706_v48  ;;  %v7988_v30 = vrot.slane %v7809_v15, %v11645_v4  ;;  %v6810_v61 = vrot.slane %v6796_v17, %v11641_v62  ;;  %v6811_v53 = vcombine.high %v6803_v29, %v6803_v29  ;;  %v5645_v15 = vpop.f32.mrf.mxu1 }
 0x2a6   : > { %v7812_v32 = vmax.f32 %v7700_v42, %v7708_v45  ;;  %v7996_v2 = vrot.slane %v7811_v26, %v11645_v4  ;;  %v8705_v35 = vrot.slane %v6803_v29, 9  ;;  %v6762_v63 = vcombine.high %v6554_v38, %v6554_v38 }
 0x2a7   : > { %v7992_v41 = vrot.slane %v7810_v5, %v11645_v4  ;;  %v6812_v19 = vcombine.high %v6810_v61, %v6810_v61  ;;  %v8706_v25 = vrot.slane %v6811_v53, 9  ;;  %v8707_v12 = vrot.slane %v6810_v61, 9 }
 0x2a8   : > { %v8000_v8 = vrot.slane %v7812_v32, %v11645_v4  ;;  %v7709_v54 = vmax.f32 %v6803_v29, %v8705_v35  ;;  %v6769_v48 = vrot.slane %v6554_v38, %v11641_v62  ;;  %v6776_v13 = vrot.slane %v6762_v63, %v11641_v62 }
 0x2a9   : > { %v8198_v37 = vsel %vm8177_vm2, %v7992_v41, %v7988_v30  ;;  %v8708_v45 = vrot.slane %v6812_v19, 9  ;;  %v7710_v46 = vmax.f32 %v6811_v53, %v8706_v25  ;;  %v7711_v3 = vmax.f32 %v6810_v61, %v8707_v12  ;;  %v9459_v30 = vpop.f32.mrf.mxu0 }
 0x2aa   : > { %v8199_v43 = vsel %vm8179_vm3, %v7996_v2, %v8198_v37  ;;  %v6777_v24 = vcombine.high %v6769_v48, %v6769_v48  ;;  %v6778_v59 = vcombine.high %v6776_v13, %v6776_v13  ;;  %v8697_v18 = vrot.slane %v6769_v48, 9  ;;  %v9414_v37 = vpop.f32.mrf.mxu1 }
 0x2ab   : > { %v7712_v22 = vmax.f32 %v6812_v19, %v8708_v45  ;;  %v8699_v60 = vrot.slane %v6776_v13, 9  ;;  %v8200_v14 = vsel %vm8181_vm4, %v8000_v8, %v8199_v43  ;;  %v6463_v31 = vadd.f32 %v11637_v23, %v6360_v16 }
 0x2ac   : > { %v8698_v55 = vrot.slane %v6777_v24, 9  ;;  %v8700_v11 = vrot.slane %v6778_v59, 9  ;;  %v7701_v56 = vmax.f32 %v6769_v48, %v8697_v18  ;;  %v6358_v51 = vadd.f32 %v6235_v1, %v5765_v28 }
 0x2ad   : > { %v7703_v17 = vmax.f32 %v6776_v13, %v8699_v60  ;;  %vm6495_vm5 = vcmp.gt.f32.partialorder %v6463_v31, 0.0  ;;  %v6527_v29 = vmul.f32 0.1, %v6463_v31  ;;  %v5768_v20 = vadd.f32 %v9411_v34, %v11574_v0 }
 0x2ae   : > { %v7702_v42 = vmax.f32 %v6777_v24, %v8698_v55  ;;  %v7704_v26 = vmax.f32 %v6778_v59, %v8700_v11  ;;  %v7813_v38 = vmax.f32 %v7701_v56, %v7709_v54  ;;  %v6461_v5 = vadd.f32 %v11637_v23, %v6358_v51 }
 0x2af   : > { %v7815_v61 = vmax.f32 %v7703_v17, %v7711_v3  ;;  %v6559_v53 = vsel %vm6495_vm5, %v6463_v31, %v6527_v29  ;;  %v6361_v32 = vadd.f32 %v9459_v30, %v5768_v20  ;;  %v5766_v16 = vadd.f32 %v5645_v15, %v11577_v6  ;;  %v5658_v15 = vpop.f32.mrf.mxu1 }
 0x2b0   : > { %v7814_v2 = vmax.f32 %v7702_v42, %v7710_v46  ;;  %v7816_v35 = vmax.f32 %v7704_v26, %v7712_v22  ;;  %v8004_v28 = vrot.slane %v7813_v38, %v11645_v4  ;;  %v6847_v63 = vcombine.high %v6559_v53, %v6559_v53  ;;  %v6238_v22 = vpop.f32.mrf.mxu0 }
 0x2b1   : > { %v8012_v41 = vrot.slane %v7815_v61, %v11645_v4  ;;  %v6854_v0 = vrot.slane %v6559_v53, %v11641_v62  ;;  %vm6493_vm6 = vcmp.gt.f32.partialorder %v6461_v5, 0.0  ;;  %v6525_v19 = vmul.f32 0.1, %v6461_v5 }
 0x2b2   : > { %v8008_v25 = vrot.slane %v7814_v2, %v11645_v4  ;;  %v8016_v12 = vrot.slane %v7816_v35, %v11645_v4  ;;  %v8201_v8 = vsel %vm8183_vm7, %v8004_v28, %v8200_v14  ;;  %v6861_v54 = vrot.slane %v6847_v63, %v11641_v62  ;;  %v9462_v61 = vpop.f32.mrf.mxu0 }
 0x2b3   : > { %v6862_v6 = vcombine.high %v6854_v0, %v6854_v0  ;;  %v8717_v48 = vrot.slane %v6854_v0, 9  ;;  %v6557_v13 = vsel %vm6493_vm6, %v6461_v5, %v6525_v19  ;;  %v6464_v34 = vadd.f32 %v11637_v23, %v6361_v32 }
 0x2b4   : > { %v8202_v45 = vsel %vm8185_vm8, %v8008_v25, %v8201_v8  ;;  %v6863_v46 = vcombine.high %v6861_v54, %v6861_v54  ;;  %v8719_v3 = vrot.slane %v6861_v54, 9  ;;  %v6813_v43 = vcombine.high %v6557_v13, %v6557_v13 }
 0x2b5   : > { %v8203_v24 = vsel %vm8187_vm9, %v8012_v41, %v8202_v45  ;;  %v8718_v59 = vrot.slane %v6862_v6, 9  ;;  %v7721_v18 = vmax.f32 %v6854_v0, %v8717_v48  ;;  %v6820_v1 = vrot.slane %v6557_v13, %v11641_v62  ;;  %v6251_v48 = vpop.f32.mrf.mxu0  ;;  %v9415_v13 = vpop.f32.mrf.mxu1 }
 0x2b6   : > { %v8204_v60 = vsel %vm8189_vm10, %v8016_v12, %v8203_v24  ;;  %v8720_v14 = vrot.slane %v6863_v46, 9  ;;  %v7723_v31 = vmax.f32 %v6861_v54, %v8719_v3  ;;  %v6827_v55 = vrot.slane %v6813_v43, %v11641_v62 }
 0x2b7   : > { %8250 = vst [vmem:[%s11718_s22 + $0x10] sm:$0xff] %v8204_v60  ;;  %v7722_v11 = vmax.f32 %v6862_v6, %v8718_v59  ;;  %v6828_v56 = vcombine.high %v6820_v1, %v6820_v1  ;;  %v8709_v51 = vrot.slane %v6820_v1, 9  ;;  %vm6496_vm11 = vcmp.gt.f32.partialorder %v6464_v34, 0.0 }
 0x2b8   : > { %v7724_v17 = vmax.f32 %v6863_v46, %v8720_v14  ;;  %v6829_v29 = vcombine.high %v6827_v55, %v6827_v55  ;;  %v8711_v20 = vrot.slane %v6827_v55, 9  ;;  %v6528_v42 = vmul.f32 0.1, %v6464_v34 }
 0x2b9   : > { %v8710_v26 = vrot.slane %v6828_v56, 9  ;;  %v7713_v38 = vmax.f32 %v6820_v1, %v8709_v51  ;;  %v6359_v5 = vadd.f32 %v6238_v22, %v5766_v16  ;;  %v5771_v30 = vadd.f32 %v9414_v37, %v11580_v57 }
 0x2ba   : > { %v8712_v53 = vrot.slane %v6829_v29, 9  ;;  %v7715_v32 = vmax.f32 %v6827_v55, %v8711_v20  ;;  %v6560_v2 = vsel %vm6496_vm11, %v6464_v34, %v6528_v42  ;;  %v5769_v35 = vadd.f32 %v5658_v15, %v11583_v9  ;;  %v9463_v55 = vpop.f32.mrf.mxu0 }
 0x2bb   : > { %v7714_v28 = vmax.f32 %v6828_v56, %v8710_v26  ;;  %v7817_v63 = vmax.f32 %v7713_v38, %v7721_v18  ;;  %v6864_v41 = vcombine.high %v6560_v2, %v6560_v2  ;;  %v6871_v0 = vrot.slane %v6560_v2, %v11641_v62 }
 0x2bc   : > { %v7716_v19 = vmax.f32 %v6829_v29, %v8712_v53  ;;  %v7819_v25 = vmax.f32 %v7715_v32, %v7723_v31  ;;  %v6462_v12 = vadd.f32 %v11637_v23, %v6359_v5  ;;  %v6364_v8 = vadd.f32 %v9462_v61, %v5771_v30 }
 0x2bd   : > { %v7818_v54 = vmax.f32 %v7714_v28, %v7722_v11  ;;  %v8020_v16 = vrot.slane %v7817_v63, %v11645_v4  ;;  %v6878_v57 = vrot.slane %v6864_v41, %v11641_v62  ;;  %v6879_v6 = vcombine.high %v6871_v0, %v6871_v0  ;;  %v5661_v11 = vpop.f32.mrf.mxu1  ;;  %v6254_v28 = vpop.f32.mrf.mxu0 }
 0x2be   : > { %v7820_v34 = vmax.f32 %v7716_v19, %v7724_v17  ;;  %v8028_v9 = vrot.slane %v7819_v25, %v11645_v4  ;;  %v8721_v37 = vrot.slane %v6871_v0, 9  ;;  %vm6494_vm12 = vcmp.gt.f32.partialorder %v6462_v12, 0.0 }
 0x2bf   : > { %v8024_v45 = vrot.slane %v7818_v54, %v11645_v4  ;;  %v6880_v46 = vcombine.high %v6878_v57, %v6878_v57  ;;  %v8722_v3 = vrot.slane %v6879_v6, 9  ;;  %v8723_v43 = vrot.slane %v6878_v57, 9 }
 0x2c0   : > { %v8032_v24 = vrot.slane %v7820_v34, %v11645_v4  ;;  %v7725_v59 = vmax.f32 %v6871_v0, %v8721_v37  ;;  %v6526_v18 = vmul.f32 0.1, %v6462_v12  ;;  %v6467_v1 = vadd.f32 %v11637_v23, %v6364_v8 }
 0x2c1   : > { %v8205_v22 = vsel %vm8177_vm2, %v8024_v45, %v8020_v16  ;;  %v8724_v60 = vrot.slane %v6880_v46, 9  ;;  %v7726_v14 = vmax.f32 %v6879_v6, %v8722_v3  ;;  %v7727_v31 = vmax.f32 %v6878_v57, %v8723_v43 }
 0x2c2   : > { %v8206_v56 = vsel %vm8179_vm3, %v8028_v9, %v8205_v22  ;;  %v6558_v51 = vsel %vm6494_vm12, %v6462_v12, %v6526_v18  ;;  %vm6499_vm13 = vcmp.gt.f32.partialorder %v6467_v1, 0.0  ;;  %v6531_v15 = vmul.f32 0.1, %v6467_v1 }
 0x2c3   : > { %v7728_v17 = vmax.f32 %v6880_v46, %v8724_v60  ;;  %v6830_v29 = vcombine.high %v6558_v51, %v6558_v51  ;;  %v6837_v20 = vrot.slane %v6558_v51, %v11641_v62  ;;  %v8207_v42 = vsel %vm8181_vm4, %v8032_v24, %v8206_v56  ;;  %v9418_v24 = vpop.f32.mrf.mxu1 }
 0x2c4   : > { %v6563_v26 = vsel %vm6499_vm13, %v6467_v1, %v6531_v15  ;;  %v6362_v38 = vadd.f32 %v6251_v48, %v5769_v35  ;;  %v5772_v5 = vadd.f32 %v9415_v13, %v11586_v44  ;;  %v5770_v30 = vadd.f32 %v5661_v11, %v11589_v10 }
 0x2c5   : > { %v6844_v61 = vrot.slane %v6830_v29, %v11641_v62  ;;  %v6845_v53 = vcombine.high %v6837_v20, %v6837_v20  ;;  %v8713_v32 = vrot.slane %v6837_v20, 9  ;;  %v6915_v2 = vcombine.high %v6563_v26, %v6563_v26 }
 0x2c6   : > { %v6922_v63 = vrot.slane %v6563_v26, %v11641_v62  ;;  %v6465_v41 = vadd.f32 %v11637_v23, %v6362_v38  ;;  %v6365_v0 = vadd.f32 %v9463_v55, %v5772_v5  ;;  %v6363_v19 = vadd.f32 %v6254_v28, %v5770_v30  ;;  %v5674_v38 = vpop.f32.mrf.mxu1 }
 0x2c7   : > { %v6846_v25 = vcombine.high %v6844_v61, %v6844_v61  ;;  %v8714_v12 = vrot.slane %v6845_v53, 9  ;;  %v8715_v8 = vrot.slane %v6844_v61, 9  ;;  %v7717_v35 = vmax.f32 %v6837_v20, %v8713_v32 }
 0x2c8   : > { %v6929_v44 = vrot.slane %v6915_v2, %v11641_v62  ;;  %v6930_v54 = vcombine.high %v6922_v63, %v6922_v63  ;;  %v8733_v10 = vrot.slane %v6922_v63, 9  ;;  %vm6497_vm14 = vcmp.gt.f32.partialorder %v6465_v41, 0.0 }
 0x2c9   : > { %v8716_v16 = vrot.slane %v6846_v25, 9  ;;  %v7718_v57 = vmax.f32 %v6845_v53, %v8714_v12  ;;  %v7719_v6 = vmax.f32 %v6844_v61, %v8715_v8  ;;  %v7821_v48 = vmax.f32 %v7717_v35, %v7725_v59  ;;  %v9466_v12 = vpop.f32.mrf.mxu0 }
 0x2ca   : > { %v6931_v13 = vcombine.high %v6929_v44, %v6929_v44  ;;  %v8734_v34 = vrot.slane %v6930_v54, 9  ;;  %v8735_v9 = vrot.slane %v6929_v44, 9  ;;  %v7737_v37 = vmax.f32 %v6922_v63, %v8733_v10 }
 0x2cb   : > { %v7720_v45 = vmax.f32 %v6846_v25, %v8716_v16  ;;  %v7822_v46 = vmax.f32 %v7718_v57, %v7726_v14  ;;  %v7823_v3 = vmax.f32 %v7719_v6, %v7727_v31  ;;  %v8036_v43 = vrot.slane %v7821_v48, %v11645_v4 }
 0x2cc   : > { %v8736_v18 = vrot.slane %v6931_v13, 9  ;;  %v7738_v1 = vmax.f32 %v6930_v54, %v8734_v34  ;;  %v7739_v22 = vmax.f32 %v6929_v44, %v8735_v9  ;;  %v6529_v60 = vmul.f32 0.1, %v6465_v41 }
 0x2cd   : > { %v7824_v55 = vmax.f32 %v7720_v45, %v7728_v17  ;;  %v8040_v11 = vrot.slane %v7822_v46, %v11645_v4  ;;  %v8044_v56 = vrot.slane %v7823_v3, %v11645_v4  ;;  %v8208_v59 = vsel %vm8183_vm7, %v8036_v43, %v8207_v42 }
 0x2ce   : > { %v7740_v51 = vmax.f32 %v6931_v13, %v8736_v18  ;;  %v6561_v15 = vsel %vm6497_vm14, %v6465_v41, %v6529_v60  ;;  %v6468_v14 = vadd.f32 %v11637_v23, %v6365_v0  ;;  %v6466_v31 = vadd.f32 %v11637_v23, %v6363_v19 }
 0x2cf   : > { %v8048_v29 = vrot.slane %v7824_v55, %v11645_v4  ;;  %v8209_v20 = vsel %vm8185_vm8, %v8040_v11, %v8208_v59  ;;  %v6881_v26 = vcombine.high %v6561_v15, %v6561_v15  ;;  %v6888_v17 = vrot.slane %v6561_v15, %v11641_v62 }
 0x2d0   : > { %v8210_v5 = vsel %vm8187_vm9, %v8044_v56, %v8209_v20  ;;  %vm6500_vm15 = vcmp.gt.f32.partialorder %v6468_v14, 0.0  ;;  %v6532_v42 = vmul.f32 0.1, %v6468_v14  ;;  %vm6498_vm0 = vcmp.gt.f32.partialorder %v6466_v31, 0.0 }
 0x2d1   : > { %v8211_v30 = vsel %vm8189_vm10, %v8048_v29, %v8210_v5  ;;  %v6895_v61 = vrot.slane %v6881_v26, %v11641_v62  ;;  %v6896_v53 = vcombine.high %v6888_v17, %v6888_v17  ;;  %v8725_v32 = vrot.slane %v6888_v17, 9  ;;  %v6267_v26 = vpop.f32.mrf.mxu0 }
 0x2d2   : > { %8251 = vst [vmem:[%s11718_s22 + $0x18] sm:$0xff] %v8211_v30  ;;  %v6564_v23 = vsel %vm6500_vm15, %v6468_v14, %v6532_v42  ;;  %v6530_v2 = vmul.f32 0.1, %v6466_v31  ;;  %v5775_v28 = vadd.f32 %v9418_v24, %v11592_v7  ;;  %v5773_v63 = vadd.f32 %v5674_v38, %v11595_v21 }
 0x2d3   : > { %v6897_v41 = vcombine.high %v6895_v61, %v6895_v61  ;;  %v8726_v0 = vrot.slane %v6896_v53, 9  ;;  %v8727_v19 = vrot.slane %v6895_v61, 9  ;;  %v7729_v25 = vmax.f32 %v6888_v17, %v8725_v32 }
 0x2d4   : > { %v6932_v8 = vcombine.high %v6564_v23, %v6564_v23  ;;  %v6939_v35 = vrot.slane %v6564_v23, %v11641_v62  ;;  %v6562_v44 = vsel %vm6498_vm0, %v6466_v31, %v6530_v2  ;;  %v6368_v54 = vadd.f32 %v9466_v12, %v5775_v28 }
 0x2d5   : > { %v8728_v10 = vrot.slane %v6897_v41, 9  ;;  %v7730_v16 = vmax.f32 %v6896_v53, %v8726_v0  ;;  %v7731_v57 = vmax.f32 %v6895_v61, %v8727_v19  ;;  %v7825_v6 = vmax.f32 %v7729_v25, %v7737_v37  ;;  %v11852_v53 = vld [vmem:[%s12011_s2] ss:$0 sm:$0xff] }
 0x2d6   : > { %v6946_v48 = vrot.slane %v6932_v8, %v11641_v62  ;;  %v6947_v7 = vcombine.high %v6939_v35, %v6939_v35  ;;  %v8737_v13 = vrot.slane %v6939_v35, 9  ;;  %v6898_v21 = vcombine.high %v6562_v44, %v6562_v44  ;;  %v9467_v8 = vpop.f32.mrf.mxu0 }
 0x2d7   : > { %v7732_v34 = vmax.f32 %v6897_v41, %v8728_v10  ;;  %v7826_v9 = vmax.f32 %v7730_v16, %v7738_v1  ;;  %v7827_v45 = vmax.f32 %v7731_v57, %v7739_v22  ;;  %v8052_v46 = vrot.slane %v7825_v6, %v11645_v4  ;;  %v9419_v1 = vpop.f32.mrf.mxu1 }
 0x2d8   : > { %v6948_v3 = vcombine.high %v6946_v48, %v6946_v48  ;;  %v8738_v43 = vrot.slane %v6947_v7, 9  ;;  %v8739_v24 = vrot.slane %v6946_v48, 9  ;;  %v7741_v18 = vmax.f32 %v6939_v35, %v8737_v13 }
 0x2d9   : > { %v7828_v60 = vmax.f32 %v7732_v34, %v7740_v51  ;;  %v8056_v55 = vrot.slane %v7826_v9, %v11645_v4  ;;  %v8060_v11 = vrot.slane %v7827_v45, %v11645_v4  ;;  %v6905_v37 = vrot.slane %v6562_v44, %v11641_v62  ;;  %v5677_v0 = vpop.f32.mrf.mxu1 }
 0x2da   : > { %v8740_v56 = vrot.slane %v6948_v3, 9  ;;  %v7742_v59 = vmax.f32 %v6947_v7, %v8738_v43  ;;  %v7743_v15 = vmax.f32 %v6946_v48, %v8739_v24  ;;  %v6912_v14 = vrot.slane %v6898_v21, %v11641_v62  ;;  %v6270_v24 = vpop.f32.mrf.mxu0 }
 0x2db   : > { %v8064_v22 = vrot.slane %v7828_v60, %v11645_v4  ;;  %v8212_v31 = vsel %vm8177_vm2, %v8056_v55, %v8052_v46  ;;  %v6913_v29 = vcombine.high %v6905_v37, %v6905_v37  ;;  %v8729_v20 = vrot.slane %v6905_v37, 9  ;;  %v9422_v45 = vpop.f32.mrf.mxu1 }
 0x2dc   : > { %v8213_v51 = vsel %vm8179_vm3, %v8060_v11, %v8212_v31  ;;  %v7744_v17 = vmax.f32 %v6948_v3, %v8740_v56  ;;  %v6914_v38 = vcombine.high %v6912_v14, %v6912_v14  ;;  %v8731_v5 = vrot.slane %v6912_v14, 9 }
 0x2dd   : > { %v8730_v42 = vrot.slane %v6913_v29, 9  ;;  %v7733_v30 = vmax.f32 %v6905_v37, %v8729_v20  ;;  %v8214_v61 = vsel %vm8181_vm4, %v8064_v22, %v8213_v51  ;;  %v6471_v32 = vadd.f32 %v11852_v53, %v6368_v54 }
 0x2de   : > { %v8732_v23 = vrot.slane %v6914_v38, 9  ;;  %v7735_v2 = vmax.f32 %v6912_v14, %v8731_v5  ;;  %v6366_v28 = vadd.f32 %v6267_v26, %v5773_v63  ;;  %v5776_v41 = vadd.f32 %v9419_v1, %v11598_v49 }
 0x2df   : > { %v7734_v19 = vmax.f32 %v6913_v29, %v8730_v42  ;;  %v7829_v25 = vmax.f32 %v7733_v30, %v7741_v18  ;;  %vm6503_vm1 = vcmp.gt.f32.partialorder %v6471_v32, 0.0  ;;  %v6535_v12 = vmul.f32 0.1, %v6471_v32  ;;  %v5690_v29 = vpop.f32.mrf.mxu1 }
 0x2e0   : > { %v7736_v35 = vmax.f32 %v6914_v38, %v8732_v23  ;;  %v7831_v44 = vmax.f32 %v7735_v2, %v7743_v15  ;;  %v6469_v10 = vadd.f32 %v11852_v53, %v6366_v28  ;;  %v6369_v16 = vadd.f32 %v9467_v8, %v5776_v41 }
 0x2e1   : > { %v7830_v57 = vmax.f32 %v7734_v19, %v7742_v59  ;;  %v8068_v6 = vrot.slane %v7829_v25, %v11645_v4  ;;  %v6567_v54 = vsel %vm6503_vm1, %v6471_v32, %v6535_v12  ;;  %v5774_v48 = vadd.f32 %v5677_v0, %v11601_v33  ;;  %v9470_v19 = vpop.f32.mrf.mxu0 }
 0x2e2   : > { %v7832_v63 = vmax.f32 %v7736_v35, %v7744_v17  ;;  %v8076_v49 = vrot.slane %v7831_v44, %v11645_v4  ;;  %v6983_v7 = vcombine.high %v6567_v54, %v6567_v54  ;;  %v6990_v13 = vrot.slane %v6567_v54, %v11641_v62 }
 0x2e3   : > { %v8072_v21 = vrot.slane %v7830_v57, %v11645_v4  ;;  %v8215_v34 = vsel %vm8183_vm7, %v8068_v6, %v8214_v61  ;;  %vm6501_vm5 = vcmp.gt.f32.partialorder %v6469_v10, 0.0  ;;  %v6533_v9 = vmul.f32 0.1, %v6469_v10 }
 0x2e4   : > { %v8080_v46 = vrot.slane %v7832_v63, %v11645_v4  ;;  %v6997_v3 = vrot.slane %v6983_v7, %v11641_v62  ;;  %v6998_v43 = vcombine.high %v6990_v13, %v6990_v13  ;;  %v8749_v33 = vrot.slane %v6990_v13, 9 }
 0x2e5   : > { %v8216_v18 = vsel %vm8185_vm8, %v8072_v21, %v8215_v34  ;;  %v6565_v60 = vsel %vm6501_vm5, %v6469_v10, %v6533_v9  ;;  %v6472_v55 = vadd.f32 %v11852_v53, %v6369_v16  ;;  %v6367_v11 = vadd.f32 %v6270_v24, %v5774_v48 }
 0x2e6   : > { %v8217_v37 = vsel %vm8187_vm9, %v8076_v49, %v8216_v18  ;;  %v6999_v56 = vcombine.high %v6997_v3, %v6997_v3  ;;  %v8750_v59 = vrot.slane %v6998_v43, 9  ;;  %v8751_v15 = vrot.slane %v6997_v3, 9 }
 0x2e7   : > { %v8218_v14 = vsel %vm8189_vm10, %v8080_v46, %v8217_v37  ;;  %v7753_v1 = vmax.f32 %v6990_v13, %v8749_v33  ;;  %v6949_v22 = vcombine.high %v6565_v60, %v6565_v60  ;;  %v6956_v31 = vrot.slane %v6565_v60, %v11641_v62 }
 0x2e8   : > { %8252 = vst [vmem:[%s11718_s22 + $0x20] sm:$0xff] %v8218_v14  ;;  %v8752_v20 = vrot.slane %v6999_v56, 9  ;;  %v7754_v26 = vmax.f32 %v6998_v43, %v8750_v59  ;;  %v7755_v51 = vmax.f32 %v6997_v3, %v8751_v15  ;;  %vm6504_vm6 = vcmp.gt.f32.partialorder %v6472_v55, 0.0  ;;  %v9423_v43 = vpop.f32.mrf.mxu1 }
 0x2e9   : > { %v6963_v17 = vrot.slane %v6949_v22, %v11641_v62  ;;  %v6964_v38 = vcombine.high %v6956_v31, %v6956_v31  ;;  %v8741_v5 = vrot.slane %v6956_v31, 9  ;;  %v6536_v42 = vmul.f32 0.1, %v6472_v55 }
 0x2ea   : > { %v7756_v30 = vmax.f32 %v6999_v56, %v8752_v20  ;;  %v6470_v61 = vadd.f32 %v11852_v53, %v6367_v11  ;;  %v5779_v32 = vadd.f32 %v9422_v45, %v11604_v36  ;;  %v5777_v23 = vadd.f32 %v5690_v29, %v11607_v52 }
 0x2eb   : > { %v6965_v2 = vcombine.high %v6963_v17, %v6963_v17  ;;  %v8742_v28 = vrot.slane %v6964_v38, 9  ;;  %v8743_v41 = vrot.slane %v6963_v17, 9  ;;  %v7745_v0 = vmax.f32 %v6956_v31, %v8741_v5 }
 0x2ec   : > { %v6568_v25 = vsel %vm6504_vm6, %v6472_v55, %v6536_v42  ;;  %vm6502_vm11 = vcmp.gt.f32.partialorder %v6470_v61, 0.0  ;;  %v6534_v12 = vmul.f32 0.1, %v6470_v61  ;;  %v6372_v8 = vadd.f32 %v9470_v19, %v5779_v32 }
 0x2ed   : > { %v8744_v35 = vrot.slane %v6965_v2, 9  ;;  %v7746_v44 = vmax.f32 %v6964_v38, %v8742_v28  ;;  %v7747_v10 = vmax.f32 %v6963_v17, %v8743_v41  ;;  %v7833_v16 = vmax.f32 %v7745_v0, %v7753_v1 }
 0x2ee   : > { %v7000_v57 = vcombine.high %v6568_v25, %v6568_v25  ;;  %v7007_v6 = vrot.slane %v6568_v25, %v11641_v62  ;;  %v6566_v54 = vsel %vm6502_vm11, %v6470_v61, %v6534_v12  ;;  %v6475_v36 = vadd.f32 %v11852_v53, %v6372_v8 }
 0x2ef   : > { %v7748_v52 = vmax.f32 %v6965_v2, %v8744_v35  ;;  %v7834_v48 = vmax.f32 %v7746_v44, %v7754_v26  ;;  %v7835_v63 = vmax.f32 %v7747_v10, %v7755_v51  ;;  %v8084_v49 = vrot.slane %v7833_v16, %v11645_v4  ;;  %v6283_v26 = vpop.f32.mrf.mxu0  ;;  %v5693_v51 = vpop.f32.mrf.mxu1 }
 0x2f0   : > { %v7014_v7 = vrot.slane %v7000_v57, %v11641_v62  ;;  %v7015_v13 = vcombine.high %v7007_v6, %v7007_v6  ;;  %v8753_v21 = vrot.slane %v7007_v6, 9  ;;  %v6966_v34 = vcombine.high %v6566_v54, %v6566_v54 }
 0x2f1   : > { %v7836_v9 = vmax.f32 %v7748_v52, %v7756_v30  ;;  %v8088_v45 = vrot.slane %v7834_v48, %v11645_v4  ;;  %v8092_v46 = vrot.slane %v7835_v63, %v11645_v4  ;;  %v6973_v3 = vrot.slane %v6566_v54, %v11641_v62  ;;  %v9471_v35 = vpop.f32.mrf.mxu0 }
 0x2f2   : > { %v7016_v33 = vcombine.high %v7014_v7, %v7014_v7  ;;  %v8754_v24 = vrot.slane %v7015_v13, 9  ;;  %v8755_v18 = vrot.slane %v7014_v7, 9  ;;  %v7757_v60 = vmax.f32 %v7007_v6, %v8753_v21 }
 0x2f3   : > { %v8096_v55 = vrot.slane %v7836_v9, %v11645_v4  ;;  %v8219_v11 = vsel %vm8177_vm2, %v8088_v45, %v8084_v49  ;;  %v6980_v37 = vrot.slane %v6966_v34, %v11641_v62  ;;  %v6981_v56 = vcombine.high %v6973_v3, %v6973_v3 }
 0x2f4   : > { %v8220_v59 = vsel %vm8179_vm3, %v8092_v46, %v8219_v11  ;;  %v8756_v15 = vrot.slane %v7016_v33, 9  ;;  %v7758_v14 = vmax.f32 %v7015_v13, %v8754_v24  ;;  %v7759_v1 = vmax.f32 %v7014_v7, %v8755_v18  ;;  %v9426_v13 = vpop.f32.mrf.mxu1 }
 0x2f5   : > { %v6982_v22 = vcombine.high %v6980_v37, %v6980_v37  ;;  %v8745_v31 = vrot.slane %v6973_v3, 9  ;;  %v8746_v29 = vrot.slane %v6981_v56, 9  ;;  %v8747_v20 = vrot.slane %v6980_v37, 9 }
 0x2f6   : > { %v7760_v17 = vmax.f32 %v7016_v33, %v8756_v15  ;;  %v8221_v38 = vsel %vm8181_vm4, %v8096_v55, %v8220_v59  ;;  %vm6507_vm12 = vcmp.gt.f32.partialorder %v6475_v36, 0.0  ;;  %v6539_v5 = vmul.f32 0.1, %v6475_v36 }
 0x2f7   : > { %v8748_v42 = vrot.slane %v6982_v22, 9  ;;  %v7749_v30 = vmax.f32 %v6973_v3, %v8745_v31  ;;  %v7750_v61 = vmax.f32 %v6981_v56, %v8746_v29  ;;  %v7751_v32 = vmax.f32 %v6980_v37, %v8747_v20  ;;  %v5706_v56 = vpop.f32.mrf.mxu1 }
 0x2f8   : > { %v6571_v2 = vsel %vm6507_vm12, %v6475_v36, %v6539_v5  ;;  %v6370_v28 = vadd.f32 %v6283_v26, %v5777_v23  ;;  %v5780_v41 = vadd.f32 %v9423_v43, %v11610_v40  ;;  %v5778_v0 = vadd.f32 %v5693_v51, %v11615_v50  ;;  %v6286_v43 = vpop.f32.mrf.mxu0 }
 0x2f9   : > { %v7752_v19 = vmax.f32 %v6982_v22, %v8748_v42  ;;  %v7837_v25 = vmax.f32 %v7749_v30, %v7757_v60  ;;  %v7838_v12 = vmax.f32 %v7750_v61, %v7758_v14  ;;  %v7839_v8 = vmax.f32 %v7751_v32, %v7759_v1 }
 0x2fa   : > { %v7051_v44 = vcombine.high %v6571_v2, %v6571_v2  ;;  %v7058_v10 = vrot.slane %v6571_v2, %v11641_v62  ;;  %v6473_v16 = vadd.f32 %v11852_v53, %v6370_v28  ;;  %v6373_v57 = vadd.f32 %v9471_v35, %v5780_v41  ;;  %v9474_v26 = vpop.f32.mrf.mxu0  ;;  %v9427_v2 = vpop.f32.mrf.mxu1 }
 0x2fb   : > { %v7840_v6 = vmax.f32 %v7752_v19, %v7760_v17  ;;  %v8100_v54 = vrot.slane %v7837_v25, %v11645_v4  ;;  %v8104_v23 = vrot.slane %v7838_v12, %v11645_v4  ;;  %v8108_v40 = vrot.slane %v7839_v8, %v11645_v4 }
 0x2fc   : > { %v7065_v50 = vrot.slane %v7051_v44, %v11641_v62  ;;  %v7066_v36 = vcombine.high %v7058_v10, %v7058_v10  ;;  %v8765_v52 = vrot.slane %v7058_v10, 9  ;;  %vm6505_vm13 = vcmp.gt.f32.partialorder %v6473_v16, 0.0  ;;  %v6299_v35 = vpop.f32.mrf.mxu0 }
 0x2fd   : > { %v8112_v48 = vrot.slane %v7840_v6, %v11645_v4  ;;  %v8222_v63 = vsel %vm8183_vm7, %v8100_v54, %v8221_v38  ;;  %v6537_v49 = vmul.f32 0.1, %v6473_v16  ;;  %v6476_v7 = vadd.f32 %v11852_v53, %v6373_v57 }
 0x2fe   : > { %v8223_v21 = vsel %vm8185_vm8, %v8104_v23, %v8222_v63  ;;  %v7067_v34 = vcombine.high %v7065_v50, %v7065_v50  ;;  %v8766_v9 = vrot.slane %v7066_v36, 9  ;;  %v8767_v45 = vrot.slane %v7065_v50, 9 }
 0x2ff   : > { %v8224_v46 = vsel %vm8187_vm9, %v8108_v40, %v8223_v21  ;;  %v6569_v3 = vsel %vm6505_vm13, %v6473_v16, %v6537_v49  ;;  %v7769_v18 = vmax.f32 %v7058_v10, %v8765_v52  ;;  %vm6508_vm14 = vcmp.gt.f32.partialorder %v6476_v7, 0.0 }
 0x300   : > { %v8225_v33 = vsel %vm8189_vm10, %v8112_v48, %v8224_v46  ;;  %v8768_v24 = vrot.slane %v7067_v34, 9  ;;  %v7017_v60 = vcombine.high %v6569_v3, %v6569_v3  ;;  %v7024_v55 = vrot.slane %v6569_v3, %v11641_v62 }
 0x301   : > { %8253 = vst [vmem:[%s11718_s22 + $0x28] sm:$0xff] %v8225_v33  ;;  %v6540_v11 = vmul.f32 0.1, %v6476_v7  ;;  %v6371_v37 = vadd.f32 %v6286_v43, %v5778_v0  ;;  %v7770_v59 = vmax.f32 %v7066_v36, %v8766_v9  ;;  %v7771_v15 = vmax.f32 %v7065_v50, %v8767_v45 }
 0x302   : > { %v7772_v14 = vmax.f32 %v7067_v34, %v8768_v24  ;;  %v5783_v1 = vadd.f32 %v9426_v13, %v11619_v27  ;;  %v7031_v22 = vrot.slane %v7017_v60, %v11641_v62  ;;  %v7032_v31 = vcombine.high %v7024_v55, %v7024_v55 }
 0x303   : > { %v8757_v29 = vrot.slane %v7024_v55, 9  ;;  %v6572_v20 = vsel %vm6508_vm14, %v6476_v7, %v6540_v11  ;;  %v6474_v38 = vadd.f32 %v11852_v53, %v6371_v37  ;;  %v5781_v5 = vadd.f32 %v5706_v56, %v11624_v58  ;;  %v9475_v7 = vpop.f32.mrf.mxu0 }
 0x304   : > { %v7068_v51 = vcombine.high %v6572_v20, %v6572_v20  ;;  %v7075_v17 = vrot.slane %v6572_v20, %v11641_v62  ;;  %v7033_v42 = vcombine.high %v7031_v22, %v7031_v22  ;;  %v8758_v30 = vrot.slane %v7032_v31, 9 }
 0x305   : > { %v8759_v61 = vrot.slane %v7031_v22, 9  ;;  %v7761_v32 = vmax.f32 %v7024_v55, %v8757_v29  ;;  %v6376_v0 = vadd.f32 %v9474_v26, %v5783_v1  ;;  %vm6506_vm15 = vcmp.gt.f32.partialorder %v6474_v38, 0.0 }
 0x306   : > { %v7082_v27 = vrot.slane %v7068_v51, %v11641_v62  ;;  %v7083_v28 = vcombine.high %v7075_v17, %v7075_v17  ;;  %v8769_v41 = vrot.slane %v7075_v17, 9  ;;  %v8760_v19 = vrot.slane %v7033_v42, 9 }
 0x307   : > { %v7762_v25 = vmax.f32 %v7032_v31, %v8758_v30  ;;  %v7763_v12 = vmax.f32 %v7031_v22, %v8759_v61  ;;  %v7841_v8 = vmax.f32 %v7761_v32, %v7769_v18  ;;  %v5784_v58 = vadd.f32 %v9427_v2, %v11627_v47 }
 0x308   : > { %v7084_v44 = vcombine.high %v7082_v27, %v7082_v27  ;;  %v8770_v10 = vrot.slane %v7083_v28, 9  ;;  %v7764_v16 = vmax.f32 %v7033_v42, %v8760_v19  ;;  %v8771_v54 = vrot.slane %v7082_v27, 9 }
 0x309   : > { %v7842_v57 = vmax.f32 %v7762_v25, %v7770_v59  ;;  %v7843_v6 = vmax.f32 %v7763_v12, %v7771_v15  ;;  %v8116_v23 = vrot.slane %v7841_v8, %v11645_v4  ;;  %v7773_v50 = vmax.f32 %v7075_v17, %v8769_v41 }
 0x30a   : > { %v8772_v40 = vrot.slane %v7084_v44, 9  ;;  %v6538_v36 = vmul.f32 0.1, %v6474_v38  ;;  %v7844_v52 = vmax.f32 %v7764_v16, %v7772_v14  ;;  %v6479_v49 = vadd.f32 %v11852_v53, %v6376_v0 }
 0x30b   : > { %v8120_v48 = vrot.slane %v7842_v57, %v11645_v4  ;;  %v8124_v63 = vrot.slane %v7843_v6, %v11645_v4  ;;  %v7774_v13 = vmax.f32 %v7083_v28, %v8770_v10  ;;  %v6374_v21 = vadd.f32 %v6299_v35, %v5781_v5 }
 0x30c   : > { %v6570_v47 = vsel %vm6506_vm15, %v6474_v38, %v6538_v36  ;;  %v6377_v34 = vadd.f32 %v9475_v7, %v5784_v58  ;;  %v8128_v9 = vrot.slane %v7844_v52, %v11645_v4  ;;  %vm6511_vm0 = vcmp.gt.f32.partialorder %v6479_v49, 0.0  ;;  %v5709_v52 = vpop.f32.mrf.mxu1 }
 0x30d   : > { %v8226_v45 = vsel %vm8177_vm2, %v8120_v48, %v8116_v23  ;;  %v7034_v46 = vcombine.high %v6570_v47, %v6570_v47  ;;  %v7041_v3 = vrot.slane %v6570_v47, %v11641_v62  ;;  %v6543_v33 = vmul.f32 0.1, %v6479_v49 }
 0x30e   : > { %v8227_v43 = vsel %vm8179_vm3, %v8124_v63, %v8226_v45  ;;  %v6477_v24 = vadd.f32 %v11852_v53, %v6374_v21  ;;  %v7775_v37 = vmax.f32 %v7082_v27, %v8771_v54  ;;  %v6480_v26 = vadd.f32 %v11852_v53, %v6377_v34 }
 0x30f   : > { %v7048_v18 = vrot.slane %v7034_v46, %v11641_v62  ;;  %v7049_v60 = vcombine.high %v7041_v3, %v7041_v3  ;;  %v8761_v55 = vrot.slane %v7041_v3, 9  ;;  %v8228_v11 = vsel %vm8181_vm4, %v8128_v9, %v8227_v43 }
 0x310   : > { %v6575_v56 = vsel %vm6511_vm0, %v6479_v49, %v6543_v33  ;;  %vm6509_vm1 = vcmp.gt.f32.partialorder %v6477_v24, 0.0  ;;  %v6541_v59 = vmul.f32 0.1, %v6477_v24  ;;  %v7776_v42 = vmax.f32 %v7084_v44, %v8772_v40 }
 0x311   : > { %v7050_v15 = vcombine.high %v7048_v18, %v7048_v18  ;;  %v8762_v14 = vrot.slane %v7049_v60, 9  ;;  %v8763_v1 = vrot.slane %v7048_v18, 9  ;;  %v7765_v22 = vmax.f32 %v7041_v3, %v8761_v55 }
 0x312   : > { %v7119_v31 = vcombine.high %v6575_v56, %v6575_v56  ;;  %v7126_v29 = vrot.slane %v6575_v56, %v11641_v62  ;;  %v6573_v20 = vsel %vm6509_vm1, %v6477_v24, %v6541_v59  ;;  %vm6512_vm5 = vcmp.gt.f32.partialorder %v6480_v26, 0.0 }
 0x313   : > { %v8764_v51 = vrot.slane %v7050_v15, 9  ;;  %v7766_v17 = vmax.f32 %v7049_v60, %v8762_v14  ;;  %v7767_v38 = vmax.f32 %v7048_v18, %v8763_v1  ;;  %v7845_v5 = vmax.f32 %v7765_v22, %v7773_v50  ;;  %v6302_v18 = vpop.f32.mrf.mxu0 }
 0x314   : > { %v7133_v30 = vrot.slane %v7119_v31, %v11641_v62  ;;  %v7134_v61 = vcombine.high %v7126_v29, %v7126_v29  ;;  %v7085_v32 = vcombine.high %v6573_v20, %v6573_v20  ;;  %v8781_v35 = vrot.slane %v7126_v29, 9 }
 0x315   : > { %v7768_v2 = vmax.f32 %v7050_v15, %v8764_v51  ;;  %v7846_v27 = vmax.f32 %v7766_v17, %v7774_v13  ;;  %v7847_v28 = vmax.f32 %v7767_v38, %v7775_v37  ;;  %v8132_v41 = vrot.slane %v7845_v5, %v11645_v4 }
 0x316   : > { %v7135_v0 = vcombine.high %v7133_v30, %v7133_v30  ;;  %v8782_v44 = vrot.slane %v7134_v61, 9  ;;  %v8783_v10 = vrot.slane %v7133_v30, 9  ;;  %v7092_v58 = vrot.slane %v6573_v20, %v11641_v62 }
 0x317   : > { %v7848_v19 = vmax.f32 %v7768_v2, %v7776_v42  ;;  %v8136_v25 = vrot.slane %v7846_v27, %v11645_v4  ;;  %v8140_v12 = vrot.slane %v7847_v28, %v11645_v4  ;;  %v8229_v8 = vsel %vm8183_vm7, %v8132_v41, %v8228_v11 }
 0x318   : > { %v7099_v6 = vrot.slane %v7085_v32, %v11641_v62  ;;  %v6544_v54 = vmul.f32 0.1, %v6480_v26  ;;  %v8784_v40 = vrot.slane %v7135_v0, 9  ;;  %v7100_v50 = vcombine.high %v7092_v58, %v7092_v58 }
 0x319   : > { %v8144_v16 = vrot.slane %v7848_v19, %v11645_v4  ;;  %v8230_v57 = vsel %vm8185_vm8, %v8136_v25, %v8229_v8  ;;  %v8773_v36 = vrot.slane %v7092_v58, 9  ;;  %v7785_v13 = vmax.f32 %v7126_v29, %v8781_v35 }
 0x31a   : > { %v8231_v23 = vsel %vm8187_vm9, %v8140_v12, %v8230_v57  ;;  %v7101_v63 = vcombine.high %v7099_v6, %v7099_v6  ;;  %v8775_v49 = vrot.slane %v7099_v6, 9  ;;  %v6576_v7 = vsel %vm6512_vm5, %v6480_v26, %v6544_v54 }
 0x31b   : > { %v8232_v48 = vsel %vm8189_vm10, %v8144_v16, %v8231_v23  ;;  %v8774_v47 = vrot.slane %v7100_v50, 9  ;;  %v7777_v21 = vmax.f32 %v7092_v58, %v8773_v36  ;;  %v7787_v34 = vmax.f32 %v7133_v30, %v8783_v10 }
 0x31c   : > { %8254 = vst [vmem:[%s11718_s22 + $0x30] sm:$0xff] %v8232_v48  ;;  %v8776_v9 = vrot.slane %v7101_v63, 9  ;;  %v7779_v45 = vmax.f32 %v7099_v6, %v8775_v49  ;;  %v5782_v46 = vadd.f32 %v5709_v52, %v11632_v39  ;;  %v7786_v3 = vmax.f32 %v7134_v61, %v8782_v44 }
 0x31d   : > { %v7778_v43 = vmax.f32 %v7100_v50, %v8774_v47  ;;  %v7849_v33 = vmax.f32 %v7777_v21, %v7785_v13  ;;  %v7136_v24 = vcombine.high %v6576_v7, %v6576_v7  ;;  %v7788_v60 = vmax.f32 %v7135_v0, %v8784_v40 }
 0x31e   : > { %v7780_v55 = vmax.f32 %v7101_v63, %v8776_v9  ;;  %v7851_v11 = vmax.f32 %v7779_v45, %v7787_v34  ;;  %v6375_v37 = vadd.f32 %v6302_v18, %v5782_v46  ;;  %v7143_v59 = vrot.slane %v6576_v7, %v11641_v62 }
 0x31f   : > { %v7850_v56 = vmax.f32 %v7778_v43, %v7786_v3  ;;  %v8148_v1 = vrot.slane %v7849_v33, %v11645_v4  ;;  %v7150_v39 = vrot.slane %v7136_v24, %v11641_v62 }
 0x320   : > { %v7852_v15 = vmax.f32 %v7780_v55, %v7788_v60  ;;  %v8156_v14 = vrot.slane %v7851_v11, %v11645_v4  ;;  %v6478_v31 = vadd.f32 %v11852_v53, %v6375_v37  ;;  %v7151_v26 = vcombine.high %v7143_v59, %v7143_v59 }
 0x321   : > { %v8152_v22 = vrot.slane %v7850_v56, %v11645_v4  ;;  %v7152_v38 = vcombine.high %v7150_v39, %v7150_v39  ;;  %v8785_v5 = vrot.slane %v7143_v59, 9  ;;  %v8787_v27 = vrot.slane %v7150_v39, 9 }
 0x322   : > { %v8160_v29 = vrot.slane %v7852_v15, %v11645_v4  ;;  %vm6510_vm6 = vcmp.gt.f32.partialorder %v6478_v31, 0.0  ;;  %v6542_v51 = vmul.f32 0.1, %v6478_v31  ;;  %v8786_v2 = vrot.slane %v7151_v26, 9 }
 0x323   : > { %v8233_v20 = vsel %vm8177_vm2, %v8152_v22, %v8148_v1  ;;  %v8788_v0 = vrot.slane %v7152_v38, 9  ;;  %v7789_v19 = vmax.f32 %v7143_v59, %v8785_v5  ;;  %v7791_v10 = vmax.f32 %v7150_v39, %v8787_v27 }
 0x324   : > { %v8234_v17 = vsel %vm8179_vm3, %v8156_v14, %v8233_v20  ;;  %v6574_v42 = vsel %vm6510_vm6, %v6478_v31, %v6542_v51  ;;  %v7790_v44 = vmax.f32 %v7151_v26, %v8786_v2 }
 0x325   : > { %v8235_v30 = vsel %vm8181_vm4, %v8160_v29, %v8234_v17  ;;  %v7102_v61 = vcombine.high %v6574_v42, %v6574_v42  ;;  %v7109_v32 = vrot.slane %v6574_v42, %v11641_v62  ;;  %v7792_v54 = vmax.f32 %v7152_v38, %v8788_v0 }
 0x327   : > { %v7116_v53 = vrot.slane %v7102_v61, %v11641_v62  ;;  %v7117_v28 = vcombine.high %v7109_v32, %v7109_v32  ;;  %v8777_v41 = vrot.slane %v7109_v32, 9 }
 0x329   : > { %v7118_v25 = vcombine.high %v7116_v53, %v7116_v53  ;;  %v8778_v12 = vrot.slane %v7117_v28, 9  ;;  %v8779_v8 = vrot.slane %v7116_v53, 9  ;;  %v7781_v35 = vmax.f32 %v7109_v32, %v8777_v41 }
 0x32b   : > { %v8780_v58 = vrot.slane %v7118_v25, 9  ;;  %v7782_v16 = vmax.f32 %v7117_v28, %v8778_v12  ;;  %v7783_v57 = vmax.f32 %v7116_v53, %v8779_v8  ;;  %v7853_v6 = vmax.f32 %v7781_v35, %v7789_v19 }
 0x32d   : > { %v7784_v23 = vmax.f32 %v7118_v25, %v8780_v58  ;;  %v7854_v62 = vmax.f32 %v7782_v16, %v7790_v44  ;;  %v7855_v40 = vmax.f32 %v7783_v57, %v7791_v10  ;;  %v8164_v50 = vrot.slane %v7853_v6, %v11645_v4 }
 0x32f   : > { %v7856_v36 = vmax.f32 %v7784_v23, %v7792_v54  ;;  %v8168_v52 = vrot.slane %v7854_v62, %v11645_v4  ;;  %v8172_v48 = vrot.slane %v7855_v40, %v11645_v4  ;;  %v8236_v63 = vsel %vm8183_vm7, %v8164_v50, %v8235_v30 }
 0x331   : > { %v8176_v49 = vrot.slane %v7856_v36, %v11645_v4  ;;  %v8237_v7 = vsel %vm8185_vm8, %v8168_v52, %v8236_v63 }
 0x332   : > { %v8238_v13 = vsel %vm8187_vm9, %v8172_v48, %v8237_v7 }
 0x333   : > { %v8239_v47 = vsel %vm8189_vm10, %v8176_v49, %v8238_v13 }
 0x334   : > { %8255 = vst [vmem:[%s11718_s22 + $0x38] sm:$0xff] %v8239_v47 }
 0x335   : > { %9746 = shalt.err (!%p9743_p0)
}
 0x336   : > { %s9747_s28 = scalar_lea.hbm %s11961_s9, 1024  ;;  %s9751_s20 = scalar_lea.hbm %s12012_s3, 2048 }
 0x337   : > { %p9748_p5 = scmp.ne.s32.totalorder %s11961_s9, %s9747_s28  ;;  %p9752_p4 = scmp.lt.s32.totalorder %s11961_s9, %s12012_s3 }
 0x338   : > { %p9753_p6 = scmp.lt.s32.totalorder %s9751_s20, %s9747_s28 }
 0x339   : > { %p9749_p9 = pnand %p9748_p5, %p12122_p11 }
 0x33a   : > { %p9754_p8 = por %p9753_p6, %p9752_p4 }
 0x33b   : > { %p9750_p1 = pneg %p9749_p9 }
 0x33d   : > { %p9755_p3 = pnand %p9754_p8, %p9750_p1 }
 0x33f   : > { %9758 = shalt.err (!%p9755_p3)
}
 0x340   : > { %s9812_s23 = smov 128   ;;  %s9813_s25 = smov 8  }
 0x341   : > { %9498 = dma.vmem_to_hbm [thread:$0]  (%p12122_p11), %s11963_s4, 1024, %s11961_s9, %s8257_s16, %s9812_s23, %s9812_s23, %s9813_s25  }
 0x342 PF: > { %s8285_s30 = sand.u32 1, %s9789_s12   ;;  %p12123_p7 = scmp.ne.s32.totalorder %s12019_s19, 0 }
 0x343   : > { %p12124_p12 = scmp.ge.s32.totalorder %s9801_s15, 2  ;;  %s8286_s7 = scalar_lea.sflag [#allocation6], %s8285_s30 }
 0x345   : > { %p9509_p10 = pnand %p12124_p12, %p12123_p7 }
 0x347   : > { %p9510_p2 = pneg %p9509_p10 }
 0x349   : > { %9784 = dma.done.wait (%p9510_p2), %s8286_s7, 1024  }
 0x34a   : > { %9786 = vsyncadd (%p9510_p2), %s8286_s7, 4294966272  ;;  %p17_p13 = scmp.ge.s32.totalorder %s9888_s24, 4   ;;  %s12125_s12 = smov %s9793_s13 }
 0x34b   : > { %s12126_s13 = smov %s9797_s14  ;;  %s12127_s14 = smov %s9905_s5 }
 0x34c   : > { %s12128_s15 = smov %s9888_s24  ;;  %19 = sbr.rel (!%p17_p13) target bundleno = 6 (0x6), region = 84 }
 0x351   :  { %8291 = vsyncpa [#allocation5], 1 }
 0x352   :  { %8293 = vsyncpa [#allocation5 + $0x1], 1 }
 0x353   :  { %8294 = vsyncpa [#allocation8], 1 }
 0x354   :  { %8295 = vsyncpa [#allocation6], 1 }
 0x355   :  { %8297 = vsyncpa [#allocation6 + $0x1], 1 }

</bundles_post_ra>
